<compile_context>
chip_gen: v7x
topology: tpu7x:2x2x1
jax: 0.10.0
libtpu: 0.0.40
codegen_flags: <defaults>
</compile_context>

<pallas_src>
import numpy as np

import jax
import jax.numpy as jnp
from jax.experimental import pallas as pl
from jax.experimental.pallas import tpu as pltpu


# ----------------------------------------------------------------------------
# Network geometry (fixed by the module: three Conv2d k=(4,2), s=2, p=1,
# MaxPool2d(2) after conv2; input spatial (64, 10) so the flatten is 64*4*2
# = 512 as required by Linear(512, 256)).
# ----------------------------------------------------------------------------
B = 2                              # batch size used in this script
H0, W0 = 64, 10                    # input spatial size
KH, KW, STRIDE, PAD = 4, 2, 2, 1
KK = KH * KW                       # 8 taps per conv kernel
C1, C2, C3 = 16, 32, 64            # conv output channels
H1, W1 = 32, 6                     # after conv1
H2, W2 = 16, 4                     # after conv2
HP, WP = 8, 2                      # after MaxPool2d(2)
H3, W3 = 4, 2                      # after conv3
SPOS = H3 * W3                     # 8 spatial positions entering the flatten
P1 = H1 * W1                       # 192 conv1 positions per sample
P1PAD = 256                        # padded to 2 lane blocks (128-aligned slices)
P2 = H2 * W2                       # 64 conv2 positions per sample
PP = HP * WP                       # 16 pooled positions per sample
NF1 = 256                          # fc1 width


# ----------------------------------------------------------------------------
# Precomputed 0/1 selection matrices (shape-only constants, shipped as bf16:
# selection entries are exact in bf16, so the gather matmuls are exact up to
# the bf16 rounding of the activations they gather).
# ----------------------------------------------------------------------------
def build_constants():
    bf16 = jnp.bfloat16

    # conv2: per-sample, transposed, per-tap selection  (KK, P1PAD, P2).
    # Row pin (< 192) of block k selects conv1 position pin for the output
    # position in that column; rows 192..255 are zero (lane padding).
    s2 = np.zeros((KK, P1PAD, P2), np.float32)
    for k in range(KK):
        i, j = divmod(k, KW)
        for ho in range(H2):
            for wo in range(W2):
                hi, wi = STRIDE * ho + i - PAD, STRIDE * wo + j - PAD
                if 0 <= hi < H1 and 0 <= wi < W1:
                    s2[k, hi * W1 + wi, ho * W2 + wo] = 1.0

    # maxpool: batch-blocked quadrant row-gathers  (4, B*PP, B*P2),
    # applied to the row-oriented h2 (rows = (b, h2, w2)).
    pq = np.zeros((4, B * PP, B * P2), np.float32)
    for q in range(4):
        qi, qj = divmod(q, 2)
        for b in range(B):
            for hp in range(HP):
                for wp in range(WP):
                    pq[q, b * PP + hp * WP + wp,
                       b * P2 + (2 * hp + qi) * W2 + (2 * wp + qj)] = 1.0

    # conv3: batch-blocked row-gathers (KK, SPOS*B, B*PP); output rows are
    # ordered (spatial, batch) so the NCHW flatten becomes contiguous
    # 2-row slices later on.
    s3 = np.zeros((KK, SPOS * B, B * PP), np.float32)
    for k in range(KK):
        i, j = divmod(k, KW)
        for ho3 in range(H3):
            for wo3 in range(W3):
                s = ho3 * W3 + wo3
                hi, wi = STRIDE * ho3 + i - PAD, STRIDE * wo3 + j - PAD
                if 0 <= hi < HP and 0 <= wi < WP:
                    for b in range(B):
                        s3[k, s * B + b, b * PP + hi * WP + wi] = 1.0

    return {"s2t": jnp.asarray(s2, bf16),
            "pq": jnp.asarray(pq, bf16),
            "s3": jnp.asarray(s3, bf16)}


# ----------------------------------------------------------------------------
# The single fused Pallas kernel
# ----------------------------------------------------------------------------
def _discriminator_kernel(p1_ref, w1_ref, b1_ref,
                          s2_ref, w2_ref, b2_ref,
                          pq_ref,
                          s3_ref, w3_ref, b3_ref,
                          wf1_hbm, bf1_ref, wf2_ref, bf2_ref,
                          o_ref,
                          wf1_vmem, wf1_sem):
    f32 = jnp.float32
    bf16 = jnp.bfloat16

    # Prefetch fc1 weights (bf16, 256 KB) from HBM; the transfer hides behind
    # conv1..conv3 and is only waited on right before fc1.
    wf1_cp = pltpu.make_async_copy(wf1_hbm, wf1_vmem, wf1_sem.at[0])
    wf1_cp.start()

    # ---- conv1 + ReLU: channel-major, lane-dense VPU MAC (K = 8) ------------
    p1 = p1_ref[...]                                   # (8, B*256)
    w1 = w1_ref[...]                                   # (16, 8)
    acc1 = jnp.zeros((C1, B * P1PAD), f32)
    for k in range(KK):
        acc1 = acc1 + w1[:, k:k + 1] * p1[k:k + 1, :]
    h1 = jnp.maximum(acc1 + b1_ref[...], 0.0)          # (16, 512)
    h1_bf = h1.astype(bf16)

    # Stack the two per-sample 256-column blocks on rows: (B*C1, 256).
    H = jnp.concatenate(
        [h1_bf[:, b * P1PAD:(b + 1) * P1PAD] for b in range(B)], axis=0)

    # ---- conv2 + ReLU: per-tap bf16 gather matmuls (shared across batch),
    #      then one weight matmul per sample -----------------------------------
    w2 = w2_ref[...]                                   # (32, KK*C1) f32
    g_taps = [jnp.dot(H, s2_ref[k], preferred_element_type=f32)   # (32, 64)
              for k in range(KK)]
    h2_rows = []
    for b in range(B):
        Gb = jnp.concatenate([g[b * C1:(b + 1) * C1, :] for g in g_taps],
                             axis=0)                   # (128, 64)
        accb = jnp.dot(w2, Gb, preferred_element_type=f32)        # (32, 64)
        h2t_b = jnp.maximum(accb + b2_ref[...], 0.0)
        # one tiny transpose per sample moves positions back onto rows for
        # the pool / conv3 / flatten stages
        h2_rows.append(jnp.transpose(h2t_b))           # (64, 32)
    h2 = jnp.concatenate(h2_rows, axis=0).astype(bf16)  # (128, 32), rows (b,pos)

    # ---- MaxPool2d(2): elementwise max over four quadrant row-gathers --------
    pooled = jnp.dot(pq_ref[0], h2, preferred_element_type=f32)   # (32, 32)
    for q in range(1, 4):
        pooled = jnp.maximum(
            pooled, jnp.dot(pq_ref[q], h2, preferred_element_type=f32))
    pooled_bf = pooled.astype(bf16)    # exact: entries are gathered bf16 values

    # ---- conv3 + ReLU: rows ordered (spatial, batch) -------------------------
    acc3 = jnp.zeros((SPOS * B, C3), f32)
    for k in range(KK):
        g = jnp.dot(s3_ref[k], pooled_bf, preferred_element_type=f32)  # (16, 32)
        acc3 = acc3 + jnp.dot(g, w3_ref[k], preferred_element_type=f32)
    h3 = jnp.maximum(acc3 + b3_ref[...], 0.0)          # (16, 64), rows (s, b)
    h3_bf = h3.astype(bf16)

    # ---- flatten + fc1 + tanh -------------------------------------------------
    # PyTorch's NCHW view(B, 512) flatten is realized by the host-side row
    # permutation of wf1 (row s*C3 + c), so fc1 reduces to contiguous 2-row
    # slices of h3 against contiguous 64-row blocks of wf1 -- no flatten
    # selection matrix, no padding rows.
    wf1_cp.wait()
    zacc = jnp.zeros((B, NF1), f32)
    for s in range(SPOS):
        zacc = zacc + jnp.dot(h3_bf[s * B:(s + 1) * B, :],
                              wf1_vmem[s * C3:(s + 1) * C3, :],
                              preferred_element_type=f32)
    z = jnp.tanh(zacc + bf1_ref[...])                  # (2, 256)

    # ---- fc2 + sigmoid (N=1: lane reduce) ------------------------------------
    logits = jnp.sum(z * wf2_ref[...], axis=1, keepdims=True) + bf2_ref[...]
    o_ref[...] = jax.nn.sigmoid(logits).astype(o_ref.dtype)


# ----------------------------------------------------------------------------
# Parameters (PyTorch-shaped) and one-time re-layout into kernel layout
# ----------------------------------------------------------------------------
def init_params(key):
    ks = jax.random.split(key, 10)

    def u(k, shape, fan_in):
        bound = 1.0 / np.sqrt(float(fan_in))
        return jax.random.uniform(k, shape, jnp.float32, -bound, bound)

    return {
        "w1": u(ks[0], (C1, 1, KH, KW), 1 * KH * KW),
        "b1": u(ks[1], (C1,), 1 * KH * KW),
        "w2": u(ks[2], (C2, C1, KH, KW), C1 * KH * KW),
        "b2": u(ks[3], (C2,), C1 * KH * KW),
        "w3": u(ks[4], (C3, C2, KH, KW), C2 * KH * KW),
        "b3": u(ks[5], (C3,), C2 * KH * KW),
        "fc1_w": u(ks[6], (NF1, 512), 512),
        "fc1_b": u(ks[7], (NF1,), 512),
        "fc2_w": u(ks[8], (1, NF1), NF1),
        "fc2_b": u(ks[9], (1,), NF1),
    }


def prepare_params(p):
    """One-time re-layout of PyTorch-shaped params into the kernel layout."""
    # conv2 weights flattened as (Cout, k*Cin + cin) to match the row order of
    # the stacked per-tap gather result.
    w2f = jnp.transpose(p["w2"], (0, 2, 3, 1)).reshape(C2, KK * C1)
    # conv3 weights per tap: (KK, Cin, Cout).
    w3f = jnp.transpose(p["w3"], (2, 3, 1, 0)).reshape(KK, C2, C3)
    # fc1 weight rows permuted from PyTorch's (channel, spatial) flatten to
    # the kernel's (spatial, channel) column order: row s*C3 + c.  Shipped
    # bf16 (halves its DMA; ~1e-3 relative rounding).
    wf1 = jnp.transpose(p["fc1_w"].reshape(NF1, C3, SPOS), (2, 1, 0)).reshape(
        SPOS * C3, NF1).astype(jnp.bfloat16)

    return {
        "w1t": p["w1"].reshape(C1, KK),
        "b1c": p["b1"].reshape(C1, 1),
        "w2f": w2f,
        "b2c": p["b2"].reshape(C2, 1),
        "w3f": w3f,
        "b3r": p["b3"].reshape(1, C3),
        "wf1": wf1,
        "bf1": p["fc1_b"].reshape(1, NF1),
        "wf2": p["fc2_w"].reshape(1, NF1),
        "bf2": p["fc2_b"].reshape(1, 1),
    }


# ----------------------------------------------------------------------------
# Forward pass: conv1 im2col in glue (transposed, lane-padded) + ONE pallas_call
# ----------------------------------------------------------------------------
def _conv1_patches(x):
    """x (B,1,H0,W0) -> transposed conv1 patch matrix (KK, B*P1PAD) f32."""
    xp = jnp.pad(x[:, 0], ((0, 0), (PAD, PAD), (PAD, PAD)))       # (B, 66, 12)
    taps = []
    for k in range(KK):
        i, j = divmod(k, KW)
        t = xp[:, i:i + STRIDE * H1:STRIDE, j:j + STRIDE * W1:STRIDE]  # (B,32,6)
        t = t.reshape(B, P1)
        t = jnp.pad(t, ((0, 0), (0, P1PAD - P1)))                  # lane padding
        taps.append(t.reshape(1, B * P1PAD))
    return jnp.concatenate(taps, axis=0)                           # (8, 512)


def discriminator_forward(kparams, consts, x):
    """x: (B, 1, 64, 10) NCHW float32 -> (B, 1) probabilities."""
    p1 = _conv1_patches(x)

    args = (p1, kparams["w1t"], kparams["b1c"],
            consts["s2t"], kparams["w2f"], kparams["b2c"],
            consts["pq"],
            consts["s3"], kparams["w3f"], kparams["b3r"],
            kparams["wf1"], kparams["bf1"], kparams["wf2"], kparams["bf2"])

    def vspec(a):
        return pl.BlockSpec(a.shape, lambda: (0,) * a.ndim)

    # wf1 stays in HBM (memory_space=pl.ANY) and is DMA'd manually so its
    # transfer overlaps the conv compute; everything else is small and lands
    # in VMEM up front via full-array BlockSpecs.
    in_specs = ([vspec(a) for a in args[:10]]
                + [pl.BlockSpec(memory_space=pl.ANY)]
                + [vspec(a) for a in args[11:]])

    return pl.pallas_call(
        _discriminator_kernel,
        out_shape=jax.ShapeDtypeStruct((B, 1), jnp.float32),
        in_specs=in_specs,
        out_specs=pl.BlockSpec((B, 1), lambda: (0, 0)),
        scratch_shapes=[pltpu.VMEM((SPOS * C3, NF1), jnp.bfloat16),
                        pltpu.SemaphoreType.DMA((1,))],
    )(*args)


# ----------------------------------------------------------------------------
# Pure-JAX reference (PyTorch semantics) for an in-script correctness check
# ----------------------------------------------------------------------------
def _reference_forward(params, x):
    prec = jax.lax.Precision.HIGHEST

    def conv_relu(h, w, b):
        cout, cin, kh, kw = w.shape
        bn, c, hgt, wid = h.shape
        ho = (hgt + 2 * PAD - kh) // STRIDE + 1
        wo = (wid + 2 * PAD - kw) // STRIDE + 1
        hpad = jnp.pad(h, ((0, 0), (0, 0), (PAD, PAD), (PAD, PAD)))
        cols = []
        for i in range(kh):
            for j in range(kw):
                cols.append(hpad[:, :, i:i + STRIDE * ho:STRIDE,
                                 j:j + STRIDE * wo:STRIDE])
        p = jnp.stack(cols, axis=0)                    # (kh*kw, B, C, Ho, Wo)
        p = p.transpose(1, 3, 4, 2, 0).reshape(bn * ho * wo, c * kh * kw)
        y = jnp.dot(p, w.reshape(cout, -1).T, precision=prec) + b
        y = jnp.maximum(y, 0.0)
        return y.reshape(bn, ho, wo, cout).transpose(0, 3, 1, 2)

    h = conv_relu(x, params["w1"], params["b1"])
    h = conv_relu(h, params["w2"], params["b2"])
    bn, c, hgt, wid = h.shape
    h = h.reshape(bn, c, hgt // 2, 2, wid // 2, 2).max(axis=(3, 5))
    h = conv_relu(h, params["w3"], params["b3"])
    h = h.reshape(bn, 512)
    h = jnp.tanh(jnp.dot(h, params["fc1_w"].T, precision=prec) + params["fc1_b"])
    h = jnp.dot(h, params["fc2_w"].T, precision=prec) + params["fc2_b"]
    return jax.nn.sigmoid(h)


if __name__ == "__main__":
    key = jax.random.PRNGKey(0)
    pkey, xkey = jax.random.split(key)

    params = init_params(pkey)           # PyTorch-shaped parameters
    kparams = prepare_params(params)     # kernel-layout weights (one-time)
    consts = build_constants()           # bf16 0/1 selection matrices

    # Input spatial size (64, 10) is what the module's view(B, 512) implies:
    # 64x10 -> conv -> 32x6 -> conv -> 16x4 -> pool -> 8x2 -> conv -> 4x2.
    x = jax.random.normal(xkey, (B, 1, H0, W0), dtype=jnp.float32)

    fwd = jax.jit(discriminator_forward)
    out = jax.block_until_ready(fwd(kparams, consts, x))

    ref = _reference_forward(params, x)
    assert out.shape == (B, 1)
    assert bool(jnp.all((out > 0.0) & (out < 1.0)))
    # Activations are rounded to bf16 before the selection matmuls and fc1
    # uses bf16 weights, so the kernel deviates from the all-f32 reference by
    # ~1e-3 relative; 3e-3 absolute keeps a meaningful accuracy budget.
    assert float(jnp.max(jnp.abs(out - ref))) < 3e-3
    print("KERNEL_OK")
</pallas_src>

<mosaic_0001>
module attributes {stable_mosaic.version = 11 : i64} {
  func.func @_discriminator_kernel(%arg0: memref<8x512xf32, #tpu.memory_space<vmem>>, %arg1: memref<16x8xf32, #tpu.memory_space<vmem>>, %arg2: memref<16x1xf32, #tpu.memory_space<vmem>>, %arg3: memref<8x256x64xbf16, #tpu.memory_space<vmem>>, %arg4: memref<32x128xf32, #tpu.memory_space<vmem>>, %arg5: memref<32x1xf32, #tpu.memory_space<vmem>>, %arg6: memref<4x32x128xbf16, #tpu.memory_space<vmem>>, %arg7: memref<8x16x32xbf16, #tpu.memory_space<vmem>>, %arg8: memref<8x32x64xf32, #tpu.memory_space<vmem>>, %arg9: memref<1x64xf32, #tpu.memory_space<vmem>>, %arg10: memref<512x256xbf16, #tpu.memory_space<any>>, %arg11: memref<1x256xf32, #tpu.memory_space<vmem>>, %arg12: memref<1x256xf32, #tpu.memory_space<vmem>>, %arg13: memref<1x1xf32, #tpu.memory_space<vmem>>, %arg14: memref<2x1xf32, #tpu.memory_space<vmem>>, %arg15: memref<512x256xbf16, #tpu.memory_space<vmem>>, %arg16: memref<1x!tpu.dma_semaphore, #tpu.memory_space<semaphore_mem>>) attributes {dimension_semantics = [], scalar_prefetch = 0 : i64, scratch_operands = 2 : i64, tpu.core_type = #tpu.core_type<tc>} {
    %c0_i32 = arith.constant 0 : i32
    %0 = tpu.memref_slice %arg16[%c0_i32] : memref<1x!tpu.dma_semaphore, #tpu.memory_space<semaphore_mem>> -> memref<1x!tpu.dma_semaphore, #tpu.memory_space<semaphore_mem>>
    %1 = tpu.memref_squeeze %0 : memref<1x!tpu.dma_semaphore, #tpu.memory_space<semaphore_mem>> -> memref<!tpu.dma_semaphore, #tpu.memory_space<semaphore_mem>>
    tpu.enqueue_dma source(%arg10 : memref<512x256xbf16, #tpu.memory_space<any>>) target(%arg15 : memref<512x256xbf16, #tpu.memory_space<vmem>>) target_semaphore(%1 : memref<!tpu.dma_semaphore, #tpu.memory_space<semaphore_mem>>)
    %c0 = arith.constant 0 : index
    %c0_0 = arith.constant 0 : index
    %2 = vector.load %arg0[%c0, %c0_0] : memref<8x512xf32, #tpu.memory_space<vmem>>, vector<8x512xf32>
    %c0_1 = arith.constant 0 : index
    %c0_2 = arith.constant 0 : index
    %3 = vector.load %arg1[%c0_1, %c0_2] : memref<16x8xf32, #tpu.memory_space<vmem>>, vector<16x8xf32>
    %cst = arith.constant 0.000000e+00 : f32
    %4 = vector.broadcast %cst : f32 to vector<16x512xf32>
    %5 = vector.extract_strided_slice %3 {offsets = [0, 0], sizes = [16, 1], strides = [1, 1]} : vector<16x8xf32> to vector<16x1xf32>
    %6 = vector.extract_strided_slice %2 {offsets = [0, 0], sizes = [1, 512], strides = [1, 1]} : vector<8x512xf32> to vector<1x512xf32>
    %7 = vector.broadcast %5 : vector<16x1xf32> to vector<16x512xf32>
    %8 = vector.broadcast %6 : vector<1x512xf32> to vector<16x512xf32>
    %9 = arith.mulf %7, %8 : vector<16x512xf32>
    %10 = arith.addf %4, %9 : vector<16x512xf32>
    %11 = vector.extract_strided_slice %3 {offsets = [0, 1], sizes = [16, 1], strides = [1, 1]} : vector<16x8xf32> to vector<16x1xf32>
    %12 = vector.extract_strided_slice %2 {offsets = [1, 0], sizes = [1, 512], strides = [1, 1]} : vector<8x512xf32> to vector<1x512xf32>
    %13 = vector.broadcast %11 : vector<16x1xf32> to vector<16x512xf32>
    %14 = vector.broadcast %12 : vector<1x512xf32> to vector<16x512xf32>
    %15 = arith.mulf %13, %14 : vector<16x512xf32>
    %16 = arith.addf %10, %15 : vector<16x512xf32>
    %17 = vector.extract_strided_slice %3 {offsets = [0, 2], sizes = [16, 1], strides = [1, 1]} : vector<16x8xf32> to vector<16x1xf32>
    %18 = vector.extract_strided_slice %2 {offsets = [2, 0], sizes = [1, 512], strides = [1, 1]} : vector<8x512xf32> to vector<1x512xf32>
    %19 = vector.broadcast %17 : vector<16x1xf32> to vector<16x512xf32>
    %20 = vector.broadcast %18 : vector<1x512xf32> to vector<16x512xf32>
    %21 = arith.mulf %19, %20 : vector<16x512xf32>
    %22 = arith.addf %16, %21 : vector<16x512xf32>
    %23 = vector.extract_strided_slice %3 {offsets = [0, 3], sizes = [16, 1], strides = [1, 1]} : vector<16x8xf32> to vector<16x1xf32>
    %24 = vector.extract_strided_slice %2 {offsets = [3, 0], sizes = [1, 512], strides = [1, 1]} : vector<8x512xf32> to vector<1x512xf32>
    %25 = vector.broadcast %23 : vector<16x1xf32> to vector<16x512xf32>
    %26 = vector.broadcast %24 : vector<1x512xf32> to vector<16x512xf32>
    %27 = arith.mulf %25, %26 : vector<16x512xf32>
    %28 = arith.addf %22, %27 : vector<16x512xf32>
    %29 = vector.extract_strided_slice %3 {offsets = [0, 4], sizes = [16, 1], strides = [1, 1]} : vector<16x8xf32> to vector<16x1xf32>
    %30 = vector.extract_strided_slice %2 {offsets = [4, 0], sizes = [1, 512], strides = [1, 1]} : vector<8x512xf32> to vector<1x512xf32>
    %31 = vector.broadcast %29 : vector<16x1xf32> to vector<16x512xf32>
    %32 = vector.broadcast %30 : vector<1x512xf32> to vector<16x512xf32>
    %33 = arith.mulf %31, %32 : vector<16x512xf32>
    %34 = arith.addf %28, %33 : vector<16x512xf32>
    %35 = vector.extract_strided_slice %3 {offsets = [0, 5], sizes = [16, 1], strides = [1, 1]} : vector<16x8xf32> to vector<16x1xf32>
    %36 = vector.extract_strided_slice %2 {offsets = [5, 0], sizes = [1, 512], strides = [1, 1]} : vector<8x512xf32> to vector<1x512xf32>
    %37 = vector.broadcast %35 : vector<16x1xf32> to vector<16x512xf32>
    %38 = vector.broadcast %36 : vector<1x512xf32> to vector<16x512xf32>
    %39 = arith.mulf %37, %38 : vector<16x512xf32>
    %40 = arith.addf %34, %39 : vector<16x512xf32>
    %41 = vector.extract_strided_slice %3 {offsets = [0, 6], sizes = [16, 1], strides = [1, 1]} : vector<16x8xf32> to vector<16x1xf32>
    %42 = vector.extract_strided_slice %2 {offsets = [6, 0], sizes = [1, 512], strides = [1, 1]} : vector<8x512xf32> to vector<1x512xf32>
    %43 = vector.broadcast %41 : vector<16x1xf32> to vector<16x512xf32>
    %44 = vector.broadcast %42 : vector<1x512xf32> to vector<16x512xf32>
    %45 = arith.mulf %43, %44 : vector<16x512xf32>
    %46 = arith.addf %40, %45 : vector<16x512xf32>
    %47 = vector.extract_strided_slice %3 {offsets = [0, 7], sizes = [16, 1], strides = [1, 1]} : vector<16x8xf32> to vector<16x1xf32>
    %48 = vector.extract_strided_slice %2 {offsets = [7, 0], sizes = [1, 512], strides = [1, 1]} : vector<8x512xf32> to vector<1x512xf32>
    %49 = vector.broadcast %47 : vector<16x1xf32> to vector<16x512xf32>
    %50 = vector.broadcast %48 : vector<1x512xf32> to vector<16x512xf32>
    %51 = arith.mulf %49, %50 : vector<16x512xf32>
    %52 = arith.addf %46, %51 : vector<16x512xf32>
    %c0_3 = arith.constant 0 : index
    %c0_4 = arith.constant 0 : index
    %53 = vector.load %arg2[%c0_3, %c0_4] : memref<16x1xf32, #tpu.memory_space<vmem>>, vector<16x1xf32>
    %54 = vector.broadcast %53 : vector<16x1xf32> to vector<16x512xf32>
    %55 = arith.addf %52, %54 : vector<16x512xf32>
    %cst_5 = arith.constant 0.000000e+00 : f32
    %56 = vector.broadcast %cst_5 : f32 to vector<16x512xf32>
    %57 = arith.maximumf %55, %56 : vector<16x512xf32>
    %58 = arith.truncf %57 : vector<16x512xf32> to vector<16x512xbf16>
    %59 = vector.extract_strided_slice %58 {offsets = [0, 0], sizes = [16, 256], strides = [1, 1]} : vector<16x512xbf16> to vector<16x256xbf16>
    %60 = vector.extract_strided_slice %58 {offsets = [0, 256], sizes = [16, 256], strides = [1, 1]} : vector<16x512xbf16> to vector<16x256xbf16>
    %61 = tpu.concatenate %59, %60 in 0 : vector<16x256xbf16>, vector<16x256xbf16> -> vector<32x256xbf16>
    %c0_6 = arith.constant 0 : index
    %c0_7 = arith.constant 0 : index
    %62 = vector.load %arg4[%c0_6, %c0_7] : memref<32x128xf32, #tpu.memory_space<vmem>>, vector<32x128xf32>
    %c0_8 = arith.constant 0 : index
    %c0_9 = arith.constant 0 : index
    %c0_10 = arith.constant 0 : index
    %63 = vector.load %arg3[%c0_8, %c0_9, %c0_10] : memref<8x256x64xbf16, #tpu.memory_space<vmem>>, vector<1x256x64xbf16>
    %64 = vector.shape_cast %63 : vector<1x256x64xbf16> to vector<256x64xbf16>
    %cst_11 = arith.constant dense<0.000000e+00> : vector<32x64xf32>
    %65 = tpu.matmul %61, %64, %cst_11 {dimension_numbers = #tpu.dot_dimension_numbers<[1], [0], [0], [1], [0, 0, 1, 1], [], []>} : vector<32x256xbf16>, vector<256x64xbf16>, vector<32x64xf32> -> vector<32x64xf32>
    %c1 = arith.constant 1 : index
    %c0_12 = arith.constant 0 : index
    %c0_13 = arith.constant 0 : index
    %66 = vector.load %arg3[%c1, %c0_12, %c0_13] : memref<8x256x64xbf16, #tpu.memory_space<vmem>>, vector<1x256x64xbf16>
    %67 = vector.shape_cast %66 : vector<1x256x64xbf16> to vector<256x64xbf16>
    %cst_14 = arith.constant dense<0.000000e+00> : vector<32x64xf32>
    %68 = tpu.matmul %61, %67, %cst_14 {dimension_numbers = #tpu.dot_dimension_numbers<[1], [0], [0], [1], [0, 0, 1, 1], [], []>} : vector<32x256xbf16>, vector<256x64xbf16>, vector<32x64xf32> -> vector<32x64xf32>
    %c2 = arith.constant 2 : index
    %c0_15 = arith.constant 0 : index
    %c0_16 = arith.constant 0 : index
    %69 = vector.load %arg3[%c2, %c0_15, %c0_16] : memref<8x256x64xbf16, #tpu.memory_space<vmem>>, vector<1x256x64xbf16>
    %70 = vector.shape_cast %69 : vector<1x256x64xbf16> to vector<256x64xbf16>
    %cst_17 = arith.constant dense<0.000000e+00> : vector<32x64xf32>
    %71 = tpu.matmul %61, %70, %cst_17 {dimension_numbers = #tpu.dot_dimension_numbers<[1], [0], [0], [1], [0, 0, 1, 1], [], []>} : vector<32x256xbf16>, vector<256x64xbf16>, vector<32x64xf32> -> vector<32x64xf32>
    %c3 = arith.constant 3 : index
    %c0_18 = arith.constant 0 : index
    %c0_19 = arith.constant 0 : index
    %72 = vector.load %arg3[%c3, %c0_18, %c0_19] : memref<8x256x64xbf16, #tpu.memory_space<vmem>>, vector<1x256x64xbf16>
    %73 = vector.shape_cast %72 : vector<1x256x64xbf16> to vector<256x64xbf16>
    %cst_20 = arith.constant dense<0.000000e+00> : vector<32x64xf32>
    %74 = tpu.matmul %61, %73, %cst_20 {dimension_numbers = #tpu.dot_dimension_numbers<[1], [0], [0], [1], [0, 0, 1, 1], [], []>} : vector<32x256xbf16>, vector<256x64xbf16>, vector<32x64xf32> -> vector<32x64xf32>
    %c4 = arith.constant 4 : index
    %c0_21 = arith.constant 0 : index
    %c0_22 = arith.constant 0 : index
    %75 = vector.load %arg3[%c4, %c0_21, %c0_22] : memref<8x256x64xbf16, #tpu.memory_space<vmem>>, vector<1x256x64xbf16>
    %76 = vector.shape_cast %75 : vector<1x256x64xbf16> to vector<256x64xbf16>
    %cst_23 = arith.constant dense<0.000000e+00> : vector<32x64xf32>
    %77 = tpu.matmul %61, %76, %cst_23 {dimension_numbers = #tpu.dot_dimension_numbers<[1], [0], [0], [1], [0, 0, 1, 1], [], []>} : vector<32x256xbf16>, vector<256x64xbf16>, vector<32x64xf32> -> vector<32x64xf32>
    %c5 = arith.constant 5 : index
    %c0_24 = arith.constant 0 : index
    %c0_25 = arith.constant 0 : index
    %78 = vector.load %arg3[%c5, %c0_24, %c0_25] : memref<8x256x64xbf16, #tpu.memory_space<vmem>>, vector<1x256x64xbf16>
    %79 = vector.shape_cast %78 : vector<1x256x64xbf16> to vector<256x64xbf16>
    %cst_26 = arith.constant dense<0.000000e+00> : vector<32x64xf32>
    %80 = tpu.matmul %61, %79, %cst_26 {dimension_numbers = #tpu.dot_dimension_numbers<[1], [0], [0], [1], [0, 0, 1, 1], [], []>} : vector<32x256xbf16>, vector<256x64xbf16>, vector<32x64xf32> -> vector<32x64xf32>
    %c6 = arith.constant 6 : index
    %c0_27 = arith.constant 0 : index
    %c0_28 = arith.constant 0 : index
    %81 = vector.load %arg3[%c6, %c0_27, %c0_28] : memref<8x256x64xbf16, #tpu.memory_space<vmem>>, vector<1x256x64xbf16>
    %82 = vector.shape_cast %81 : vector<1x256x64xbf16> to vector<256x64xbf16>
    %cst_29 = arith.constant dense<0.000000e+00> : vector<32x64xf32>
    %83 = tpu.matmul %61, %82, %cst_29 {dimension_numbers = #tpu.dot_dimension_numbers<[1], [0], [0], [1], [0, 0, 1, 1], [], []>} : vector<32x256xbf16>, vector<256x64xbf16>, vector<32x64xf32> -> vector<32x64xf32>
    %c7 = arith.constant 7 : index
    %c0_30 = arith.constant 0 : index
    %c0_31 = arith.constant 0 : index
    %84 = vector.load %arg3[%c7, %c0_30, %c0_31] : memref<8x256x64xbf16, #tpu.memory_space<vmem>>, vector<1x256x64xbf16>
    %85 = vector.shape_cast %84 : vector<1x256x64xbf16> to vector<256x64xbf16>
    %cst_32 = arith.constant dense<0.000000e+00> : vector<32x64xf32>
    %86 = tpu.matmul %61, %85, %cst_32 {dimension_numbers = #tpu.dot_dimension_numbers<[1], [0], [0], [1], [0, 0, 1, 1], [], []>} : vector<32x256xbf16>, vector<256x64xbf16>, vector<32x64xf32> -> vector<32x64xf32>
    %87 = vector.extract_strided_slice %65 {offsets = [0, 0], sizes = [16, 64], strides = [1, 1]} : vector<32x64xf32> to vector<16x64xf32>
    %88 = vector.extract_strided_slice %68 {offsets = [0, 0], sizes = [16, 64], strides = [1, 1]} : vector<32x64xf32> to vector<16x64xf32>
    %89 = vector.extract_strided_slice %71 {offsets = [0, 0], sizes = [16, 64], strides = [1, 1]} : vector<32x64xf32> to vector<16x64xf32>
    %90 = vector.extract_strided_slice %74 {offsets = [0, 0], sizes = [16, 64], strides = [1, 1]} : vector<32x64xf32> to vector<16x64xf32>
    %91 = vector.extract_strided_slice %77 {offsets = [0, 0], sizes = [16, 64], strides = [1, 1]} : vector<32x64xf32> to vector<16x64xf32>
    %92 = vector.extract_strided_slice %80 {offsets = [0, 0], sizes = [16, 64], strides = [1, 1]} : vector<32x64xf32> to vector<16x64xf32>
    %93 = vector.extract_strided_slice %83 {offsets = [0, 0], sizes = [16, 64], strides = [1, 1]} : vector<32x64xf32> to vector<16x64xf32>
    %94 = vector.extract_strided_slice %86 {offsets = [0, 0], sizes = [16, 64], strides = [1, 1]} : vector<32x64xf32> to vector<16x64xf32>
    %95 = tpu.concatenate %87, %88, %89, %90, %91, %92, %93, %94 in 0 : vector<16x64xf32>, vector<16x64xf32>, vector<16x64xf32>, vector<16x64xf32>, vector<16x64xf32>, vector<16x64xf32>, vector<16x64xf32>, vector<16x64xf32> -> vector<128x64xf32>
    %cst_33 = arith.constant dense<0.000000e+00> : vector<32x64xf32>
    %96 = tpu.matmul %62, %95, %cst_33 {dimension_numbers = #tpu.dot_dimension_numbers<[1], [0], [0], [1], [0, 0, 1, 1], [], []>} : vector<32x128xf32>, vector<128x64xf32>, vector<32x64xf32> -> vector<32x64xf32>
    %c0_34 = arith.constant 0 : index
    %c0_35 = arith.constant 0 : index
    %97 = vector.load %arg5[%c0_34, %c0_35] : memref<32x1xf32, #tpu.memory_space<vmem>>, vector<32x1xf32>
    %98 = vector.broadcast %97 : vector<32x1xf32> to vector<32x64xf32>
    %99 = arith.addf %96, %98 : vector<32x64xf32>
    %cst_36 = arith.constant 0.000000e+00 : f32
    %100 = vector.broadcast %cst_36 : f32 to vector<32x64xf32>
    %101 = arith.maximumf %99, %100 : vector<32x64xf32>
    %102 = tpu.transpose %101, [1, 0] : vector<32x64xf32> -> vector<64x32xf32>
    %103 = vector.extract_strided_slice %65 {offsets = [16, 0], sizes = [16, 64], strides = [1, 1]} : vector<32x64xf32> to vector<16x64xf32>
    %104 = vector.extract_strided_slice %68 {offsets = [16, 0], sizes = [16, 64], strides = [1, 1]} : vector<32x64xf32> to vector<16x64xf32>
    %105 = vector.extract_strided_slice %71 {offsets = [16, 0], sizes = [16, 64], strides = [1, 1]} : vector<32x64xf32> to vector<16x64xf32>
    %106 = vector.extract_strided_slice %74 {offsets = [16, 0], sizes = [16, 64], strides = [1, 1]} : vector<32x64xf32> to vector<16x64xf32>
    %107 = vector.extract_strided_slice %77 {offsets = [16, 0], sizes = [16, 64], strides = [1, 1]} : vector<32x64xf32> to vector<16x64xf32>
    %108 = vector.extract_strided_slice %80 {offsets = [16, 0], sizes = [16, 64], strides = [1, 1]} : vector<32x64xf32> to vector<16x64xf32>
    %109 = vector.extract_strided_slice %83 {offsets = [16, 0], sizes = [16, 64], strides = [1, 1]} : vector<32x64xf32> to vector<16x64xf32>
    %110 = vector.extract_strided_slice %86 {offsets = [16, 0], sizes = [16, 64], strides = [1, 1]} : vector<32x64xf32> to vector<16x64xf32>
    %111 = tpu.concatenate %103, %104, %105, %106, %107, %108, %109, %110 in 0 : vector<16x64xf32>, vector<16x64xf32>, vector<16x64xf32>, vector<16x64xf32>, vector<16x64xf32>, vector<16x64xf32>, vector<16x64xf32>, vector<16x64xf32> -> vector<128x64xf32>
    %cst_37 = arith.constant dense<0.000000e+00> : vector<32x64xf32>
    %112 = tpu.matmul %62, %111, %cst_37 {dimension_numbers = #tpu.dot_dimension_numbers<[1], [0], [0], [1], [0, 0, 1, 1], [], []>} : vector<32x128xf32>, vector<128x64xf32>, vector<32x64xf32> -> vector<32x64xf32>
    %c0_38 = arith.constant 0 : index
    %c0_39 = arith.constant 0 : index
    %113 = vector.load %arg5[%c0_38, %c0_39] : memref<32x1xf32, #tpu.memory_space<vmem>>, vector<32x1xf32>
    %114 = vector.broadcast %113 : vector<32x1xf32> to vector<32x64xf32>
    %115 = arith.addf %112, %114 : vector<32x64xf32>
    %cst_40 = arith.constant 0.000000e+00 : f32
    %116 = vector.broadcast %cst_40 : f32 to vector<32x64xf32>
    %117 = arith.maximumf %115, %116 : vector<32x64xf32>
    %118 = tpu.transpose %117, [1, 0] : vector<32x64xf32> -> vector<64x32xf32>
    %119 = tpu.concatenate %102, %118 in 0 : vector<64x32xf32>, vector<64x32xf32> -> vector<128x32xf32>
    %120 = arith.truncf %119 : vector<128x32xf32> to vector<128x32xbf16>
    %c0_41 = arith.constant 0 : index
    %c0_42 = arith.constant 0 : index
    %c0_43 = arith.constant 0 : index
    %121 = vector.load %arg6[%c0_41, %c0_42, %c0_43] : memref<4x32x128xbf16, #tpu.memory_space<vmem>>, vector<1x32x128xbf16>
    %122 = vector.shape_cast %121 : vector<1x32x128xbf16> to vector<32x128xbf16>
    %cst_44 = arith.constant dense<0.000000e+00> : vector<32x32xf32>
    %123 = tpu.matmul %122, %120, %cst_44 {dimension_numbers = #tpu.dot_dimension_numbers<[1], [0], [0], [1], [0, 0, 1, 1], [], []>} : vector<32x128xbf16>, vector<128x32xbf16>, vector<32x32xf32> -> vector<32x32xf32>
    %c1_45 = arith.constant 1 : index
    %c0_46 = arith.constant 0 : index
    %c0_47 = arith.constant 0 : index
    %124 = vector.load %arg6[%c1_45, %c0_46, %c0_47] : memref<4x32x128xbf16, #tpu.memory_space<vmem>>, vector<1x32x128xbf16>
    %125 = vector.shape_cast %124 : vector<1x32x128xbf16> to vector<32x128xbf16>
    %cst_48 = arith.constant dense<0.000000e+00> : vector<32x32xf32>
    %126 = tpu.matmul %125, %120, %cst_48 {dimension_numbers = #tpu.dot_dimension_numbers<[1], [0], [0], [1], [0, 0, 1, 1], [], []>} : vector<32x128xbf16>, vector<128x32xbf16>, vector<32x32xf32> -> vector<32x32xf32>
    %127 = arith.maximumf %123, %126 : vector<32x32xf32>
    %c2_49 = arith.constant 2 : index
    %c0_50 = arith.constant 0 : index
    %c0_51 = arith.constant 0 : index
    %128 = vector.load %arg6[%c2_49, %c0_50, %c0_51] : memref<4x32x128xbf16, #tpu.memory_space<vmem>>, vector<1x32x128xbf16>
    %129 = vector.shape_cast %128 : vector<1x32x128xbf16> to vector<32x128xbf16>
    %cst_52 = arith.constant dense<0.000000e+00> : vector<32x32xf32>
    %130 = tpu.matmul %129, %120, %cst_52 {dimension_numbers = #tpu.dot_dimension_numbers<[1], [0], [0], [1], [0, 0, 1, 1], [], []>} : vector<32x128xbf16>, vector<128x32xbf16>, vector<32x32xf32> -> vector<32x32xf32>
    %131 = arith.maximumf %127, %130 : vector<32x32xf32>
    %c3_53 = arith.constant 3 : index
    %c0_54 = arith.constant 0 : index
    %c0_55 = arith.constant 0 : index
    %132 = vector.load %arg6[%c3_53, %c0_54, %c0_55] : memref<4x32x128xbf16, #tpu.memory_space<vmem>>, vector<1x32x128xbf16>
    %133 = vector.shape_cast %132 : vector<1x32x128xbf16> to vector<32x128xbf16>
    %cst_56 = arith.constant dense<0.000000e+00> : vector<32x32xf32>
    %134 = tpu.matmul %133, %120, %cst_56 {dimension_numbers = #tpu.dot_dimension_numbers<[1], [0], [0], [1], [0, 0, 1, 1], [], []>} : vector<32x128xbf16>, vector<128x32xbf16>, vector<32x32xf32> -> vector<32x32xf32>
    %135 = arith.maximumf %131, %134 : vector<32x32xf32>
    %136 = arith.truncf %135 : vector<32x32xf32> to vector<32x32xbf16>
    %cst_57 = arith.constant 0.000000e+00 : f32
    %137 = vector.broadcast %cst_57 : f32 to vector<16x64xf32>
    %c0_58 = arith.constant 0 : index
    %c0_59 = arith.constant 0 : index
    %c0_60 = arith.constant 0 : index
    %138 = vector.load %arg7[%c0_58, %c0_59, %c0_60] : memref<8x16x32xbf16, #tpu.memory_space<vmem>>, vector<1x16x32xbf16>
    %139 = vector.shape_cast %138 : vector<1x16x32xbf16> to vector<16x32xbf16>
    %cst_61 = arith.constant dense<0.000000e+00> : vector<16x32xf32>
    %140 = tpu.matmul %139, %136, %cst_61 {dimension_numbers = #tpu.dot_dimension_numbers<[1], [0], [0], [1], [0, 0, 1, 1], [], []>} : vector<16x32xbf16>, vector<32x32xbf16>, vector<16x32xf32> -> vector<16x32xf32>
    %c0_62 = arith.constant 0 : index
    %c0_63 = arith.constant 0 : index
    %c0_64 = arith.constant 0 : index
    %141 = vector.load %arg8[%c0_62, %c0_63, %c0_64] : memref<8x32x64xf32, #tpu.memory_space<vmem>>, vector<1x32x64xf32>
    %142 = vector.shape_cast %141 : vector<1x32x64xf32> to vector<32x64xf32>
    %cst_65 = arith.constant dense<0.000000e+00> : vector<16x64xf32>
    %143 = tpu.matmul %140, %142, %cst_65 {dimension_numbers = #tpu.dot_dimension_numbers<[1], [0], [0], [1], [0, 0, 1, 1], [], []>} : vector<16x32xf32>, vector<32x64xf32>, vector<16x64xf32> -> vector<16x64xf32>
    %144 = arith.addf %137, %143 : vector<16x64xf32>
    %c1_66 = arith.constant 1 : index
    %c0_67 = arith.constant 0 : index
    %c0_68 = arith.constant 0 : index
    %145 = vector.load %arg7[%c1_66, %c0_67, %c0_68] : memref<8x16x32xbf16, #tpu.memory_space<vmem>>, vector<1x16x32xbf16>
    %146 = vector.shape_cast %145 : vector<1x16x32xbf16> to vector<16x32xbf16>
    %cst_69 = arith.constant dense<0.000000e+00> : vector<16x32xf32>
    %147 = tpu.matmul %146, %136, %cst_69 {dimension_numbers = #tpu.dot_dimension_numbers<[1], [0], [0], [1], [0, 0, 1, 1], [], []>} : vector<16x32xbf16>, vector<32x32xbf16>, vector<16x32xf32> -> vector<16x32xf32>
    %c1_70 = arith.constant 1 : index
    %c0_71 = arith.constant 0 : index
    %c0_72 = arith.constant 0 : index
    %148 = vector.load %arg8[%c1_70, %c0_71, %c0_72] : memref<8x32x64xf32, #tpu.memory_space<vmem>>, vector<1x32x64xf32>
    %149 = vector.shape_cast %148 : vector<1x32x64xf32> to vector<32x64xf32>
    %cst_73 = arith.constant dense<0.000000e+00> : vector<16x64xf32>
    %150 = tpu.matmul %147, %149, %cst_73 {dimension_numbers = #tpu.dot_dimension_numbers<[1], [0], [0], [1], [0, 0, 1, 1], [], []>} : vector<16x32xf32>, vector<32x64xf32>, vector<16x64xf32> -> vector<16x64xf32>
    %151 = arith.addf %144, %150 : vector<16x64xf32>
    %c2_74 = arith.constant 2 : index
    %c0_75 = arith.constant 0 : index
    %c0_76 = arith.constant 0 : index
    %152 = vector.load %arg7[%c2_74, %c0_75, %c0_76] : memref<8x16x32xbf16, #tpu.memory_space<vmem>>, vector<1x16x32xbf16>
    %153 = vector.shape_cast %152 : vector<1x16x32xbf16> to vector<16x32xbf16>
    %cst_77 = arith.constant dense<0.000000e+00> : vector<16x32xf32>
    %154 = tpu.matmul %153, %136, %cst_77 {dimension_numbers = #tpu.dot_dimension_numbers<[1], [0], [0], [1], [0, 0, 1, 1], [], []>} : vector<16x32xbf16>, vector<32x32xbf16>, vector<16x32xf32> -> vector<16x32xf32>
    %c2_78 = arith.constant 2 : index
    %c0_79 = arith.constant 0 : index
    %c0_80 = arith.constant 0 : index
    %155 = vector.load %arg8[%c2_78, %c0_79, %c0_80] : memref<8x32x64xf32, #tpu.memory_space<vmem>>, vector<1x32x64xf32>
    %156 = vector.shape_cast %155 : vector<1x32x64xf32> to vector<32x64xf32>
    %cst_81 = arith.constant dense<0.000000e+00> : vector<16x64xf32>
    %157 = tpu.matmul %154, %156, %cst_81 {dimension_numbers = #tpu.dot_dimension_numbers<[1], [0], [0], [1], [0, 0, 1, 1], [], []>} : vector<16x32xf32>, vector<32x64xf32>, vector<16x64xf32> -> vector<16x64xf32>
    %158 = arith.addf %151, %157 : vector<16x64xf32>
    %c3_82 = arith.constant 3 : index
    %c0_83 = arith.constant 0 : index
    %c0_84 = arith.constant 0 : index
    %159 = vector.load %arg7[%c3_82, %c0_83, %c0_84] : memref<8x16x32xbf16, #tpu.memory_space<vmem>>, vector<1x16x32xbf16>
    %160 = vector.shape_cast %159 : vector<1x16x32xbf16> to vector<16x32xbf16>
    %cst_85 = arith.constant dense<0.000000e+00> : vector<16x32xf32>
    %161 = tpu.matmul %160, %136, %cst_85 {dimension_numbers = #tpu.dot_dimension_numbers<[1], [0], [0], [1], [0, 0, 1, 1], [], []>} : vector<16x32xbf16>, vector<32x32xbf16>, vector<16x32xf32> -> vector<16x32xf32>
    %c3_86 = arith.constant 3 : index
    %c0_87 = arith.constant 0 : index
    %c0_88 = arith.constant 0 : index
    %162 = vector.load %arg8[%c3_86, %c0_87, %c0_88] : memref<8x32x64xf32, #tpu.memory_space<vmem>>, vector<1x32x64xf32>
    %163 = vector.shape_cast %162 : vector<1x32x64xf32> to vector<32x64xf32>
    %cst_89 = arith.constant dense<0.000000e+00> : vector<16x64xf32>
    %164 = tpu.matmul %161, %163, %cst_89 {dimension_numbers = #tpu.dot_dimension_numbers<[1], [0], [0], [1], [0, 0, 1, 1], [], []>} : vector<16x32xf32>, vector<32x64xf32>, vector<16x64xf32> -> vector<16x64xf32>
    %165 = arith.addf %158, %164 : vector<16x64xf32>
    %c4_90 = arith.constant 4 : index
    %c0_91 = arith.constant 0 : index
    %c0_92 = arith.constant 0 : index
    %166 = vector.load %arg7[%c4_90, %c0_91, %c0_92] : memref<8x16x32xbf16, #tpu.memory_space<vmem>>, vector<1x16x32xbf16>
    %167 = vector.shape_cast %166 : vector<1x16x32xbf16> to vector<16x32xbf16>
    %cst_93 = arith.constant dense<0.000000e+00> : vector<16x32xf32>
    %168 = tpu.matmul %167, %136, %cst_93 {dimension_numbers = #tpu.dot_dimension_numbers<[1], [0], [0], [1], [0, 0, 1, 1], [], []>} : vector<16x32xbf16>, vector<32x32xbf16>, vector<16x32xf32> -> vector<16x32xf32>
    %c4_94 = arith.constant 4 : index
    %c0_95 = arith.constant 0 : index
    %c0_96 = arith.constant 0 : index
    %169 = vector.load %arg8[%c4_94, %c0_95, %c0_96] : memref<8x32x64xf32, #tpu.memory_space<vmem>>, vector<1x32x64xf32>
    %170 = vector.shape_cast %169 : vector<1x32x64xf32> to vector<32x64xf32>
    %cst_97 = arith.constant dense<0.000000e+00> : vector<16x64xf32>
    %171 = tpu.matmul %168, %170, %cst_97 {dimension_numbers = #tpu.dot_dimension_numbers<[1], [0], [0], [1], [0, 0, 1, 1], [], []>} : vector<16x32xf32>, vector<32x64xf32>, vector<16x64xf32> -> vector<16x64xf32>
    %172 = arith.addf %165, %171 : vector<16x64xf32>
    %c5_98 = arith.constant 5 : index
    %c0_99 = arith.constant 0 : index
    %c0_100 = arith.constant 0 : index
    %173 = vector.load %arg7[%c5_98, %c0_99, %c0_100] : memref<8x16x32xbf16, #tpu.memory_space<vmem>>, vector<1x16x32xbf16>
    %174 = vector.shape_cast %173 : vector<1x16x32xbf16> to vector<16x32xbf16>
    %cst_101 = arith.constant dense<0.000000e+00> : vector<16x32xf32>
    %175 = tpu.matmul %174, %136, %cst_101 {dimension_numbers = #tpu.dot_dimension_numbers<[1], [0], [0], [1], [0, 0, 1, 1], [], []>} : vector<16x32xbf16>, vector<32x32xbf16>, vector<16x32xf32> -> vector<16x32xf32>
    %c5_102 = arith.constant 5 : index
    %c0_103 = arith.constant 0 : index
    %c0_104 = arith.constant 0 : index
    %176 = vector.load %arg8[%c5_102, %c0_103, %c0_104] : memref<8x32x64xf32, #tpu.memory_space<vmem>>, vector<1x32x64xf32>
    %177 = vector.shape_cast %176 : vector<1x32x64xf32> to vector<32x64xf32>
    %cst_105 = arith.constant dense<0.000000e+00> : vector<16x64xf32>
    %178 = tpu.matmul %175, %177, %cst_105 {dimension_numbers = #tpu.dot_dimension_numbers<[1], [0], [0], [1], [0, 0, 1, 1], [], []>} : vector<16x32xf32>, vector<32x64xf32>, vector<16x64xf32> -> vector<16x64xf32>
    %179 = arith.addf %172, %178 : vector<16x64xf32>
    %c6_106 = arith.constant 6 : index
    %c0_107 = arith.constant 0 : index
    %c0_108 = arith.constant 0 : index
    %180 = vector.load %arg7[%c6_106, %c0_107, %c0_108] : memref<8x16x32xbf16, #tpu.memory_space<vmem>>, vector<1x16x32xbf16>
    %181 = vector.shape_cast %180 : vector<1x16x32xbf16> to vector<16x32xbf16>
    %cst_109 = arith.constant dense<0.000000e+00> : vector<16x32xf32>
    %182 = tpu.matmul %181, %136, %cst_109 {dimension_numbers = #tpu.dot_dimension_numbers<[1], [0], [0], [1], [0, 0, 1, 1], [], []>} : vector<16x32xbf16>, vector<32x32xbf16>, vector<16x32xf32> -> vector<16x32xf32>
    %c6_110 = arith.constant 6 : index
    %c0_111 = arith.constant 0 : index
    %c0_112 = arith.constant 0 : index
    %183 = vector.load %arg8[%c6_110, %c0_111, %c0_112] : memref<8x32x64xf32, #tpu.memory_space<vmem>>, vector<1x32x64xf32>
    %184 = vector.shape_cast %183 : vector<1x32x64xf32> to vector<32x64xf32>
    %cst_113 = arith.constant dense<0.000000e+00> : vector<16x64xf32>
    %185 = tpu.matmul %182, %184, %cst_113 {dimension_numbers = #tpu.dot_dimension_numbers<[1], [0], [0], [1], [0, 0, 1, 1], [], []>} : vector<16x32xf32>, vector<32x64xf32>, vector<16x64xf32> -> vector<16x64xf32>
    %186 = arith.addf %179, %185 : vector<16x64xf32>
    %c7_114 = arith.constant 7 : index
    %c0_115 = arith.constant 0 : index
    %c0_116 = arith.constant 0 : index
    %187 = vector.load %arg7[%c7_114, %c0_115, %c0_116] : memref<8x16x32xbf16, #tpu.memory_space<vmem>>, vector<1x16x32xbf16>
    %188 = vector.shape_cast %187 : vector<1x16x32xbf16> to vector<16x32xbf16>
    %cst_117 = arith.constant dense<0.000000e+00> : vector<16x32xf32>
    %189 = tpu.matmul %188, %136, %cst_117 {dimension_numbers = #tpu.dot_dimension_numbers<[1], [0], [0], [1], [0, 0, 1, 1], [], []>} : vector<16x32xbf16>, vector<32x32xbf16>, vector<16x32xf32> -> vector<16x32xf32>
    %c7_118 = arith.constant 7 : index
    %c0_119 = arith.constant 0 : index
    %c0_120 = arith.constant 0 : index
    %190 = vector.load %arg8[%c7_118, %c0_119, %c0_120] : memref<8x32x64xf32, #tpu.memory_space<vmem>>, vector<1x32x64xf32>
    %191 = vector.shape_cast %190 : vector<1x32x64xf32> to vector<32x64xf32>
    %cst_121 = arith.constant dense<0.000000e+00> : vector<16x64xf32>
    %192 = tpu.matmul %189, %191, %cst_121 {dimension_numbers = #tpu.dot_dimension_numbers<[1], [0], [0], [1], [0, 0, 1, 1], [], []>} : vector<16x32xf32>, vector<32x64xf32>, vector<16x64xf32> -> vector<16x64xf32>
    %193 = arith.addf %186, %192 : vector<16x64xf32>
    %c0_122 = arith.constant 0 : index
    %c0_123 = arith.constant 0 : index
    %194 = vector.load %arg9[%c0_122, %c0_123] : memref<1x64xf32, #tpu.memory_space<vmem>>, vector<1x64xf32>
    %195 = vector.broadcast %194 : vector<1x64xf32> to vector<16x64xf32>
    %196 = arith.addf %193, %195 : vector<16x64xf32>
    %cst_124 = arith.constant 0.000000e+00 : f32
    %197 = vector.broadcast %cst_124 : f32 to vector<16x64xf32>
    %198 = arith.maximumf %196, %197 : vector<16x64xf32>
    %199 = arith.truncf %198 : vector<16x64xf32> to vector<16x64xbf16>
    %c0_i32_125 = arith.constant 0 : i32
    %200 = tpu.memref_slice %arg16[%c0_i32_125] : memref<1x!tpu.dma_semaphore, #tpu.memory_space<semaphore_mem>> -> memref<1x!tpu.dma_semaphore, #tpu.memory_space<semaphore_mem>>
    %201 = tpu.memref_squeeze %200 : memref<1x!tpu.dma_semaphore, #tpu.memory_space<semaphore_mem>> -> memref<!tpu.dma_semaphore, #tpu.memory_space<semaphore_mem>>
    tpu.wait_dma2 semaphore(%201 : memref<!tpu.dma_semaphore, #tpu.memory_space<semaphore_mem>>) src(%arg10 : memref<512x256xbf16, #tpu.memory_space<any>>) dst(%arg15 : memref<512x256xbf16, #tpu.memory_space<vmem>>)
    %cst_126 = arith.constant 0.000000e+00 : f32
    %202 = vector.broadcast %cst_126 : f32 to vector<2x256xf32>
    %203 = vector.extract_strided_slice %199 {offsets = [0, 0], sizes = [2, 64], strides = [1, 1]} : vector<16x64xbf16> to vector<2x64xbf16>
    %c0_127 = arith.constant 0 : index
    %c0_128 = arith.constant 0 : index
    %204 = vector.load %arg15[%c0_127, %c0_128] : memref<512x256xbf16, #tpu.memory_space<vmem>>, vector<64x256xbf16>
    %cst_129 = arith.constant dense<0.000000e+00> : vector<2x256xf32>
    %205 = tpu.matmul %203, %204, %cst_129 {dimension_numbers = #tpu.dot_dimension_numbers<[1], [0], [0], [1], [0, 0, 1, 1], [], []>} : vector<2x64xbf16>, vector<64x256xbf16>, vector<2x256xf32> -> vector<2x256xf32>
    %206 = arith.addf %202, %205 : vector<2x256xf32>
    %207 = vector.extract_strided_slice %199 {offsets = [2, 0], sizes = [2, 64], strides = [1, 1]} : vector<16x64xbf16> to vector<2x64xbf16>
    %c64 = arith.constant 64 : index
    %c0_130 = arith.constant 0 : index
    %208 = vector.load %arg15[%c64, %c0_130] : memref<512x256xbf16, #tpu.memory_space<vmem>>, vector<64x256xbf16>
    %cst_131 = arith.constant dense<0.000000e+00> : vector<2x256xf32>
    %209 = tpu.matmul %207, %208, %cst_131 {dimension_numbers = #tpu.dot_dimension_numbers<[1], [0], [0], [1], [0, 0, 1, 1], [], []>} : vector<2x64xbf16>, vector<64x256xbf16>, vector<2x256xf32> -> vector<2x256xf32>
    %210 = arith.addf %206, %209 : vector<2x256xf32>
    %211 = vector.extract_strided_slice %199 {offsets = [4, 0], sizes = [2, 64], strides = [1, 1]} : vector<16x64xbf16> to vector<2x64xbf16>
    %c128 = arith.constant 128 : index
    %c0_132 = arith.constant 0 : index
    %212 = vector.load %arg15[%c128, %c0_132] : memref<512x256xbf16, #tpu.memory_space<vmem>>, vector<64x256xbf16>
    %cst_133 = arith.constant dense<0.000000e+00> : vector<2x256xf32>
    %213 = tpu.matmul %211, %212, %cst_133 {dimension_numbers = #tpu.dot_dimension_numbers<[1], [0], [0], [1], [0, 0, 1, 1], [], []>} : vector<2x64xbf16>, vector<64x256xbf16>, vector<2x256xf32> -> vector<2x256xf32>
    %214 = arith.addf %210, %213 : vector<2x256xf32>
    %215 = vector.extract_strided_slice %199 {offsets = [6, 0], sizes = [2, 64], strides = [1, 1]} : vector<16x64xbf16> to vector<2x64xbf16>
    %c192 = arith.constant 192 : index
    %c0_134 = arith.constant 0 : index
    %216 = vector.load %arg15[%c192, %c0_134] : memref<512x256xbf16, #tpu.memory_space<vmem>>, vector<64x256xbf16>
    %cst_135 = arith.constant dense<0.000000e+00> : vector<2x256xf32>
    %217 = tpu.matmul %215, %216, %cst_135 {dimension_numbers = #tpu.dot_dimension_numbers<[1], [0], [0], [1], [0, 0, 1, 1], [], []>} : vector<2x64xbf16>, vector<64x256xbf16>, vector<2x256xf32> -> vector<2x256xf32>
    %218 = arith.addf %214, %217 : vector<2x256xf32>
    %219 = vector.extract_strided_slice %199 {offsets = [8, 0], sizes = [2, 64], strides = [1, 1]} : vector<16x64xbf16> to vector<2x64xbf16>
    %c256 = arith.constant 256 : index
    %c0_136 = arith.constant 0 : index
    %220 = vector.load %arg15[%c256, %c0_136] : memref<512x256xbf16, #tpu.memory_space<vmem>>, vector<64x256xbf16>
    %cst_137 = arith.constant dense<0.000000e+00> : vector<2x256xf32>
    %221 = tpu.matmul %219, %220, %cst_137 {dimension_numbers = #tpu.dot_dimension_numbers<[1], [0], [0], [1], [0, 0, 1, 1], [], []>} : vector<2x64xbf16>, vector<64x256xbf16>, vector<2x256xf32> -> vector<2x256xf32>
    %222 = arith.addf %218, %221 : vector<2x256xf32>
    %223 = vector.extract_strided_slice %199 {offsets = [10, 0], sizes = [2, 64], strides = [1, 1]} : vector<16x64xbf16> to vector<2x64xbf16>
    %c320 = arith.constant 320 : index
    %c0_138 = arith.constant 0 : index
    %224 = vector.load %arg15[%c320, %c0_138] : memref<512x256xbf16, #tpu.memory_space<vmem>>, vector<64x256xbf16>
    %cst_139 = arith.constant dense<0.000000e+00> : vector<2x256xf32>
    %225 = tpu.matmul %223, %224, %cst_139 {dimension_numbers = #tpu.dot_dimension_numbers<[1], [0], [0], [1], [0, 0, 1, 1], [], []>} : vector<2x64xbf16>, vector<64x256xbf16>, vector<2x256xf32> -> vector<2x256xf32>
    %226 = arith.addf %222, %225 : vector<2x256xf32>
    %227 = vector.extract_strided_slice %199 {offsets = [12, 0], sizes = [2, 64], strides = [1, 1]} : vector<16x64xbf16> to vector<2x64xbf16>
    %c384 = arith.constant 384 : index
    %c0_140 = arith.constant 0 : index
    %228 = vector.load %arg15[%c384, %c0_140] : memref<512x256xbf16, #tpu.memory_space<vmem>>, vector<64x256xbf16>
    %cst_141 = arith.constant dense<0.000000e+00> : vector<2x256xf32>
    %229 = tpu.matmul %227, %228, %cst_141 {dimension_numbers = #tpu.dot_dimension_numbers<[1], [0], [0], [1], [0, 0, 1, 1], [], []>} : vector<2x64xbf16>, vector<64x256xbf16>, vector<2x256xf32> -> vector<2x256xf32>
    %230 = arith.addf %226, %229 : vector<2x256xf32>
    %231 = vector.extract_strided_slice %199 {offsets = [14, 0], sizes = [2, 64], strides = [1, 1]} : vector<16x64xbf16> to vector<2x64xbf16>
    %c448 = arith.constant 448 : index
    %c0_142 = arith.constant 0 : index
    %232 = vector.load %arg15[%c448, %c0_142] : memref<512x256xbf16, #tpu.memory_space<vmem>>, vector<64x256xbf16>
    %cst_143 = arith.constant dense<0.000000e+00> : vector<2x256xf32>
    %233 = tpu.matmul %231, %232, %cst_143 {dimension_numbers = #tpu.dot_dimension_numbers<[1], [0], [0], [1], [0, 0, 1, 1], [], []>} : vector<2x64xbf16>, vector<64x256xbf16>, vector<2x256xf32> -> vector<2x256xf32>
    %234 = arith.addf %230, %233 : vector<2x256xf32>
    %c0_144 = arith.constant 0 : index
    %c0_145 = arith.constant 0 : index
    %235 = vector.load %arg11[%c0_144, %c0_145] : memref<1x256xf32, #tpu.memory_space<vmem>>, vector<1x256xf32>
    %236 = vector.broadcast %235 : vector<1x256xf32> to vector<2x256xf32>
    %237 = arith.addf %234, %236 : vector<2x256xf32>
    %238 = math.tanh %237 : vector<2x256xf32>
    %c0_146 = arith.constant 0 : index
    %c0_147 = arith.constant 0 : index
    %239 = vector.load %arg12[%c0_146, %c0_147] : memref<1x256xf32, #tpu.memory_space<vmem>>, vector<1x256xf32>
    %240 = vector.broadcast %239 : vector<1x256xf32> to vector<2x256xf32>
    %241 = arith.mulf %238, %240 : vector<2x256xf32>
    %cst_148 = arith.constant dense<0.000000e+00> : vector<2xf32>
    %242 = vector.multi_reduction <add>, %241, %cst_148 [1] : vector<2x256xf32> to vector<2xf32>
    %243 = vector.shape_cast %242 : vector<2xf32> to vector<2x1xf32>
    %c0_149 = arith.constant 0 : index
    %c0_150 = arith.constant 0 : index
    %244 = vector.load %arg13[%c0_149, %c0_150] : memref<1x1xf32, #tpu.memory_space<vmem>>, vector<1x1xf32>
    %245 = vector.broadcast %244 : vector<1x1xf32> to vector<2x1xf32>
    %246 = arith.addf %243, %245 : vector<2x1xf32>
    %247 = arith.negf %246 : vector<2x1xf32>
    %248 = math.exp %247 : vector<2x1xf32>
    %cst_151 = arith.constant 1.000000e+00 : f32
    %249 = vector.broadcast %cst_151 : f32 to vector<2x1xf32>
    %250 = arith.addf %249, %248 : vector<2x1xf32>
    %251 = arith.divf %249, %250 : vector<2x1xf32>
    %c0_152 = arith.constant 0 : index
    %c0_153 = arith.constant 0 : index
    %252 = vector.load %arg14[%c0_152, %c0_153] : memref<2x1xf32, #tpu.memory_space<vmem>>, vector<2x1xf32>
    tpu.vector_store %arg14[%c0_152, %c0_153], %251 {strides = array<i32>} : memref<2x1xf32, #tpu.memory_space<vmem>>, vector<2x1xf32>,
    return
  }
}

</mosaic_0001>

<bundles_post_ra>
// kernel: discriminator_forward.1
= control target key start
LH: loop header
LB: loop body
LE: loop exit
PB: predicated region body
PF: predicated region fallthrough
CT: control target
= control target key end

     0   :  { %s7276_s0 = inlined_call_operand.vmem [shape: f32[8,512], index: 0, kind: input, shape index: {}]   ;;  %s7277_s1 = inlined_call_operand.vmem [shape: f32[16,8], index: 1, kind: input, shape index: {}]   ;;  %s7278_s2 = inlined_call_operand.vmem [shape: f32[16,1], index: 2, kind: input, shape index: {}]   ;;  %s7279_s3 = inlined_call_operand.vmem [shape: bf16[8,256,64], index: 3, kind: input, shape index: {}]   ;;  %s7280_s4 = inlined_call_operand.vmem [shape: f32[32,128], index: 4, kind: input, shape index: {}]   ;;  %s7281_s5 = inlined_call_operand.vmem [shape: f32[32,1], index: 5, kind: input, shape index: {}]   ;;  %s7282_s6 = inlined_call_operand.vmem [shape: bf16[4,32,128], index: 6, kind: input, shape index: {}]   ;;  %s7283_s7 = inlined_call_operand.vmem [shape: bf16[8,16,32], index: 7, kind: input, shape index: {}]   ;;  %s7284_s8 = inlined_call_operand.vmem [shape: f32[8,32,64], index: 8, kind: input, shape index: {}]   ;;  %s7285_s9 = inlined_call_operand.vmem [shape: f32[1,64], index: 9, kind: input, shape index: {}]   ;;  %s7286_s11 = inlined_call_operand.vmem [shape: f32[1,256], index: 11, kind: input, shape index: {}]   ;;  %s7287_s12 = inlined_call_operand.vmem [shape: f32[1,256], index: 12, kind: input, shape index: {}]   ;;  %s7288_s13 = inlined_call_operand.<no memory space> [shape: f32[1,1], index: 13, kind: input, shape index: {}]   ;;  %s7289_s14 = inlined_call_operand.vmem [shape: f32[2,1], index: 14, kind: output, shape index: {}]   ;;  %s7290_s10 = inlined_call_operand.vmem [shape: bf16[512,256], index: 10, kind: input, shape index: {}]  }
   0x1   :  { %v19_v0 = vstv %s7288_s13  ;;  %v65_v1 = vld [vmem:[%s7290_s10] sm:$0xf]  ;;  %v67_v2 = vld [vmem:[%s7290_s10 + $0x8] sm:$0xf]  ;;  %v69_v3 = vld [vmem:[%s7290_s10 + $0x4] sm:$0xf] }
   0x2   :  { %20 = vst [vmem:[#allocation4] sm:$0x1] %v19_v0  ;;  %66 = vst [vmem:[#allocation2] sm:$0xf] %v65_v1  ;;  %v71_v4 = vld [vmem:[%s7290_s10 + $0xc] sm:$0xff]   ;;  %v79_v7 = vld [vmem:[%s7290_s10 + $0x1c] sm:$0xff]  }
   0x3   :  { %68 = vst [vmem:[#allocation2 + $0x4] sm:$0xf] %v67_v2  ;;  %70 = vst [vmem:[#allocation2 + $0x8] sm:$0xf] %v69_v3  ;;  %v75_v5 = vld [vmem:[%s7290_s10 + $0x18] sm:$0xf] }
   0x4   :  { %v77_v6 = vld [vmem:[%s7290_s10 + $0x14] sm:$0xf]  ;;  %72 = vst [vmem:[#allocation2 + $0xc] sm:$0xff] %v71_v4   ;;  %76 = vst [vmem:[#allocation2 + $0x14] sm:$0xf] %v75_v5  ;;  %v87_v10 = vld [vmem:[%s7290_s10 + $0x2c] sm:$0xff]  }
   0x5   :  { %78 = vst [vmem:[#allocation2 + $0x18] sm:$0xf] %v77_v6  ;;  %v83_v8 = vld [vmem:[%s7290_s10 + $0x28] sm:$0xf]  ;;  %v85_v9 = vld [vmem:[%s7290_s10 + $0x24] sm:$0xf] }
   0x6   :  { %80 = vst [vmem:[#allocation2 + $0x1c] sm:$0xff] %v79_v7   ;;  %84 = vst [vmem:[#allocation2 + $0x24] sm:$0xf] %v83_v8  ;;  %v91_v11 = vld [vmem:[%s7290_s10 + $0x38] sm:$0xf]  ;;  %v95_v13 = vld [vmem:[%s7290_s10 + $0x3c] sm:$0xff]  }
   0x7   :  { %86 = vst [vmem:[#allocation2 + $0x28] sm:$0xf] %v85_v9  ;;  %v93_v12 = vld [vmem:[%s7290_s10 + $0x34] sm:$0xf]  ;;  %88 = vst [vmem:[#allocation2 + $0x2c] sm:$0xff] %v87_v10   ;;  %v103_v16 = vld [vmem:[%s7290_s10 + $0x4c] sm:$0xff]  }
   0x8   :  { %92 = vst [vmem:[#allocation2 + $0x34] sm:$0xf] %v91_v11  ;;  %94 = vst [vmem:[#allocation2 + $0x38] sm:$0xf] %v93_v12  ;;  %v99_v14 = vld [vmem:[%s7290_s10 + $0x48] sm:$0xf] }
   0x9   :  { %v101_v15 = vld [vmem:[%s7290_s10 + $0x44] sm:$0xf]  ;;  %96 = vst [vmem:[#allocation2 + $0x3c] sm:$0xff] %v95_v13   ;;  %100 = vst [vmem:[#allocation2 + $0x44] sm:$0xf] %v99_v14  ;;  %v111_v19 = vld [vmem:[%s7290_s10 + $0x5c] sm:$0xff]  }
   0xa   :  { %102 = vst [vmem:[#allocation2 + $0x48] sm:$0xf] %v101_v15  ;;  %v107_v17 = vld [vmem:[%s7290_s10 + $0x58] sm:$0xf]  ;;  %v109_v18 = vld [vmem:[%s7290_s10 + $0x54] sm:$0xf] }
   0xb   :  { %104 = vst [vmem:[#allocation2 + $0x4c] sm:$0xff] %v103_v16   ;;  %108 = vst [vmem:[#allocation2 + $0x54] sm:$0xf] %v107_v17  ;;  %v115_v20 = vld [vmem:[%s7290_s10 + $0x68] sm:$0xf]  ;;  %v119_v22 = vld [vmem:[%s7290_s10 + $0x6c] sm:$0xff]  }
   0xc   :  { %110 = vst [vmem:[#allocation2 + $0x58] sm:$0xf] %v109_v18  ;;  %v117_v21 = vld [vmem:[%s7290_s10 + $0x64] sm:$0xf]  ;;  %112 = vst [vmem:[#allocation2 + $0x5c] sm:$0xff] %v111_v19   ;;  %v127_v25 = vld [vmem:[%s7290_s10 + $0x7c] sm:$0xff]  }
   0xd   :  { %116 = vst [vmem:[#allocation2 + $0x64] sm:$0xf] %v115_v20  ;;  %118 = vst [vmem:[#allocation2 + $0x68] sm:$0xf] %v117_v21  ;;  %v123_v23 = vld [vmem:[%s7290_s10 + $0x78] sm:$0xf] }
   0xe   :  { %v125_v24 = vld [vmem:[%s7290_s10 + $0x74] sm:$0xf]  ;;  %120 = vst [vmem:[#allocation2 + $0x6c] sm:$0xff] %v119_v22   ;;  %124 = vst [vmem:[#allocation2 + $0x74] sm:$0xf] %v123_v23  ;;  %v135_v28 = vld [vmem:[%s7290_s10 + $0x8c] sm:$0xff]  }
   0xf   :  { %126 = vst [vmem:[#allocation2 + $0x78] sm:$0xf] %v125_v24  ;;  %v131_v26 = vld [vmem:[%s7290_s10 + $0x88] sm:$0xf]  ;;  %v133_v27 = vld [vmem:[%s7290_s10 + $0x84] sm:$0xf] }
  0x10   :  { %128 = vst [vmem:[#allocation2 + $0x7c] sm:$0xff] %v127_v25   ;;  %132 = vst [vmem:[#allocation2 + $0x84] sm:$0xf] %v131_v26  ;;  %v139_v29 = vld [vmem:[%s7290_s10 + $0x98] sm:$0xf]  ;;  %v143_v31 = vld [vmem:[%s7290_s10 + $0x9c] sm:$0xff]  }
  0x11   :  { %134 = vst [vmem:[#allocation2 + $0x88] sm:$0xf] %v133_v27  ;;  %v141_v30 = vld [vmem:[%s7290_s10 + $0x94] sm:$0xf]  ;;  %136 = vst [vmem:[#allocation2 + $0x8c] sm:$0xff] %v135_v28   ;;  %v151_v34 = vld [vmem:[%s7290_s10 + $0xac] sm:$0xff]  }
  0x12   :  { %140 = vst [vmem:[#allocation2 + $0x94] sm:$0xf] %v139_v29  ;;  %142 = vst [vmem:[#allocation2 + $0x98] sm:$0xf] %v141_v30  ;;  %v147_v32 = vld [vmem:[%s7290_s10 + $0xa8] sm:$0xf] }
  0x13   :  { %v149_v33 = vld [vmem:[%s7290_s10 + $0xa4] sm:$0xf]  ;;  %144 = vst [vmem:[#allocation2 + $0x9c] sm:$0xff] %v143_v31   ;;  %148 = vst [vmem:[#allocation2 + $0xa4] sm:$0xf] %v147_v32  ;;  %v159_v37 = vld [vmem:[%s7290_s10 + $0xbc] sm:$0xff]  }
  0x14   :  { %150 = vst [vmem:[#allocation2 + $0xa8] sm:$0xf] %v149_v33  ;;  %v155_v35 = vld [vmem:[%s7290_s10 + $0xb8] sm:$0xf]  ;;  %v157_v36 = vld [vmem:[%s7290_s10 + $0xb4] sm:$0xf] }
  0x15   :  { %152 = vst [vmem:[#allocation2 + $0xac] sm:$0xff] %v151_v34   ;;  %156 = vst [vmem:[#allocation2 + $0xb4] sm:$0xf] %v155_v35  ;;  %v163_v38 = vld [vmem:[%s7290_s10 + $0xc8] sm:$0xf]  ;;  %v167_v40 = vld [vmem:[%s7290_s10 + $0xcc] sm:$0xff]  }
  0x16   :  { %158 = vst [vmem:[#allocation2 + $0xb8] sm:$0xf] %v157_v36  ;;  %v165_v39 = vld [vmem:[%s7290_s10 + $0xc4] sm:$0xf]  ;;  %160 = vst [vmem:[#allocation2 + $0xbc] sm:$0xff] %v159_v37   ;;  %v175_v43 = vld [vmem:[%s7290_s10 + $0xdc] sm:$0xff]  }
  0x17   :  { %164 = vst [vmem:[#allocation2 + $0xc4] sm:$0xf] %v163_v38  ;;  %166 = vst [vmem:[#allocation2 + $0xc8] sm:$0xf] %v165_v39  ;;  %v171_v41 = vld [vmem:[%s7290_s10 + $0xd8] sm:$0xf] }
  0x18   :  { %v173_v42 = vld [vmem:[%s7290_s10 + $0xd4] sm:$0xf]  ;;  %168 = vst [vmem:[#allocation2 + $0xcc] sm:$0xff] %v167_v40   ;;  %172 = vst [vmem:[#allocation2 + $0xd4] sm:$0xf] %v171_v41  ;;  %v183_v46 = vld [vmem:[%s7290_s10 + $0xec] sm:$0xff]  }
  0x19   :  { %174 = vst [vmem:[#allocation2 + $0xd8] sm:$0xf] %v173_v42  ;;  %v179_v44 = vld [vmem:[%s7290_s10 + $0xe8] sm:$0xf]  ;;  %v181_v45 = vld [vmem:[%s7290_s10 + $0xe4] sm:$0xf] }
  0x1a   :  { %176 = vst [vmem:[#allocation2 + $0xdc] sm:$0xff] %v175_v43   ;;  %180 = vst [vmem:[#allocation2 + $0xe4] sm:$0xf] %v179_v44  ;;  %v187_v47 = vld [vmem:[%s7290_s10 + $0xf8] sm:$0xf]  ;;  %v191_v49 = vld [vmem:[%s7290_s10 + $0xfc] sm:$0xff]  }
  0x1b   :  { %182 = vst [vmem:[#allocation2 + $0xe8] sm:$0xf] %v181_v45  ;;  %v189_v48 = vld [vmem:[%s7290_s10 + $0xf4] sm:$0xf]  ;;  %184 = vst [vmem:[#allocation2 + $0xec] sm:$0xff] %v183_v46   ;;  %v199_v52 = vld [vmem:[%s7290_s10 + $0x10c] sm:$0xff]  }
  0x1c   :  { %188 = vst [vmem:[#allocation2 + $0xf4] sm:$0xf] %v187_v47  ;;  %190 = vst [vmem:[#allocation2 + $0xf8] sm:$0xf] %v189_v48  ;;  %v195_v50 = vld [vmem:[%s7290_s10 + $0x108] sm:$0xf] }
  0x1d   :  { %v197_v51 = vld [vmem:[%s7290_s10 + $0x104] sm:$0xf]  ;;  %192 = vst [vmem:[#allocation2 + $0xfc] sm:$0xff] %v191_v49   ;;  %196 = vst [vmem:[#allocation2 + $0x104] sm:$0xf] %v195_v50  ;;  %v207_v55 = vld [vmem:[%s7290_s10 + $0x11c] sm:$0xff]  }
  0x1e   :  { %198 = vst [vmem:[#allocation2 + $0x108] sm:$0xf] %v197_v51  ;;  %v203_v53 = vld [vmem:[%s7290_s10 + $0x118] sm:$0xf]  ;;  %v205_v54 = vld [vmem:[%s7290_s10 + $0x114] sm:$0xf] }
  0x1f   :  { %200 = vst [vmem:[#allocation2 + $0x10c] sm:$0xff] %v199_v52   ;;  %204 = vst [vmem:[#allocation2 + $0x114] sm:$0xf] %v203_v53  ;;  %v211_v56 = vld [vmem:[%s7290_s10 + $0x128] sm:$0xf]  ;;  %v215_v58 = vld [vmem:[%s7290_s10 + $0x12c] sm:$0xff]  }
  0x20   :  { %206 = vst [vmem:[#allocation2 + $0x118] sm:$0xf] %v205_v54  ;;  %v213_v57 = vld [vmem:[%s7290_s10 + $0x124] sm:$0xf]  ;;  %208 = vst [vmem:[#allocation2 + $0x11c] sm:$0xff] %v207_v55   ;;  %v223_v61 = vld [vmem:[%s7290_s10 + $0x13c] sm:$0xff]  }
  0x21   :  { %212 = vst [vmem:[#allocation2 + $0x124] sm:$0xf] %v211_v56  ;;  %214 = vst [vmem:[#allocation2 + $0x128] sm:$0xf] %v213_v57  ;;  %v219_v59 = vld [vmem:[%s7290_s10 + $0x138] sm:$0xf] }
  0x22   :  { %v221_v60 = vld [vmem:[%s7290_s10 + $0x134] sm:$0xf]  ;;  %216 = vst [vmem:[#allocation2 + $0x12c] sm:$0xff] %v215_v58   ;;  %220 = vst [vmem:[#allocation2 + $0x134] sm:$0xf] %v219_v59  ;;  %v231_v0 = vld [vmem:[%s7290_s10 + $0x14c] sm:$0xff]  }
  0x23   :  { %222 = vst [vmem:[#allocation2 + $0x138] sm:$0xf] %v221_v60  ;;  %v227_v62 = vld [vmem:[%s7290_s10 + $0x148] sm:$0xf]  ;;  %v229_v63 = vld [vmem:[%s7290_s10 + $0x144] sm:$0xf] }
  0x24   :  { %224 = vst [vmem:[#allocation2 + $0x13c] sm:$0xff] %v223_v61   ;;  %228 = vst [vmem:[#allocation2 + $0x144] sm:$0xf] %v227_v62  ;;  %v235_v1 = vld [vmem:[%s7290_s10 + $0x158] sm:$0xf]  ;;  %v239_v3 = vld [vmem:[%s7290_s10 + $0x15c] sm:$0xff]  }
  0x25   :  { %230 = vst [vmem:[#allocation2 + $0x148] sm:$0xf] %v229_v63  ;;  %v237_v2 = vld [vmem:[%s7290_s10 + $0x154] sm:$0xf]  ;;  %232 = vst [vmem:[#allocation2 + $0x14c] sm:$0xff] %v231_v0   ;;  %v247_v6 = vld [vmem:[%s7290_s10 + $0x16c] sm:$0xff]  }
  0x26   :  { %236 = vst [vmem:[#allocation2 + $0x154] sm:$0xf] %v235_v1  ;;  %238 = vst [vmem:[#allocation2 + $0x158] sm:$0xf] %v237_v2  ;;  %v243_v4 = vld [vmem:[%s7290_s10 + $0x168] sm:$0xf] }
  0x27   :  { %v245_v5 = vld [vmem:[%s7290_s10 + $0x164] sm:$0xf]  ;;  %240 = vst [vmem:[#allocation2 + $0x15c] sm:$0xff] %v239_v3   ;;  %244 = vst [vmem:[#allocation2 + $0x164] sm:$0xf] %v243_v4  ;;  %v255_v9 = vld [vmem:[%s7290_s10 + $0x17c] sm:$0xff]  }
  0x28   :  { %246 = vst [vmem:[#allocation2 + $0x168] sm:$0xf] %v245_v5  ;;  %v251_v7 = vld [vmem:[%s7290_s10 + $0x178] sm:$0xf]  ;;  %v253_v8 = vld [vmem:[%s7290_s10 + $0x174] sm:$0xf] }
  0x29   :  { %248 = vst [vmem:[#allocation2 + $0x16c] sm:$0xff] %v247_v6   ;;  %252 = vst [vmem:[#allocation2 + $0x174] sm:$0xf] %v251_v7  ;;  %v259_v10 = vld [vmem:[%s7290_s10 + $0x188] sm:$0xf]  ;;  %v263_v12 = vld [vmem:[%s7290_s10 + $0x18c] sm:$0xff]  }
  0x2a   :  { %254 = vst [vmem:[#allocation2 + $0x178] sm:$0xf] %v253_v8  ;;  %v261_v11 = vld [vmem:[%s7290_s10 + $0x184] sm:$0xf]  ;;  %256 = vst [vmem:[#allocation2 + $0x17c] sm:$0xff] %v255_v9   ;;  %v271_v15 = vld [vmem:[%s7290_s10 + $0x19c] sm:$0xff]  }
  0x2b   :  { %260 = vst [vmem:[#allocation2 + $0x184] sm:$0xf] %v259_v10  ;;  %262 = vst [vmem:[#allocation2 + $0x188] sm:$0xf] %v261_v11  ;;  %v267_v13 = vld [vmem:[%s7290_s10 + $0x198] sm:$0xf] }
  0x2c   :  { %v269_v14 = vld [vmem:[%s7290_s10 + $0x194] sm:$0xf]  ;;  %264 = vst [vmem:[#allocation2 + $0x18c] sm:$0xff] %v263_v12   ;;  %268 = vst [vmem:[#allocation2 + $0x194] sm:$0xf] %v267_v13  ;;  %v279_v18 = vld [vmem:[%s7290_s10 + $0x1ac] sm:$0xff]  }
  0x2d   :  { %270 = vst [vmem:[#allocation2 + $0x198] sm:$0xf] %v269_v14  ;;  %v275_v16 = vld [vmem:[%s7290_s10 + $0x1a8] sm:$0xf]  ;;  %v277_v17 = vld [vmem:[%s7290_s10 + $0x1a4] sm:$0xf] }
  0x2e   :  { %272 = vst [vmem:[#allocation2 + $0x19c] sm:$0xff] %v271_v15   ;;  %276 = vst [vmem:[#allocation2 + $0x1a4] sm:$0xf] %v275_v16  ;;  %v283_v19 = vld [vmem:[%s7290_s10 + $0x1b8] sm:$0xf]  ;;  %v287_v21 = vld [vmem:[%s7290_s10 + $0x1bc] sm:$0xff]  }
  0x2f   :  { %278 = vst [vmem:[#allocation2 + $0x1a8] sm:$0xf] %v277_v17  ;;  %v285_v20 = vld [vmem:[%s7290_s10 + $0x1b4] sm:$0xf]  ;;  %280 = vst [vmem:[#allocation2 + $0x1ac] sm:$0xff] %v279_v18   ;;  %v295_v24 = vld [vmem:[%s7290_s10 + $0x1cc] sm:$0xff]  }
  0x30   :  { %284 = vst [vmem:[#allocation2 + $0x1b4] sm:$0xf] %v283_v19  ;;  %286 = vst [vmem:[#allocation2 + $0x1b8] sm:$0xf] %v285_v20  ;;  %v291_v22 = vld [vmem:[%s7290_s10 + $0x1c8] sm:$0xf] }
  0x31   :  { %v293_v23 = vld [vmem:[%s7290_s10 + $0x1c4] sm:$0xf]  ;;  %288 = vst [vmem:[#allocation2 + $0x1bc] sm:$0xff] %v287_v21   ;;  %292 = vst [vmem:[#allocation2 + $0x1c4] sm:$0xf] %v291_v22  ;;  %v303_v27 = vld [vmem:[%s7290_s10 + $0x1dc] sm:$0xff]  }
  0x32   :  { %294 = vst [vmem:[#allocation2 + $0x1c8] sm:$0xf] %v293_v23  ;;  %v299_v25 = vld [vmem:[%s7290_s10 + $0x1d8] sm:$0xf]  ;;  %v301_v26 = vld [vmem:[%s7290_s10 + $0x1d4] sm:$0xf] }
  0x33   :  { %296 = vst [vmem:[#allocation2 + $0x1cc] sm:$0xff] %v295_v24   ;;  %300 = vst [vmem:[#allocation2 + $0x1d4] sm:$0xf] %v299_v25  ;;  %v307_v28 = vld [vmem:[%s7290_s10 + $0x1e8] sm:$0xf]  ;;  %v311_v30 = vld [vmem:[%s7290_s10 + $0x1ec] sm:$0xff]  }
  0x34   :  { %302 = vst [vmem:[#allocation2 + $0x1d8] sm:$0xf] %v301_v26  ;;  %v309_v29 = vld [vmem:[%s7290_s10 + $0x1e4] sm:$0xf]  ;;  %304 = vst [vmem:[#allocation2 + $0x1dc] sm:$0xff] %v303_v27   ;;  %v6052_v35 = vmov 1  }
  0x35   :  { %308 = vst [vmem:[#allocation2 + $0x1e4] sm:$0xf] %v307_v28  ;;  %310 = vst [vmem:[#allocation2 + $0x1e8] sm:$0xf] %v309_v29  ;;  %v315_v31 = vld [vmem:[%s7290_s10 + $0x1f8] sm:$0xf]  ;;  %5885 = vset.pattern.permute.xlu1 %v6052_v35 }
  0x36   :  { %v317_v32 = vld [vmem:[%s7290_s10 + $0x1f4] sm:$0xf]  ;;  %312 = vst [vmem:[#allocation2 + $0x1ec] sm:$0xff] %v311_v30   ;;  %316 = vst [vmem:[#allocation2 + $0x1f4] sm:$0xf] %v315_v31  ;;  %v6434_v34 = vld [vmem:[%s7277_s1] sm:$0xff] }
  0x37   :  { %318 = vst [vmem:[#allocation2 + $0x1f8] sm:$0xf] %v317_v32  ;;  %v319_v33 = vld [vmem:[%s7290_s10 + $0x1fc] sm:$0xf]  ;;  %v7291_v36 = vmov 0   ;;  %657 = vperm.xlu1 %5885, %v6434_v34   ;;  %v6442_v37 = vld [vmem:[%s7277_s1 + $0x8] sm:$0xff] }
  0x38   :  { %320 = vst [vmem:[#allocation2 + $0x1fc] sm:$0xf] %v319_v33  ;;  %5884 = vset.pattern.permute.xlu0 %v7291_v36 }
  0x39   :  { %616 = vperm.xlu0 %5884, %v6434_v34  }
  0x3a   :  { %607 = vsyncadd [#allocation3], 8192  ;;  %v6054_v38 = vmov 2   ;;  %v6055_v39 = vmov 3   ;;  %v6056_v40 = vmov 4   ;;  %v6057_v41 = vmov 5  }
  0x3b   :  { %661 = vperm.xlu1 %5885, %v6442_v37   ;;  %v5898_v42 = vld [vmem:[%s7279_s3 + $0x40] sm:$0xff]   ;;  %v6058_v46 = vmov 6   ;;  %v5902_v48 = vld [vmem:[%s7279_s3 + $0x48] sm:$0xff]   ;;  %v5906_v53 = vld [vmem:[%s7279_s3 + $0x50] sm:$0xff]   ;;  %v6059_v0 = vmov 7   ;;  %v624_v20 = vlaneseq  ;;  %vm6061_vm0 = vmmov 0  }
  0x3c   :  { %v5899_v43 = vld [vmem:[%s7279_s3 + $0xc0] sm:$0xff]   ;;  %5048 = vmatprep.subr.bf16.mxu0 %v5898_v42  ;;  %v5903_v49 = vld [vmem:[%s7279_s3 + $0xc8] sm:$0xff]   ;;  %v5907_v54 = vld [vmem:[%s7279_s3 + $0xd0] sm:$0xff]   ;;  %vm2953_vm1 = vcmask 261120  }
  0x3d   :  { %621 = vperm.xlu0 %5884, %v6442_v37   ;;  %v5900_v44 = vld [vmem:[%s7279_s3] sm:$0xff]   ;;  %5076 = vmatprep.subr.bf16.mxu1 %v5899_v43  ;;  %v5904_v50 = vld [vmem:[%s7279_s3 + $0x8] sm:$0xff]   ;;  %v5908_v55 = vld [vmem:[%s7279_s3 + $0x10] sm:$0xff]   ;;  %v625_v21 = vshrl.u32 %v624_v20, 7 }
  0x3e   :  { %v5901_v45 = vld [vmem:[%s7279_s3 + $0x80] sm:$0xff]   ;;  %5049 = vmatpush3.bf16.msra.mxu0 %v5900_v44  ;;  %v5905_v51 = vld [vmem:[%s7279_s3 + $0x88] sm:$0xff]   ;;  %v5909_v56 = vld [vmem:[%s7279_s3 + $0x90] sm:$0xff]  }
  0x3f   :  { %5887 = vset.pattern.permute.xlu1 %v6054_v38  ;;  %v936_v47 = vld [vmem:[%s7278_s2] sm:$0xff]  ;;  %5077 = vmatpush3.bf16.msra.mxu1 %v5901_v45  ;;  %v2396_v52 = vld [vmem:[%s7281_s5 + $0x8] sm:$0xff]  ;;  %v2398_v57 = vld [vmem:[%s7281_s5 + $0x18] sm:$0xff]  ;;  %v6580_v23 = vsub.s32 1, %v625_v21  ;;  %v6594_v29 = vsub.s32 0, %v625_v21  ;;  %v706_v31 = vsub.s32 2, %v625_v21 }
  0x40   :  { %701 = vperm.xlu1 %5887, %v6442_v37   ;;  %5050 = vmatprep.subr.bf16.mxu0 %v5902_v48  ;;  %v5910_v58 = vld [vmem:[%s7279_s3 + $0x58] sm:$0xff]   ;;  %v5914_v62 = vld [vmem:[%s7279_s3 + $0x60] sm:$0xff]   ;;  %v5918_v3 = vld [vmem:[%s7279_s3 + $0x68] sm:$0xff]   ;;  %v746_v32 = vsub.s32 3, %v625_v21  ;;  %v786_v42 = vsub.s32 4, %v625_v21 }
  0x41   :  { %5886 = vset.pattern.permute.xlu0 %v6054_v38  ;;  %5078 = vmatprep.subr.bf16.mxu1 %v5903_v49  ;;  %v5911_v59 = vld [vmem:[%s7279_s3 + $0xd8] sm:$0xff]   ;;  %v5915_v63 = vld [vmem:[%s7279_s3 + $0xe0] sm:$0xff]   ;;  %v5919_v4 = vld [vmem:[%s7279_s3 + $0xe8] sm:$0xff]  }
  0x42   :  { %697 = vperm.xlu0 %5886, %v6434_v34   ;;  %5051 = vmatpush3.bf16.msra.mxu0 %v5904_v50  ;;  %v5912_v60 = vld [vmem:[%s7279_s3 + $0x18] sm:$0xff]   ;;  %v5916_v1 = vld [vmem:[%s7279_s3 + $0x20] sm:$0xff]   ;;  %v5920_v5 = vld [vmem:[%s7279_s3 + $0x28] sm:$0xff]   ;;  %v866_v50 = vsub.s32 6, %v625_v21 }
  0x43   :  { %5079 = vmatpush3.bf16.msra.mxu1 %v5905_v51  ;;  %5052 = vmatprep.subr.bf16.mxu0 %v5906_v53  ;;  %v5913_v61 = vld [vmem:[%s7279_s3 + $0x98] sm:$0xff]   ;;  %v5917_v2 = vld [vmem:[%s7279_s3 + $0xa0] sm:$0xff]   ;;  %v5921_v6 = vld [vmem:[%s7279_s3 + $0xa8] sm:$0xff]   ;;  %v906_v51 = vsub.s32 7, %v625_v21 }
  0x44   :  { %5888 = vset.pattern.permute.xlu1 %v6055_v39  ;;  %5080 = vmatprep.subr.bf16.mxu1 %v5907_v54  ;;  %v937_v7 = vld [vmem:[%s7278_s2 + $0x8] sm:$0xff]  ;;  %v5922_v8 = vld [vmem:[%s7279_s3 + $0x70] sm:$0xff]   ;;  %v2395_v12 = vld [vmem:[%s7281_s5] sm:$0xff] }
  0x45   :  { %737 = vperm.xlu1 %5888, %v6434_v34   ;;  %v5923_v9 = vld [vmem:[%s7279_s3 + $0xf0] sm:$0xff]   ;;  %v5926_v13 = vld [vmem:[%s7279_s3 + $0x78] sm:$0xff]   ;;  %v5930_v18 = vld [vmem:[%s7279_s3 + $0x140] sm:$0xff]  }
  0x46   :  { %5889 = vset.pattern.permute.xlu0 %v6055_v39  ;;  %5053 = vmatpush3.bf16.msra.mxu0 %v5908_v55  ;;  %v5924_v10 = vld [vmem:[%s7279_s3 + $0x30] sm:$0xff]   ;;  %v5927_v14 = vld [vmem:[%s7279_s3 + $0xf8] sm:$0xff]   ;;  %v5931_v19 = vld [vmem:[%s7279_s3 + $0x1c0] sm:$0xff]  }
  0x47   :  { %741 = vperm.xlu0 %5889, %v6442_v37   ;;  %5081 = vmatpush3.bf16.msra.mxu1 %v5909_v56  ;;  %v5925_v11 = vld [vmem:[%s7279_s3 + $0xb0] sm:$0xff]   ;;  %v5928_v15 = vld [vmem:[%s7279_s3 + $0x38] sm:$0xff]   ;;  %v608_v24 = vld [vmem:[%s7276_s0] sm:$0xff] }
  0x48   :  { %5054 = vmatprep.subr.bf16.mxu0 %v5910_v58  ;;  %5082 = vmatprep.subr.bf16.mxu1 %v5911_v59  ;;  %v5929_v16 = vld [vmem:[%s7279_s3 + $0xb8] sm:$0xff]   ;;  %v2397_v17 = vld [vmem:[%s7281_s5 + $0x10] sm:$0xff]  ;;  %v609_v25 = vld [vmem:[%s7276_s0 + $0x8] sm:$0xff]  ;;  %v667_v33 = vrot.slane %v608_v24, %v6580_v23  ;;  %v627_v39 = vrot.slane %v608_v24, %v6594_v29  ;;  %v707_v44 = vrot.slane %v608_v24, %v706_v31 }
  0x49   :  { %5890 = vset.pattern.permute.xlu1 %v6056_v40  ;;  %v610_v26 = vld [vmem:[%s7276_s0 + $0x10] sm:$0xff]  ;;  %v611_v28 = vld [vmem:[%s7276_s0 + $0x18] sm:$0xff]  ;;  %v631_v40 = vrot.slane %v609_v25, %v6594_v29  ;;  %v711_v45 = vrot.slane %v609_v25, %v706_v31  ;;  %v6610_v53 = vrot.slane %v609_v25, %v746_v32  ;;  %v6620_v58 = vrot.slane %v609_v25, %v786_v42 }
  0x4a   :  { %777 = vperm.xlu1 %5890, %v6434_v34   ;;  %5055 = vmatpush3.bf16.msra.mxu0 %v5912_v60  ;;  %v675_v35 = vrot.slane %v610_v26, %v6580_v23  ;;  %v639_v43 = vrot.slane %v611_v28, %v6594_v29  ;;  %v6606_v48 = vrot.slane %v610_v26, %v706_v31 }
  0x4b   :  { %5891 = vset.pattern.permute.xlu0 %v6057_v41  ;;  %5083 = vmatpush3.bf16.msra.mxu1 %v5913_v61  ;;  %v719_v49 = vrot.slane %v611_v28, %v706_v31  ;;  %v6612_v54 = vrot.slane %v610_v26, %v746_v32  ;;  %v6614_v55 = vrot.slane %v611_v28, %v746_v32 }
  0x4c   :  { %817 = vperm.xlu0 %5891, %v6434_v34   ;;  %5056 = vmatprep.subr.bf16.mxu0 %v5914_v62  ;;  %v6622_v59 = vrot.slane %v610_v26, %v786_v42  ;;  %v6624_v60 = vrot.slane %v611_v28, %v786_v42 }
  0x4d   :  { %5084 = vmatprep.subr.bf16.mxu1 %v5915_v63 }
  0x4e   :  { %781 = vperm.xlu1 %5890, %v6442_v37   ;;  %5057 = vmatpush3.bf16.msra.mxu0 %v5916_v1  ;;  %v6634_v1 = vrot.slane %v608_v24, %v866_v50 }
  0x4f   :  { %5085 = vmatpush3.bf16.msra.mxu1 %v5917_v2  ;;  %5058 = vmatprep.subr.bf16.mxu0 %v5918_v3  ;;  %v6636_v2 = vrot.slane %v609_v25, %v866_v50  ;;  %v6638_v3 = vrot.slane %v610_v26, %v866_v50 }
  0x50   :  { %5894 = vset.pattern.permute.xlu0 %v6058_v46  ;;  %5086 = vmatprep.subr.bf16.mxu1 %v5919_v4  ;;  %v6640_v4 = vrot.slane %v611_v28, %v866_v50 }
  0x51   :  { %861 = vperm.xlu0 %5894, %v6442_v37  }
  0x52   :  { %5892 = vset.pattern.permute.xlu1 %v6057_v41  ;;  %5059 = vmatpush3.bf16.msra.mxu0 %v5920_v5  ;;  %v635_v41 = vrot.slane %v610_v26, %v6594_v29  ;;  %v6642_v5 = vrot.slane %v608_v24, %v906_v51 }
  0x53   :  { %821 = vperm.xlu1 %5892, %v6442_v37   ;;  %5087 = vmatpush3.bf16.msra.mxu1 %v5921_v6  ;;  %v6644_v6 = vrot.slane %v609_v25, %v906_v51 }
  0x54   :  { %5060 = vmatprep.subr.bf16.mxu0 %v5922_v8  ;;  %5088 = vmatprep.subr.bf16.mxu1 %v5923_v9  ;;  %v6648_v8 = vrot.slane %v611_v28, %v906_v51 }
  0x55   :  { %5896 = vset.pattern.permute.xlu0 %v7291_v36 }
  0x56   :  { %940 = vperm.xlu0 %5896, %v936_v47   ;;  %5061 = vmatpush3.bf16.msra.mxu0 %v5924_v10 }
  0x57   :  { %5893 = vset.pattern.permute.xlu1 %v6058_v46  ;;  %5089 = vmatpush3.bf16.msra.mxu1 %v5925_v11  ;;  %v826_v46 = vsub.s32 5, %v625_v21 }
  0x58   :  { %857 = vperm.xlu1 %5893, %v6434_v34   ;;  %5062 = vmatprep.subr.bf16.mxu0 %v5926_v13 }
  0x59   :  { %5090 = vmatprep.subr.bf16.mxu1 %v5927_v14  ;;  %v6626_v61 = vrot.slane %v608_v24, %v826_v46  ;;  %v6628_v62 = vrot.slane %v609_v25, %v826_v46  ;;  %v6630_v63 = vrot.slane %v610_v26, %v826_v46 }
  0x5a   :  { %2406 = vperm.xlu0 %5896, %v2396_v52   ;;  %5063 = vmatpush3.bf16.msra.mxu0 %v5928_v15  ;;  %v6608_v52 = vrot.slane %v608_v24, %v746_v32 }
  0x5b   :  { %5091 = vmatpush3.bf16.msra.mxu1 %v5929_v16  ;;  %5104 = vmatprep.subr.bf16.mxu0 %v5930_v18 }
  0x5c   :  { %5895 = vset.pattern.permute.xlu1 %v6059_v0  ;;  %5132 = vmatprep.subr.bf16.mxu1 %v5931_v19  ;;  %v6632_v0 = vrot.slane %v611_v28, %v826_v46 }
  0x5d   :  { %897 = vperm.xlu1 %5895, %v6434_v34   ;;  %v671_v34 = vrot.slane %v609_v25, %v6580_v23 }
  0x5e   :  { %2416 = vperm.xlu0 %5896, %v2398_v57   ;;  %v6618_v57 = vrot.slane %v608_v24, %v786_v42 }
  0x61   :  { %901 = vperm.xlu1 %5895, %v6442_v37   ;;  %v679_v37 = vrot.slane %v611_v28, %v6580_v23 }
  0x65   :  { %5897 = vset.pattern.permute.xlu1 %v7291_v36 }
  0x66   :  { %945 = vperm.xlu1 %5897, %v937_v7   ;;  %v6646_v7 = vrot.slane %v610_v26, %v906_v51 }
  0x6a   :  { %2401 = vperm.xlu1 %5897, %v2395_v12  }
  0x6e   :  { %2411 = vperm.xlu1 %5897, %v2397_v17  }
  0xb6   :  { %v658_v22 = vpop.permute.xlu1 %657 }
  0xb7   :  { %v680_v9 = vmul.f32 %v667_v33, %v658_v22  ;;  %v681_v10 = vmul.f32 %v671_v34, %v658_v22  ;;  %v682_v14 = vmul.f32 %v675_v35, %v658_v22  ;;  %v683_v15 = vmul.f32 %v679_v37, %v658_v22 }
  0xb8   :  { %v617_v30 = vpop.permute.xlu0 %616 }
  0xb9   :  { %v640_v11 = vmul.f32 %v627_v39, %v617_v30  ;;  %v641_v12 = vmul.f32 %v631_v40, %v617_v30  ;;  %v642_v16 = vmul.f32 %v635_v41, %v617_v30  ;;  %v643_v17 = vmul.f32 %v639_v43, %v617_v30 }
  0xba   :  { %v662_v27 = vpop.permute.xlu1 %661 }
  0xbb   :  { %v684_v19 = vmul.f32 %v667_v33, %v662_v27  ;;  %v685_v20 = vmul.f32 %v671_v34, %v662_v27  ;;  %v686_v25 = vmul.f32 %v675_v35, %v662_v27  ;;  %v687_v31 = vmul.f32 %v679_v37, %v662_v27 }
  0xbc   :  { %v622_v47 = vpop.permute.xlu0 %621  ;;  %v688_v28 = vadd.f32 %v680_v9, %v640_v11  ;;  %v689_v42 = vadd.f32 %v681_v10, %v641_v12  ;;  %v690_v51 = vadd.f32 %v682_v14, %v642_v16  ;;  %v691_v36 = vadd.f32 %v683_v15, %v643_v17 }
  0xbd   :  { %v644_v21 = vmul.f32 %v627_v39, %v622_v47  ;;  %v645_v24 = vmul.f32 %v631_v40, %v622_v47  ;;  %v646_v26 = vmul.f32 %v635_v41, %v622_v47  ;;  %v647_v32 = vmul.f32 %v639_v43, %v622_v47 }
  0xbf   :  { %v6600_v38 = vpop.permute.xlu1 %701  ;;  %v692_v34 = vadd.f32 %v684_v19, %v644_v21  ;;  %v693_v39 = vadd.f32 %v685_v20, %v645_v24  ;;  %v694_v37 = vadd.f32 %v686_v25, %v646_v26  ;;  %v695_v41 = vadd.f32 %v687_v31, %v647_v32 }
  0xc0   :  { %v724_v46 = vmul.f32 %v707_v44, %v6600_v38  ;;  %v725_v50 = vmul.f32 %v711_v45, %v6600_v38  ;;  %v726_v22 = vmul.f32 %v6606_v48, %v6600_v38  ;;  %v727_v43 = vmul.f32 %v719_v49, %v6600_v38 }
  0xc1   :  { %v698_v13 = vpop.permute.xlu0 %697 }
  0xc2   :  { %v720_v30 = vmul.f32 %v707_v44, %v698_v13  ;;  %v721_v40 = vmul.f32 %v711_v45, %v698_v13  ;;  %v723_v35 = vmul.f32 %v719_v49, %v698_v13  ;;  %v732_v9 = vadd.f32 %v724_v46, %v692_v34 }
  0xc3   :  { %v733_v10 = vadd.f32 %v725_v50, %v693_v39  ;;  %v722_v11 = vmul.f32 %v6606_v48, %v698_v13  ;;  %v734_v12 = vadd.f32 %v726_v22, %v694_v37  ;;  %v735_v25 = vadd.f32 %v727_v43, %v695_v41 }
  0xc4   :  { %v6616_v56 = vpop.permute.xlu1 %737  ;;  %v728_v14 = vadd.f32 %v720_v30, %v688_v28  ;;  %v729_v16 = vadd.f32 %v721_v40, %v689_v42  ;;  %v731_v17 = vadd.f32 %v723_v35, %v691_v36 }
  0xc5   :  { %v760_v47 = vmul.f32 %v6608_v52, %v6616_v56  ;;  %v761_v44 = vmul.f32 %v6610_v53, %v6616_v56  ;;  %v763_v45 = vmul.f32 %v6614_v55, %v6616_v56  ;;  %v730_v31 = vadd.f32 %v722_v11, %v690_v51 }
  0xc6   :  { %v742_v27 = vpop.permute.xlu0 %741  ;;  %v762_v26 = vmul.f32 %v6612_v54, %v6616_v56 }
  0xc7   :  { %v764_v38 = vmul.f32 %v6608_v52, %v742_v27  ;;  %v765_v49 = vmul.f32 %v6610_v53, %v742_v27  ;;  %v768_v21 = vadd.f32 %v760_v47, %v728_v14  ;;  %v766_v48 = vmul.f32 %v6612_v54, %v742_v27 }
  0xc8   :  { %v767_v13 = vmul.f32 %v6614_v55, %v742_v27  ;;  %v769_v32 = vadd.f32 %v761_v44, %v729_v16  ;;  %v771_v36 = vadd.f32 %v763_v45, %v731_v17 }
  0xc9   :  { %v778_v18 = vpop.permute.xlu1 %777  ;;  %v772_v42 = vadd.f32 %v764_v38, %v732_v9  ;;  %v773_v46 = vadd.f32 %v765_v49, %v733_v10  ;;  %v774_v22 = vadd.f32 %v766_v48, %v734_v12  ;;  %v770_v38 = vadd.f32 %v762_v26, %v730_v31 }
  0xca   :  { %v800_v15 = vmul.f32 %v6618_v57, %v778_v18  ;;  %v801_v24 = vmul.f32 %v6620_v58, %v778_v18  ;;  %v803_v52 = vmul.f32 %v6624_v60, %v778_v18  ;;  %v775_v30 = vadd.f32 %v767_v13, %v735_v25 }
  0xcb   :  { %v818_v19 = vpop.permute.xlu0 %817  ;;  %v802_v54 = vmul.f32 %v6622_v59, %v778_v18 }
  0xcc   :  { %v808_v28 = vadd.f32 %v800_v15, %v768_v21  ;;  %v840_v53 = vmul.f32 %v6626_v61, %v818_v19  ;;  %v809_v34 = vadd.f32 %v801_v24, %v769_v32  ;;  %v841_v51 = vmul.f32 %v6628_v62, %v818_v19 }
  0xcd   :  { %v782_v33 = vpop.permute.xlu1 %781  ;;  %v811_v37 = vadd.f32 %v803_v52, %v771_v36  ;;  %v810_v48 = vadd.f32 %v802_v54, %v770_v38  ;;  %v842_v13 = vmul.f32 %v6630_v63, %v818_v19  ;;  %v5940_v38 = vld [vmem:[%s7279_s3 + $0x110] sm:$0xff]  }
  0xce   :  { %v804_v50 = vmul.f32 %v6618_v57, %v782_v33  ;;  %v805_v55 = vmul.f32 %v6620_v58, %v782_v33  ;;  %v807_v56 = vmul.f32 %v6624_v60, %v782_v33  ;;  %v843_v57 = vmul.f32 %v6632_v0, %v818_v19 }
  0xcf   :  { %v848_v41 = vadd.f32 %v840_v53, %v808_v28  ;;  %v849_v18 = vadd.f32 %v841_v51, %v809_v34  ;;  %v806_v60 = vmul.f32 %v6622_v59, %v782_v33  ;;  %v850_v54 = vadd.f32 %v842_v13, %v810_v48  ;;  %v5947_v48 = vld [vmem:[%s7279_s3 + $0x1e0] sm:$0xff]  }
  0xd0   :  { %v862_v27 = vpop.permute.xlu0 %861  ;;  %v812_v43 = vadd.f32 %v804_v50, %v772_v42  ;;  %v813_v47 = vadd.f32 %v805_v55, %v773_v46  ;;  %v815_v11 = vadd.f32 %v807_v56, %v775_v30  ;;  %v851_v33 = vadd.f32 %v843_v57, %v811_v37  ;;  %v5948_v13 = vld [vmem:[%s7279_s3 + $0x120] sm:$0xff]  }
  0xd1   :  { %v887_v59 = vmul.f32 %v6640_v4, %v862_v27  ;;  %v886_v24 = vmul.f32 %v6638_v3, %v862_v27 }
  0xd2   :  { %v822_v20 = vpop.permute.xlu1 %821 }
  0xd3   :  { %v844_v40 = vmul.f32 %v6626_v61, %v822_v20  ;;  %v845_v35 = vmul.f32 %v6628_v62, %v822_v20  ;;  %v847_v9 = vmul.f32 %v6632_v0, %v822_v20  ;;  %v884_v61 = vmul.f32 %v6634_v1, %v862_v27 }
  0xd4   :  { %v885_v62 = vmul.f32 %v6636_v2, %v862_v27  ;;  %v846_v44 = vmul.f32 %v6630_v63, %v822_v20 }
  0xd5   :  { %v852_v12 = vadd.f32 %v844_v40, %v812_v43  ;;  %v853_v14 = vadd.f32 %v845_v35, %v813_v47  ;;  %v855_v49 = vadd.f32 %v847_v9, %v815_v11  ;;  %v941_v53 = vpop.permute.xlu0 %940  ;;  %v5935_v11 = vld [vmem:[%s7279_s3 + $0x1c8] sm:$0xff]  }
  0xd7   :  { %v858_v39 = vpop.permute.xlu1 %857  ;;  %v892_v52 = vadd.f32 %v884_v61, %v852_v12  ;;  %v893_v28 = vadd.f32 %v885_v62, %v853_v14  ;;  %v895_v26 = vadd.f32 %v887_v59, %v855_v49  ;;  %v5934_v62 = vld [vmem:[%s7279_s3 + $0x148] sm:$0xff]   ;;  %v5941_v49 = vld [vmem:[%s7279_s3 + $0x190] sm:$0xff]  }
  0xd8   :  { %v880_v58 = vmul.f32 %v6634_v1, %v858_v39  ;;  %v881_v10 = vmul.f32 %v6636_v2, %v858_v39  ;;  %v883_v15 = vmul.f32 %v6640_v4, %v858_v39  ;;  %v814_v2 = vadd.f32 %v806_v60, %v774_v22  ;;  %v5936_v14 = vld [vmem:[%s7279_s3 + $0x108] sm:$0xff]  }
  0xd9   :  { %v882_v50 = vmul.f32 %v6638_v3, %v858_v39 }
  0xda   :  { %v888_v16 = vadd.f32 %v880_v58, %v848_v41  ;;  %v889_v1 = vadd.f32 %v881_v10, %v849_v18  ;;  %v854_v36 = vadd.f32 %v846_v44, %v814_v2  ;;  %v891_v31 = vadd.f32 %v883_v15, %v851_v33  ;;  %v5933_v18 = vld [vmem:[%s7279_s3 + $0x180] sm:$0xff]   ;;  %v5943_v33 = vld [vmem:[%s7279_s3 + $0x1d8] sm:$0xff]  }
  0xdb   :  { %v890_v37 = vadd.f32 %v882_v50, %v850_v54  ;;  %v5944_v2 = vld [vmem:[%s7279_s3 + $0x118] sm:$0xff]   ;;  %v5969_v54 = vld [vmem:[%s7279_s3 + $0x288] sm:$0xff]  }
  0xdc   :  { %v898_v45 = vpop.permute.xlu1 %897  ;;  %v894_v56 = vadd.f32 %v886_v24, %v854_v36  ;;  %v5949_v24 = vld [vmem:[%s7279_s3 + $0x1a0] sm:$0xff]   ;;  %v5952_v36 = vld [vmem:[%s7279_s3 + $0x128] sm:$0xff]   ;;  %v5961_v50 = vld [vmem:[%s7279_s3 + $0x1b8] sm:$0xff]  }
  0xdd   :  { %v920_v0 = vmul.f32 %v6642_v5, %v898_v45  ;;  %v921_v17 = vmul.f32 %v6644_v6, %v898_v45  ;;  %v923_v21 = vmul.f32 %v6648_v8, %v898_v45  ;;  %v922_v40 = vmul.f32 %v6646_v7, %v898_v45  ;;  %v5937_v45 = vld [vmem:[%s7279_s3 + $0x188] sm:$0xff]  }
  0xdf   :  { %v928_v20 = vadd.f32 %v920_v0, %v888_v16  ;;  %v929_v25 = vadd.f32 %v921_v17, %v889_v1  ;;  %v931_v55 = vadd.f32 %v923_v21, %v891_v31  ;;  %v930_v43 = vadd.f32 %v922_v40, %v890_v37  ;;  %v5938_v16 = vld [vmem:[%s7279_s3 + $0x150] sm:$0xff]   ;;  %v5942_v1 = vld [vmem:[%s7279_s3 + $0x158] sm:$0xff]  }
  0xe0   :  { %v902_v32 = vpop.permute.xlu1 %901  ;;  %v5939_v0 = vld [vmem:[%s7279_s3 + $0x1d0] sm:$0xff]   ;;  %v5945_v21 = vld [vmem:[%s7279_s3 + $0x198] sm:$0xff]  }
  0xe1   :  { %v924_v4 = vmul.f32 %v6642_v5, %v902_v32  ;;  %v925_v42 = vmul.f32 %v6644_v6, %v902_v32  ;;  %v927_v46 = vmul.f32 %v6648_v8, %v902_v32  ;;  %v948_v63 = vadd.f32 %v941_v53, %v928_v20  ;;  %v5946_v20 = vld [vmem:[%s7279_s3 + $0x160] sm:$0xff]   ;;  %v5955_v31 = vld [vmem:[%s7279_s3 + $0x1f0] sm:$0xff]   ;;  %v5976_v37 = vld [vmem:[%s7279_s3 + $0x218] sm:$0xff]  }
  0xe2   :  { %v926_v19 = vmul.f32 %v6646_v7, %v902_v32  ;;  %v949_v22 = vadd.f32 %v941_v53, %v929_v25  ;;  %v951_v8 = vadd.f32 %v941_v53, %v931_v55  ;;  %v5932_v7 = vld [vmem:[%s7279_s3 + $0x100] sm:$0xff]   ;;  %v950_v44 = vadd.f32 %v941_v53, %v930_v43  ;;  %v5950_v25 = vld [vmem:[%s7279_s3 + $0x168] sm:$0xff]   ;;  %v5957_v53 = vld [vmem:[%s7279_s3 + $0x1b0] sm:$0xff]  }
  0xe3   :  { %v932_v30 = vadd.f32 %v924_v4, %v892_v52  ;;  %v933_v34 = vadd.f32 %v925_v42, %v893_v28  ;;  %v935_v51 = vadd.f32 %v927_v46, %v895_v26  ;;  %v956_v3 = vmax.f32 %v948_v63, 0.0  ;;  %v5951_v32 = vld [vmem:[%s7279_s3 + $0x1e8] sm:$0xff]   ;;  %v5954_v28 = vld [vmem:[%s7279_s3 + $0x170] sm:$0xff]   ;;  %v5958_v4 = vld [vmem:[%s7279_s3 + $0x178] sm:$0xff]  }
  0xe4   :  { %v934_v57 = vadd.f32 %v926_v19, %v894_v56  ;;  %v957_v39 = vmax.f32 %v949_v22, 0.0  ;;  %v959_v60 = vmax.f32 %v951_v8, 0.0  ;;  %v958_v17 = vmax.f32 %v950_v44, 0.0  ;;  %v5953_v52 = vld [vmem:[%s7279_s3 + $0x1a8] sm:$0xff]   ;;  %v5956_v26 = vld [vmem:[%s7279_s3 + $0x130] sm:$0xff]   ;;  %v5959_v42 = vld [vmem:[%s7279_s3 + $0x1f8] sm:$0xff]  }
  0xe5   :  { %v946_v35 = vpop.permute.xlu1 %945  ;;  %v5960_v46 = vld [vmem:[%s7279_s3 + $0x138] sm:$0xff]   ;;  %v5962_v55 = vld [vmem:[%s7279_s3 + $0x240] sm:$0xff]   ;;  %v5970_v56 = vld [vmem:[%s7279_s3 + $0x250] sm:$0xff]  }
  0xe6   :  { %v952_v5 = vadd.f32 %v946_v35, %v932_v30  ;;  %v953_v27 = vadd.f32 %v946_v35, %v933_v34  ;;  %v955_v6 = vadd.f32 %v946_v35, %v935_v51  ;;  %v954_v61 = vadd.f32 %v946_v35, %v934_v57  ;;  %v5963_v63 = vld [vmem:[%s7279_s3 + $0x2c0] sm:$0xff]   ;;  %v5966_v30 = vld [vmem:[%s7279_s3 + $0x248] sm:$0xff]   ;;  %v5971_v40 = vld [vmem:[%s7279_s3 + $0x2d0] sm:$0xff]  }
  0xe7   :  { %v5964_v19 = vld [vmem:[%s7279_s3 + $0x200] sm:$0xff]   ;;  %v5967_v34 = vld [vmem:[%s7279_s3 + $0x2c8] sm:$0xff]   ;;  %v5972_v35 = vld [vmem:[%s7279_s3 + $0x210] sm:$0xff]  }
  0xe8   :  { %v960_v41 = vmax.f32 %v952_v5, 0.0  ;;  %v961_v58 = vmax.f32 %v953_v27, 0.0  ;;  %v963_v47 = vmax.f32 %v955_v6, 0.0  ;;  %v962_v15 = vmax.f32 %v954_v61, 0.0  ;;  %v5965_v22 = vld [vmem:[%s7279_s3 + $0x280] sm:$0xff]   ;;  %v5968_v51 = vld [vmem:[%s7279_s3 + $0x208] sm:$0xff]  }
  0xe9   :  { %v5973_v5 = vld [vmem:[%s7279_s3 + $0x290] sm:$0xff]   ;;  %v5974_v27 = vld [vmem:[%s7279_s3 + $0x258] sm:$0xff]   ;;  %v5978_v57 = vld [vmem:[%s7279_s3 + $0x260] sm:$0xff]  }
  0xea   :  { %v6700_v9 = vpack.c.bf16 %v960_v41, %v956_v3  ;;  %v6702_v10 = vpack.c.bf16 %v961_v58, %v957_v39  ;;  %v6718_v12 = vpack.c.bf16 %v963_v47, %v959_v60  ;;  %v6742_v59 = vpack.c.bf16 %v962_v15, %v958_v17  ;;  %v5975_v6 = vld [vmem:[%s7279_s3 + $0x2d8] sm:$0xff]   ;;  %v5979_v3 = vld [vmem:[%s7279_s3 + $0x2e0] sm:$0xff]   ;;  %v5982_v58 = vld [vmem:[%s7279_s3 + $0x268] sm:$0xff]  }
  0xeb   :  { %v5977_v8 = vld [vmem:[%s7279_s3 + $0x298] sm:$0xff]   ;;  %v5980_v39 = vld [vmem:[%s7279_s3 + $0x220] sm:$0xff]   ;;  %v5983_v43 = vld [vmem:[%s7279_s3 + $0x2e8] sm:$0xff]  }
  0xec   :  { %1132 = vmatprep.mubr.bf16.mxu0 %v6702_v10  ;;  %1310 = vmatprep.mubr.bf16.mxu1 %v6702_v10  ;;  %v5981_v41 = vld [vmem:[%s7279_s3 + $0x2a0] sm:$0xff]   ;;  %v5984_v47 = vld [vmem:[%s7279_s3 + $0x228] sm:$0xff]   ;;  %v5987_v60 = vld [vmem:[%s7279_s3 + $0x2f0] sm:$0xff]  }
  0xed   :  { %1133 = vmatmul.mubr.bf16.vlgmr.msra.gmra.mrb[0].mxu0 %v6700_v9  ;;  %1311 = vmatmul.mubr.bf16.vlgmr.msra.gmra.mrb[0].mxu1 %v6700_v9  ;;  %v5988_v61 = vld [vmem:[%s7279_s3 + $0x230] sm:$0xff]   ;;  %v5991_v44 = vld [vmem:[%s7279_s3 + $0x2f8] sm:$0xff]   ;;  %v5994_v15 = vld [vmem:[%s7279_s3 + $0x340] sm:$0xff]  }
  0xee   :  { %5105 = vmatpush3.bf16.msra.mxu0 %v5932_v7  ;;  %5133 = vmatpush3.bf16.msra.mxu1 %v5933_v18  ;;  %v5985_v7 = vld [vmem:[%s7279_s3 + $0x2a8] sm:$0xff]   ;;  %v5986_v18 = vld [vmem:[%s7279_s3 + $0x270] sm:$0xff]   ;;  %v5997_v17 = vld [vmem:[%s7279_s3 + $0x380] sm:$0xff]  }
  0xef   :  { %1140 = vmatprep.mubr.bf16.mxu0 %v6718_v12  ;;  %1318 = vmatprep.mubr.bf16.mxu1 %v6718_v12 }
  0xf0   :  { %5106 = vmatprep.subr.bf16.mxu0 %v5934_v62  ;;  %5134 = vmatprep.subr.bf16.mxu1 %v5935_v11  ;;  %v5989_v62 = vld [vmem:[%s7279_s3 + $0x2b0] sm:$0xff]   ;;  %v5990_v11 = vld [vmem:[%s7279_s3 + $0x278] sm:$0xff]  }
  0xf2   :  { %5107 = vmatpush3.bf16.msra.mxu0 %v5936_v14  ;;  %5135 = vmatpush3.bf16.msra.mxu1 %v5937_v45  ;;  %v5992_v14 = vld [vmem:[%s7279_s3 + $0x238] sm:$0xff]  }
  0xf3   :  { %5108 = vmatprep.subr.bf16.mxu0 %v5938_v16  ;;  %5136 = vmatprep.subr.bf16.mxu1 %v5939_v0  ;;  %v5993_v45 = vld [vmem:[%s7279_s3 + $0x2b8] sm:$0xff]   ;;  %v5995_v16 = vld [vmem:[%s7279_s3 + $0x3c0] sm:$0xff]  }
  0xf4   :  { %v5996_v0 = vld [vmem:[%s7279_s3 + $0x300] sm:$0xff]  }
  0xf5   :  { %1141 = vmatmul.mubr.bf16.gmra.mrb[4].mxu0 %v6742_v59  ;;  %1319 = vmatmul.mubr.bf16.gmra.mrb[4].mxu1 %v6742_v59 }
  0xf6   :  { %5109 = vmatpush3.bf16.msra.mxu0 %v5940_v38  ;;  %5137 = vmatpush3.bf16.msra.mxu1 %v5941_v49  ;;  %v5998_v38 = vld [vmem:[%s7279_s3 + $0x348] sm:$0xff]  }
  0xf7   :  { %1488 = vmatprep.mubr.bf16.mxu0 %v6702_v10  ;;  %1666 = vmatprep.mubr.bf16.mxu1 %v6702_v10  ;;  %v5999_v49 = vld [vmem:[%s7279_s3 + $0x3c8] sm:$0xff]  }
  0xf8   :  { %5110 = vmatprep.subr.bf16.mxu0 %v5942_v1  ;;  %5138 = vmatprep.subr.bf16.mxu1 %v5943_v33  ;;  %v6000_v1 = vld [vmem:[%s7279_s3 + $0x308] sm:$0xff]  }
  0xf9   :  { %v6001_v33 = vld [vmem:[%s7279_s3 + $0x388] sm:$0xff]  }
  0xfa   :  { %5111 = vmatpush3.bf16.msra.mxu0 %v5944_v2  ;;  %5139 = vmatpush3.bf16.msra.mxu1 %v5945_v21  ;;  %v6002_v2 = vld [vmem:[%s7279_s3 + $0x350] sm:$0xff]  }
  0xfb   :  { %5112 = vmatprep.subr.bf16.mxu0 %v5946_v20  ;;  %5140 = vmatprep.subr.bf16.mxu1 %v5947_v48  ;;  %v6003_v21 = vld [vmem:[%s7279_s3 + $0x3d0] sm:$0xff]  }
  0xfc   :  { %v6004_v20 = vld [vmem:[%s7279_s3 + $0x310] sm:$0xff]  }
  0xfd   :  { %v6005_v48 = vld [vmem:[%s7279_s3 + $0x390] sm:$0xff]  }
  0xfe   :  { %5113 = vmatpush3.bf16.msra.mxu0 %v5948_v13  ;;  %5141 = vmatpush3.bf16.msra.mxu1 %v5949_v24  ;;  %v6006_v13 = vld [vmem:[%s7279_s3 + $0x358] sm:$0xff]  }
  0xff   :  { %5114 = vmatprep.subr.bf16.mxu0 %v5950_v25  ;;  %5142 = vmatprep.subr.bf16.mxu1 %v5951_v32  ;;  %v6007_v24 = vld [vmem:[%s7279_s3 + $0x3d8] sm:$0xff]  }
 0x100   :  { %v6008_v25 = vld [vmem:[%s7279_s3 + $0x318] sm:$0xff]  }
 0x101   :  { %v6009_v32 = vld [vmem:[%s7279_s3 + $0x398] sm:$0xff]  }
 0x102   :  { %5115 = vmatpush3.bf16.msra.mxu0 %v5952_v36  ;;  %5143 = vmatpush3.bf16.msra.mxu1 %v5953_v52  ;;  %v6010_v36 = vld [vmem:[%s7279_s3 + $0x360] sm:$0xff]  }
 0x103   :  { %5116 = vmatprep.subr.bf16.mxu0 %v5954_v28  ;;  %5144 = vmatprep.subr.bf16.mxu1 %v5955_v31  ;;  %v6012_v52 = vld [vmem:[%s7279_s3 + $0x320] sm:$0xff]   ;;  %v6014_v31 = vld [vmem:[%s7279_s3 + $0x368] sm:$0xff]  }
 0x104   :  { %v6013_v28 = vld [vmem:[%s7279_s3 + $0x3a0] sm:$0xff]  }
 0x106   :  { %5117 = vmatpush3.bf16.msra.mxu0 %v5956_v26  ;;  %5145 = vmatpush3.bf16.msra.mxu1 %v5957_v53  ;;  %v6015_v26 = vld [vmem:[%s7279_s3 + $0x3e8] sm:$0xff]  }
 0x107   :  { %5118 = vmatprep.subr.bf16.mxu0 %v5958_v4  ;;  %5146 = vmatprep.subr.bf16.mxu1 %v5959_v42  ;;  %v6016_v53 = vld [vmem:[%s7279_s3 + $0x328] sm:$0xff]   ;;  %v6018_v42 = vld [vmem:[%s7279_s3 + $0x370] sm:$0xff]  }
 0x108   :  { %v6017_v4 = vld [vmem:[%s7279_s3 + $0x3a8] sm:$0xff]  }
 0x10a   :  { %5119 = vmatpush3.bf16.msra.mxu0 %v5960_v46  ;;  %5147 = vmatpush3.bf16.msra.mxu1 %v5961_v50  ;;  %v6019_v46 = vld [vmem:[%s7279_s3 + $0x3f0] sm:$0xff]  }
 0x10b   :  { %5160 = vmatprep.subr.bf16.mxu0 %v5962_v55  ;;  %5188 = vmatprep.subr.bf16.mxu1 %v5963_v63  ;;  %v6020_v50 = vld [vmem:[%s7279_s3 + $0x330] sm:$0xff]   ;;  %v6022_v63 = vld [vmem:[%s7279_s3 + $0x378] sm:$0xff]  }
 0x10c   :  { %v6021_v55 = vld [vmem:[%s7279_s3 + $0x3b0] sm:$0xff]  }
 0x10d   :  { %1489 = vmatmul.mubr.bf16.vlgmr.msra.gmra.mrb[8].mxu0 %v6700_v9  ;;  %1667 = vmatmul.mubr.bf16.vlgmr.msra.gmra.mrb[8].mxu1 %v6700_v9 }
 0x10e   :  { %1496 = vmatprep.mubr.bf16.mxu0 %v6718_v12  ;;  %1674 = vmatprep.mubr.bf16.mxu1 %v6718_v12 }
 0x10f   :  { %5161 = vmatpush3.bf16.msra.mxu0 %v5964_v19  ;;  %5189 = vmatpush3.bf16.msra.mxu1 %v5965_v22  ;;  %v6023_v19 = vld [vmem:[%s7279_s3 + $0x3f8] sm:$0xff]  }
 0x110   :  { %5162 = vmatprep.subr.bf16.mxu0 %v5966_v30  ;;  %5190 = vmatprep.subr.bf16.mxu1 %v5967_v34  ;;  %v6024_v22 = vld [vmem:[%s7279_s3 + $0x338] sm:$0xff]   ;;  %v968_v34 = vld [vmem:[%s7280_s4] sm:$0xff] }
 0x111   :  { %v6025_v30 = vld [vmem:[%s7279_s3 + $0x3b8] sm:$0xff]  }
 0x113   :  { %5163 = vmatpush3.bf16.msra.mxu0 %v5968_v51  ;;  %5191 = vmatpush3.bf16.msra.mxu1 %v5969_v54 }
 0x114   :  { %5164 = vmatprep.subr.bf16.mxu0 %v5970_v56  ;;  %5192 = vmatprep.subr.bf16.mxu1 %v5971_v40 }
 0x115   :  { %1497 = vmatmul.mubr.bf16.gmra.mrb[12].mxu0 %v6742_v59  ;;  %1675 = vmatmul.mubr.bf16.gmra.mrb[12].mxu1 %v6742_v59 }
 0x116   :  { %1844 = vmatprep.mubr.bf16.mxu0 %v6702_v10  ;;  %2022 = vmatprep.mubr.bf16.mxu1 %v6702_v10 }
 0x117   :  { %5165 = vmatpush3.bf16.msra.mxu0 %v5972_v35  ;;  %5193 = vmatpush3.bf16.msra.mxu1 %v5973_v5 }
 0x118   :  { %5166 = vmatprep.subr.bf16.mxu0 %v5974_v27  ;;  %5194 = vmatprep.subr.bf16.mxu1 %v5975_v6 }
 0x11b   :  { %5167 = vmatpush3.bf16.msra.mxu0 %v5976_v37  ;;  %5195 = vmatpush3.bf16.msra.mxu1 %v5977_v8 }
 0x11c   :  { %5168 = vmatprep.subr.bf16.mxu0 %v5978_v57  ;;  %5196 = vmatprep.subr.bf16.mxu1 %v5979_v3 }
 0x11f   :  { %5169 = vmatpush3.bf16.msra.mxu0 %v5980_v39  ;;  %5197 = vmatpush3.bf16.msra.mxu1 %v5981_v41 }
 0x120   :  { %5170 = vmatprep.subr.bf16.mxu0 %v5982_v58  ;;  %5198 = vmatprep.subr.bf16.mxu1 %v5983_v43 }
 0x123   :  { %5171 = vmatpush3.bf16.msra.mxu0 %v5984_v47  ;;  %5199 = vmatpush3.bf16.msra.mxu1 %v5985_v7 }
 0x124   :  { %5172 = vmatprep.subr.bf16.mxu0 %v5986_v18  ;;  %5200 = vmatprep.subr.bf16.mxu1 %v5987_v60 }
 0x127   :  { %5173 = vmatpush3.bf16.msra.mxu0 %v5988_v61  ;;  %5201 = vmatpush3.bf16.msra.mxu1 %v5989_v62 }
 0x128   :  { %5174 = vmatprep.subr.bf16.mxu0 %v5990_v11  ;;  %5202 = vmatprep.subr.bf16.mxu1 %v5991_v44 }
 0x12b   :  { %5175 = vmatpush3.bf16.msra.mxu0 %v5992_v14  ;;  %5203 = vmatpush3.bf16.msra.mxu1 %v5993_v45 }
 0x12c   :  { %5216 = vmatprep.subr.bf16.mxu0 %v5994_v15  ;;  %5244 = vmatprep.subr.bf16.mxu1 %v5995_v16 }
 0x12e   :  { %1845 = vmatmul.mubr.bf16.vlgmr.msra.gmra.mrb[16].mxu0 %v6700_v9  ;;  %2023 = vmatmul.mubr.bf16.vlgmr.msra.gmra.mrb[16].mxu1 %v6700_v9 }
 0x12f   :  { %1852 = vmatprep.mubr.bf16.mxu0 %v6718_v12  ;;  %2030 = vmatprep.mubr.bf16.mxu1 %v6718_v12 }
 0x130   :  { %5217 = vmatpush3.bf16.msra.mxu0 %v5996_v0  ;;  %5245 = vmatpush3.bf16.msra.mxu1 %v5997_v17 }
 0x131   :  { %5218 = vmatprep.subr.bf16.mxu0 %v5998_v38  ;;  %5246 = vmatprep.subr.bf16.mxu1 %v5999_v49 }
 0x134   :  { %5219 = vmatpush3.bf16.msra.mxu0 %v6000_v1  ;;  %5247 = vmatpush3.bf16.msra.mxu1 %v6001_v33 }
 0x135   :  { %5220 = vmatprep.subr.bf16.mxu0 %v6002_v2  ;;  %5248 = vmatprep.subr.bf16.mxu1 %v6003_v21 }
 0x136   :  { %1853 = vmatmul.mubr.bf16.gmra.mrb[20].mxu0 %v6742_v59  ;;  %2031 = vmatmul.mubr.bf16.gmra.mrb[20].mxu1 %v6742_v59 }
 0x137   :  { %2200 = vmatprep.mubr.bf16.mxu0 %v6702_v10  ;;  %2378 = vmatprep.mubr.bf16.mxu1 %v6702_v10  ;;  %v6011_v10 = vld [vmem:[%s7279_s3 + $0x3e0] sm:$0xff]  }
 0x138   :  { %5221 = vmatpush3.bf16.msra.mxu0 %v6004_v20  ;;  %5249 = vmatpush3.bf16.msra.mxu1 %v6005_v48 }
 0x139   :  { %5222 = vmatprep.subr.bf16.mxu0 %v6006_v13  ;;  %5250 = vmatprep.subr.bf16.mxu1 %v6007_v24 }
 0x13c   :  { %5223 = vmatpush3.bf16.msra.mxu0 %v6008_v25  ;;  %5251 = vmatpush3.bf16.msra.mxu1 %v6009_v32 }
 0x13d   :  { %5224 = vmatprep.subr.bf16.mxu0 %v6010_v36  ;;  %5252 = vmatprep.subr.bf16.mxu1 %v6011_v10 }
 0x140   :  { %5225 = vmatpush3.bf16.msra.mxu0 %v6012_v52  ;;  %5253 = vmatpush3.bf16.msra.mxu1 %v6013_v28 }
 0x141   :  { %5226 = vmatprep.subr.bf16.mxu0 %v6014_v31  ;;  %5254 = vmatprep.subr.bf16.mxu1 %v6015_v26 }
 0x144   :  { %5227 = vmatpush3.bf16.msra.mxu0 %v6016_v53  ;;  %5255 = vmatpush3.bf16.msra.mxu1 %v6017_v4 }
 0x145   :  { %5228 = vmatprep.subr.bf16.mxu0 %v6018_v42  ;;  %5256 = vmatprep.subr.bf16.mxu1 %v6019_v46 }
 0x148   :  { %5229 = vmatpush3.bf16.msra.mxu0 %v6020_v50  ;;  %5257 = vmatpush3.bf16.msra.mxu1 %v6021_v55 }
 0x149   :  { %5230 = vmatprep.subr.bf16.mxu0 %v6022_v63  ;;  %5258 = vmatprep.subr.bf16.mxu1 %v6023_v19 }
 0x14c   :  { %5231 = vmatpush3.bf16.msra.mxu0 %v6024_v22  ;;  %5259 = vmatpush3.bf16.msra.mxu1 %v6025_v30 }
 0x14f   :  { %2201 = vmatmul.mubr.bf16.vlgmr.msra.gmra.mrb[24].mxu0 %v6700_v9  ;;  %2379 = vmatmul.mubr.bf16.vlgmr.msra.gmra.mrb[24].mxu1 %v6700_v9 }
 0x150   :  { %2208 = vmatprep.mubr.bf16.mxu0 %v6718_v12  ;;  %2386 = vmatprep.mubr.bf16.mxu1 %v6718_v12 }
 0x157   :  { %2209 = vmatmul.mubr.bf16.gmra.mrb[28].mxu0 %v6742_v59  ;;  %2387 = vmatmul.mubr.bf16.gmra.mrb[28].mxu1 %v6742_v59 }
 0x158   :  { %5456 = vmatprep.mubr.f32.mxu0 %v968_v34  ;;  %5494 = vmatprep.mubr.f32.mxu1 %v968_v34 }
 0x1c0   :  { %v5064_v51 = vpop.f32.mrb[0].mxu0  ;;  %v5092_v54 = vpop.f32.mrb[0].mxu1 }
 0x1c1   :  { %v5065_v56 = vpop.f32.mrb[1].mxu0  ;;  %v5093_v40 = vpop.f32.mrb[1].mxu1 }
 0x1c2   :  { %v5066_v35 = vadd.f32 %v5065_v56, %v5064_v51  ;;  %v5094_v9 = vadd.f32 %v5093_v40, %v5092_v54  ;;  %v5067_v5 = vpop.f32.mrb[2].mxu0  ;;  %v5095_v27 = vpop.f32.mrb[2].mxu1 }
 0x1c3   :  { %v5068_v6 = vpop.f32.mrb[3].mxu0  ;;  %v5096_v12 = vpop.f32.mrb[3].mxu1 }
 0x1c4   :  { %v5069_v37 = vadd.f32 %v5068_v6, %v5067_v5  ;;  %v5097_v8 = vadd.f32 %v5096_v12, %v5095_v27 }
 0x1c6   :  { %v5732_v57 = vpack.c.bf16 %v5069_v37, %v5066_v35  ;;  %v5736_v59 = vpack.c.bf16 %v5097_v8, %v5094_v9 }
 0x1c8   :  { %v5070_v3 = vpop.f32.mrb[4].mxu0  ;;  %v5098_v39 = vpop.f32.mrb[4].mxu1  ;;  %5733 = vmatprep.subr.bf16.mxu0 %v5732_v57 }
 0x1c9   :  { %v5071_v41 = vpop.f32.mrb[5].mxu0  ;;  %v5099_v58 = vpop.f32.mrb[5].mxu1  ;;  %5735 = vmatpush3.bf16.msra.mxu0 %v5732_v57 }
 0x1ca   :  { %v5072_v43 = vadd.f32 %v5071_v41, %v5070_v3  ;;  %v5100_v47 = vadd.f32 %v5099_v58, %v5098_v39  ;;  %v5073_v7 = vpop.f32.mrb[6].mxu0  ;;  %v5101_v18 = vpop.f32.mrb[6].mxu1  ;;  %5737 = vmatprep.subr.bf16.mxu0 %v5736_v59 }
 0x1cb   :  { %v5074_v60 = vpop.f32.mrb[7].mxu0  ;;  %v5102_v61 = vpop.f32.mrb[7].mxu1 }
 0x1cc   :  { %v5075_v62 = vadd.f32 %v5074_v60, %v5073_v7  ;;  %v5103_v11 = vadd.f32 %v5102_v61, %v5101_v18 }
 0x1cd   :  { %5739 = vmatpush3.bf16.msra.mxu0 %v5736_v59 }
 0x1ce   :  { %v5764_v44 = vpack.c.bf16 %v5075_v62, %v5072_v43  ;;  %v5768_v14 = vpack.c.bf16 %v5103_v11, %v5100_v47 }
 0x1d0   :  { %5765 = vmatprep.subr.bf16.mxu1 %v5764_v44 }
 0x1d1   :  { %5767 = vmatpush3.bf16.msra.mxu1 %v5764_v44 }
 0x1d2   :  { %5769 = vmatprep.subr.bf16.mxu1 %v5768_v14 }
 0x1d5   :  { %5771 = vmatpush3.bf16.msra.mxu1 %v5768_v14 }
 0x1e0   :  { %v5120_v45 = vpop.f32.mrb[8].mxu0  ;;  %v5148_v15 = vpop.f32.mrb[8].mxu1 }
 0x1e1   :  { %v5121_v16 = vpop.f32.mrb[9].mxu0  ;;  %v5149_v0 = vpop.f32.mrb[9].mxu1 }
 0x1e2   :  { %v5122_v17 = vadd.f32 %v5121_v16, %v5120_v45  ;;  %v5150_v38 = vadd.f32 %v5149_v0, %v5148_v15  ;;  %v5123_v49 = vpop.f32.mrb[10].mxu0  ;;  %v5151_v1 = vpop.f32.mrb[10].mxu1 }
 0x1e3   :  { %v5124_v33 = vpop.f32.mrb[11].mxu0  ;;  %v5152_v2 = vpop.f32.mrb[11].mxu1 }
 0x1e4   :  { %v5125_v21 = vadd.f32 %v5124_v33, %v5123_v49  ;;  %v5153_v20 = vadd.f32 %v5152_v2, %v5151_v1 }
 0x1e6   :  { %v5740_v48 = vpack.c.bf16 %v5125_v21, %v5122_v17  ;;  %v5744_v13 = vpack.c.bf16 %v5153_v20, %v5150_v38 }
 0x1e8   :  { %v5126_v24 = vpop.f32.mrb[12].mxu0  ;;  %v5154_v25 = vpop.f32.mrb[12].mxu1  ;;  %5741 = vmatprep.subr.bf16.mxu0 %v5740_v48 }
 0x1e9   :  { %v5127_v32 = vpop.f32.mrb[13].mxu0  ;;  %v5155_v36 = vpop.f32.mrb[13].mxu1  ;;  %5743 = vmatpush3.bf16.msra.mxu0 %v5740_v48 }
 0x1ea   :  { %v5128_v10 = vadd.f32 %v5127_v32, %v5126_v24  ;;  %v5156_v52 = vadd.f32 %v5155_v36, %v5154_v25  ;;  %v5129_v28 = vpop.f32.mrb[14].mxu0  ;;  %v5157_v31 = vpop.f32.mrb[14].mxu1  ;;  %5745 = vmatprep.subr.bf16.mxu0 %v5744_v13 }
 0x1eb   :  { %v5130_v26 = vpop.f32.mrb[15].mxu0  ;;  %v5158_v53 = vpop.f32.mrb[15].mxu1 }
 0x1ec   :  { %v5131_v4 = vadd.f32 %v5130_v26, %v5129_v28  ;;  %v5159_v42 = vadd.f32 %v5158_v53, %v5157_v31  ;;  %v969_v28 = vld [vmem:[%s7280_s4 + $0x8] sm:$0xff]  ;;  %v970_v53 = vld [vmem:[%s7280_s4 + $0x10] sm:$0xff] }
 0x1ed   :  { %5747 = vmatpush3.bf16.msra.mxu0 %v5744_v13 }
 0x1ee   :  { %v5772_v46 = vpack.c.bf16 %v5131_v4, %v5128_v10  ;;  %v5776_v50 = vpack.c.bf16 %v5159_v42, %v5156_v52  ;;  %v971_v4 = vld [vmem:[%s7280_s4 + $0x18] sm:$0xff] }
 0x1f0   :  { %5773 = vmatprep.subr.bf16.mxu1 %v5772_v46 }
 0x1f1   :  { %5775 = vmatpush3.bf16.msra.mxu1 %v5772_v46  ;;  %v2402_v46 = vpop.permute.xlu1 %2401 }
 0x1f2   :  { %5777 = vmatprep.subr.bf16.mxu1 %v5776_v50 }
 0x1f5   :  { %5779 = vmatpush3.bf16.msra.mxu1 %v5776_v50 }
 0x201   :  { %v5176_v55 = vpop.f32.mrb[16].mxu0  ;;  %v5204_v63 = vpop.f32.mrb[16].mxu1 }
 0x202   :  { %v5177_v19 = vpop.f32.mrb[17].mxu0  ;;  %v5205_v22 = vpop.f32.mrb[17].mxu1 }
 0x203   :  { %v5178_v30 = vadd.f32 %v5177_v19, %v5176_v55  ;;  %v5206_v34 = vadd.f32 %v5205_v22, %v5204_v63  ;;  %v5179_v51 = vpop.f32.mrb[18].mxu0  ;;  %v5207_v54 = vpop.f32.mrb[18].mxu1 }
 0x204   :  { %v5180_v56 = vpop.f32.mrb[19].mxu0  ;;  %v5208_v40 = vpop.f32.mrb[19].mxu1 }
 0x205   :  { %v5181_v35 = vadd.f32 %v5180_v56, %v5179_v51  ;;  %v5209_v9 = vadd.f32 %v5208_v40, %v5207_v54  ;;  %v2407_v63 = vpop.permute.xlu0 %2406  ;;  %v2412_v51 = vpop.permute.xlu1 %2411 }
 0x207   :  { %v5748_v5 = vpack.c.bf16 %v5181_v35, %v5178_v30  ;;  %v5752_v27 = vpack.c.bf16 %v5209_v9, %v5206_v34 }
 0x209   :  { %v5182_v6 = vpop.f32.mrb[20].mxu0  ;;  %v5210_v12 = vpop.f32.mrb[20].mxu1  ;;  %5749 = vmatprep.subr.bf16.mxu0 %v5748_v5 }
 0x20a   :  { %v5183_v37 = vpop.f32.mrb[21].mxu0  ;;  %v5211_v8 = vpop.f32.mrb[21].mxu1  ;;  %5751 = vmatpush3.bf16.msra.mxu0 %v5748_v5 }
 0x20b   :  { %v5184_v57 = vadd.f32 %v5183_v37, %v5182_v6  ;;  %v5212_v59 = vadd.f32 %v5211_v8, %v5210_v12  ;;  %v5185_v3 = vpop.f32.mrb[22].mxu0  ;;  %v5213_v39 = vpop.f32.mrb[22].mxu1  ;;  %5753 = vmatprep.subr.bf16.mxu0 %v5752_v27 }
 0x20c   :  { %v5186_v41 = vpop.f32.mrb[23].mxu0  ;;  %v5214_v58 = vpop.f32.mrb[23].mxu1 }
 0x20d   :  { %v5187_v43 = vadd.f32 %v5186_v41, %v5185_v3  ;;  %v5215_v47 = vadd.f32 %v5214_v58, %v5213_v39  ;;  %v2417_v5 = vpop.permute.xlu0 %2416 }
 0x20e   :  { %5755 = vmatpush3.bf16.msra.mxu0 %v5752_v27 }
 0x20f   :  { %v5780_v7 = vpack.c.bf16 %v5187_v43, %v5184_v57  ;;  %v5784_v18 = vpack.c.bf16 %v5215_v47, %v5212_v59  ;;  %v6026_v47 = vld [vmem:[%s7282_s6] sm:$0xff]  }
 0x211   :  { %5781 = vmatprep.subr.bf16.mxu1 %v5780_v7 }
 0x212   :  { %5783 = vmatpush3.bf16.msra.mxu1 %v5780_v7  ;;  %v6027_v7 = vld [vmem:[%s7282_s6 + $0x10] sm:$0xff]  }
 0x213   :  { %5785 = vmatprep.subr.bf16.mxu1 %v5784_v18 }
 0x216   :  { %5787 = vmatpush3.bf16.msra.mxu1 %v5784_v18 }
 0x222   :  { %v5232_v60 = vpop.f32.mrb[24].mxu0  ;;  %v5260_v61 = vpop.f32.mrb[24].mxu1 }
 0x223   :  { %v5233_v62 = vpop.f32.mrb[25].mxu0  ;;  %v5261_v11 = vpop.f32.mrb[25].mxu1 }
 0x224   :  { %v5234_v44 = vadd.f32 %v5233_v62, %v5232_v60  ;;  %v5262_v14 = vadd.f32 %v5261_v11, %v5260_v61  ;;  %v5235_v45 = vpop.f32.mrb[26].mxu0  ;;  %v5263_v15 = vpop.f32.mrb[26].mxu1 }
 0x225   :  { %v5236_v16 = vpop.f32.mrb[27].mxu0  ;;  %v5264_v0 = vpop.f32.mrb[27].mxu1 }
 0x226   :  { %v5237_v17 = vadd.f32 %v5236_v16, %v5235_v45  ;;  %v5265_v38 = vadd.f32 %v5264_v0, %v5263_v15 }
 0x228   :  { %v5756_v49 = vpack.c.bf16 %v5237_v17, %v5234_v44  ;;  %v5760_v1 = vpack.c.bf16 %v5265_v38, %v5262_v14 }
 0x22a   :  { %v5238_v33 = vpop.f32.mrb[28].mxu0  ;;  %v5266_v2 = vpop.f32.mrb[28].mxu1  ;;  %5757 = vmatprep.subr.bf16.mxu0 %v5756_v49 }
 0x22b   :  { %v5239_v21 = vpop.f32.mrb[29].mxu0  ;;  %v5267_v20 = vpop.f32.mrb[29].mxu1  ;;  %5759 = vmatpush3.bf16.msra.mxu0 %v5756_v49 }
 0x22c   :  { %v5240_v48 = vadd.f32 %v5239_v21, %v5238_v33  ;;  %v5268_v13 = vadd.f32 %v5267_v20, %v5266_v2  ;;  %v5241_v24 = vpop.f32.mrb[30].mxu0  ;;  %v5269_v25 = vpop.f32.mrb[30].mxu1  ;;  %5761 = vmatprep.subr.bf16.mxu0 %v5760_v1 }
 0x22d   :  { %v5242_v32 = vpop.f32.mrb[31].mxu0  ;;  %v5270_v36 = vpop.f32.mrb[31].mxu1 }
 0x22e   :  { %v5243_v10 = vadd.f32 %v5242_v32, %v5241_v24  ;;  %v5271_v52 = vadd.f32 %v5270_v36, %v5269_v25  ;;  %v6028_v36 = vld [vmem:[%s7282_s6 + $0x8] sm:$0xff]  }
 0x22f   :  { %5763 = vmatpush3.bf16.msra.mxu0 %v5760_v1 }
 0x230   :  { %v5788_v31 = vpack.c.bf16 %v5243_v10, %v5240_v48  ;;  %v5792_v26 = vpack.c.bf16 %v5271_v52, %v5268_v13  ;;  %v6029_v10 = vld [vmem:[%s7282_s6 + $0x18] sm:$0xff]   ;;  %v6030_v52 = vld [vmem:[%s7282_s6 + $0x20] sm:$0xff]  }
 0x232   :  { %5457 = vmatmul.mubr.f32.vlgmr.msra.gmra.mrb[32].mxu0 %v969_v28  ;;  %5789 = vmatprep.subr.bf16.mxu1 %v5788_v31 }
 0x233   :  { %5791 = vmatpush3.bf16.msra.mxu1 %v5788_v31  ;;  %5459 = vmatprep.mubr.f32.mxu0 %v970_v53  ;;  %v6032_v31 = vld [vmem:[%s7282_s6 + $0x28] sm:$0xff]  }
 0x234   :  { %5793 = vmatprep.subr.bf16.mxu1 %v5792_v26 }
 0x236   :  { %5460 = vmatmul.mubr.f32.gmra.mrb[34].mxu0 %v971_v4 }
 0x237   :  { %5795 = vmatpush3.bf16.msra.mxu1 %v5792_v26  ;;  %5516 = vmatprep.mubr.bf16.mxu0 %v6026_v47  ;;  %v6033_v26 = vld [vmem:[%s7282_s6 + $0x38] sm:$0xff]  }
 0x23a   :  { %5495 = vmatmul.mubr.f32.vlgmr.msra.gmra.mrb[32].mxu1 %v969_v28  ;;  %v6031_v28 = vld [vmem:[%s7282_s6 + $0x30] sm:$0xff]  }
 0x23b   :  { %5497 = vmatprep.mubr.f32.mxu1 %v970_v53  ;;  %v6060_v53 = vmov 0.0  }
 0x23e   :  { %5498 = vmatmul.mubr.f32.gmra.mrb[34].mxu1 %v971_v4 }
 0x23f   :  { %5536 = vmatprep.mubr.bf16.mxu1 %v6027_v7  ;;  %v6034_v7 = vld [vmem:[%s7283_s7] sm:$0xff]  }
 0x305   :  { %v5458_v42 = vpop.f32.mrb[32].mxu0 }
 0x306   :  { %v2485_v50 = vpop.f32.mrb[33].mxu0  ;;  %v2491_v19 = vadd.f32 %v5458_v42, %v2407_v63 }
 0x307   :  { %v2486_v55 = vadd.f32 %v2485_v50, %v2402_v46 }
 0x308   :  { %v2505_v54 = vmax.f32 %v2491_v19, 0.0 }
 0x309   :  { %v2504_v22 = vmax.f32 %v2486_v55, 0.0  ;;  %v5461_v30 = vpop.f32.mrb[34].mxu0 }
 0x30a   :  { %v2495_v34 = vpop.f32.mrb[35].mxu0  ;;  %v2501_v27 = vadd.f32 %v5461_v30, %v2417_v5 }
 0x30b   :  { %2508 = vxpose.xlu1.b32.start [1/4] (short) (narrow) %v2504_v22, 64  ;;  %v2496_v56 = vadd.f32 %v2495_v34, %v2412_v51 }
 0x30c   :  { %v2507_v59 = vmax.f32 %v2501_v27, 0.0 }
 0x30d   :  { %v5496_v40 = vpop.f32.mrb[32].mxu1  ;;  %v2506_v6 = vmax.f32 %v2496_v56, 0.0 }
 0x30e   :  { %v2606_v35 = vpop.f32.mrb[33].mxu1  ;;  %v2612_v12 = vadd.f32 %v5496_v40, %v2407_v63 }
 0x30f   :  { %v2607_v9 = vadd.f32 %v2606_v35, %v2402_v46  ;;  %2509 = vxpose.xlu1.b32.cont [2/4] (short) (narrow) %v2505_v54, 64 }
 0x310   :  { %v2626_v3 = vmax.f32 %v2612_v12, 0.0 }
 0x311   :  { %v2625_v37 = vmax.f32 %v2607_v9, 0.0  ;;  %v5499_v8 = vpop.f32.mrb[34].mxu1 }
 0x312   :  { %v2616_v57 = vpop.f32.mrb[35].mxu1  ;;  %v2622_v41 = vadd.f32 %v5499_v8, %v2417_v5 }
 0x313   :  { %2629 = vxpose.xlu0.b32.start [1/4] (short) (narrow) %v2625_v37, 64  ;;  %2510 = vxpose.xlu1.b32.cont [3/4] (short) (narrow) %v2506_v6, 64  ;;  %v2617_v39 = vadd.f32 %v2616_v57, %v2412_v51 }
 0x314   :  { %v2628_v43 = vmax.f32 %v2622_v41, 0.0 }
 0x315   :  { %v2627_v58 = vmax.f32 %v2617_v39, 0.0 }
 0x317   :  { %2630 = vxpose.xlu0.b32.cont [2/4] (short) (narrow) %v2626_v3, 64  ;;  %2511 = vxpose.xlu1.b32.end [4/4] (short) (narrow) %v2507_v59, 64 }
 0x31b   :  { %2631 = vxpose.xlu0.b32.cont [3/4] (short) (narrow) %v2627_v58, 64 }
 0x31f   :  { %2632 = vxpose.xlu0.b32.end [4/4] (short) (narrow) %v2628_v43, 64 }
 0x38b   :  { %v2524_v18 = vpop.trf.xlu1 }
 0x38f   :  { %v2525_v60 = vpop.trf.xlu1 }
 0x390   :  { %v2661_v61 = vpack.c.bf16 %v2525_v60, %v2524_v18  ;;  %v6035_v18 = vld [vmem:[%s7283_s7 + $0x8] sm:$0xff]   ;;  %v6036_v60 = vld [vmem:[%s7283_s7 + $0x10] sm:$0xff]  }
 0x392   :  { %5500 = vmatprep.subr.bf16.mxu0 %v2661_v61  ;;  %5520 = vmatprep.subr.bf16.mxu1 %v2661_v61 }
 0x393   :  { %5501 = vmatpush3.bf16.msra.mxu0 %v2661_v61  ;;  %5521 = vmatpush3.bf16.msra.mxu1 %v2661_v61  ;;  %v2526_v62 = vpop.trf.xlu1  ;;  %v2645_v11 = vpop.trf.xlu0 }
 0x397   :  { %v2527_v44 = vpop.trf.xlu1  ;;  %v2646_v14 = vpop.trf.xlu0 }
 0x398   :  { %v2662_v45 = vpack.c.bf16 %v2527_v44, %v2526_v62  ;;  %v2665_v20 = vpack.c.bf16 %v2646_v14, %v2645_v11  ;;  %v6038_v62 = vld [vmem:[%s7283_s7 + $0x20] sm:$0xff]   ;;  %v6039_v11 = vld [vmem:[%s7283_s7 + $0x28] sm:$0xff]   ;;  %v6040_v44 = vld [vmem:[%s7283_s7 + $0x30] sm:$0xff]  }
 0x399   :  { %v6041_v14 = vld [vmem:[%s7283_s7 + $0x38] sm:$0xff]  }
 0x39a   :  { %5502 = vmatprep.subr.bf16.mxu0 %v2662_v45  ;;  %5522 = vmatprep.subr.bf16.mxu1 %v2662_v45 }
 0x39b   :  { %5503 = vmatpush3.bf16.msra.mxu0 %v2662_v45  ;;  %5523 = vmatpush3.bf16.msra.mxu1 %v2662_v45  ;;  %v2528_v15 = vpop.trf.xlu1  ;;  %v2647_v16 = vpop.trf.xlu0 }
 0x39f   :  { %v2529_v0 = vpop.trf.xlu1  ;;  %v2648_v17 = vpop.trf.xlu0 }
 0x3a0   :  { %v2663_v38 = vpack.c.bf16 %v2529_v0, %v2528_v15  ;;  %v2666_v13 = vpack.c.bf16 %v2648_v17, %v2647_v16  ;;  %v4969_v15 = vld [vmem:[%s7284_s8 + $0x28] sm:$0xff]  ;;  %v4970_v0 = vld [vmem:[%s7284_s8 + $0x30] sm:$0xff]  ;;  %v4971_v17 = vld [vmem:[%s7284_s8 + $0x38] sm:$0xff] }
 0x3a2   :  { %5504 = vmatprep.subr.bf16.mxu0 %v2663_v38  ;;  %5524 = vmatprep.subr.bf16.mxu1 %v2663_v38 }
 0x3a3   :  { %5505 = vmatpush3.bf16.msra.mxu0 %v2663_v38  ;;  %5525 = vmatpush3.bf16.msra.mxu1 %v2663_v38  ;;  %v2530_v49 = vpop.trf.xlu1  ;;  %v2649_v1 = vpop.trf.xlu0 }
 0x3a7   :  { %v2531_v33 = vpop.trf.xlu1  ;;  %v2650_v2 = vpop.trf.xlu0 }
 0x3a8   :  { %v2664_v21 = vpack.c.bf16 %v2531_v33, %v2530_v49  ;;  %v2667_v24 = vpack.c.bf16 %v2650_v2, %v2649_v1  ;;  %v2998_v49 = vld [vmem:[%s7284_s8] sm:$0xff]  ;;  %v2999_v1 = vld [vmem:[%s7284_s8 + $0x8] sm:$0xff] }
 0x3a9   :  { %v5804_v33 = vpack.c.bf16 %v2999_v1, %v2998_v49  ;;  %v5030_v1 = vld [vmem:[%s7284_s8 + $0xe0] sm:$0xff] }
 0x3aa   :  { %5506 = vmatprep.subr.bf16.mxu0 %v2664_v21  ;;  %5526 = vmatprep.subr.bf16.mxu1 %v2664_v21 }
 0x3ab   :  { %5507 = vmatpush3.bf16.msra.mxu0 %v2664_v21  ;;  %5527 = vmatpush3.bf16.msra.mxu1 %v2664_v21  ;;  %v2651_v48 = vpop.trf.xlu0 }
 0x3ac   :  { %5508 = vmatprep.subr.bf16.mxu0 %v2665_v20  ;;  %5528 = vmatprep.subr.bf16.mxu1 %v2665_v20 }
 0x3af   :  { %5509 = vmatpush3.bf16.msra.mxu0 %v2665_v20  ;;  %5529 = vmatpush3.bf16.msra.mxu1 %v2665_v20  ;;  %v2652_v25 = vpop.trf.xlu0 }
 0x3b0   :  { %5510 = vmatprep.subr.bf16.mxu0 %v2666_v13  ;;  %5530 = vmatprep.subr.bf16.mxu1 %v2666_v13  ;;  %v2668_v32 = vpack.c.bf16 %v2652_v25, %v2651_v48 }
 0x3b3   :  { %5511 = vmatpush3.bf16.msra.mxu0 %v2666_v13  ;;  %5531 = vmatpush3.bf16.msra.mxu1 %v2666_v13 }
 0x3b4   :  { %5512 = vmatprep.subr.bf16.mxu0 %v2667_v24  ;;  %5532 = vmatprep.subr.bf16.mxu1 %v2667_v24 }
 0x3b7   :  { %5513 = vmatpush3.bf16.msra.mxu0 %v2667_v24  ;;  %5533 = vmatpush3.bf16.msra.mxu1 %v2667_v24 }
 0x3b8   :  { %5514 = vmatprep.subr.bf16.mxu0 %v2668_v32  ;;  %5534 = vmatprep.subr.bf16.mxu1 %v2668_v32 }
 0x3bb   :  { %5515 = vmatpush3.bf16.msra.mxu0 %v2668_v32  ;;  %5535 = vmatpush3.bf16.msra.mxu1 %v2668_v32 }
 0x3bc   :  { %5540 = vmatprep.subr.bf16.mxu0 %v2661_v61  ;;  %5560 = vmatprep.subr.bf16.mxu1 %v2661_v61 }
 0x3be   :  { %5517 = vmatmul.mubr.bf16.vlgmr.msra.gmra.mrb[36].mxu0 %v6028_v36  ;;  %5537 = vmatmul.mubr.bf16.vlgmr.msra.gmra.mrb[36].mxu1 %v6029_v10 }
 0x3bf   :  { %5541 = vmatpush3.bf16.msra.mxu0 %v2661_v61  ;;  %5561 = vmatpush3.bf16.msra.mxu1 %v2661_v61  ;;  %v6037_v61 = vld [vmem:[%s7283_s7 + $0x18] sm:$0xff]  }
 0x3c0   :  { %5542 = vmatprep.subr.bf16.mxu0 %v2662_v45  ;;  %5562 = vmatprep.subr.bf16.mxu1 %v2662_v45 }
 0x3c1   :  { %5556 = vmatprep.mubr.bf16.mxu0 %v6030_v52  ;;  %5576 = vmatprep.mubr.bf16.mxu1 %v6031_v28  ;;  %v4980_v52 = vld [vmem:[%s7284_s8 + $0x40] sm:$0xff]  ;;  %v4981_v28 = vld [vmem:[%s7284_s8 + $0x48] sm:$0xff] }
 0x3c3   :  { %5543 = vmatpush3.bf16.msra.mxu0 %v2662_v45  ;;  %5563 = vmatpush3.bf16.msra.mxu1 %v2662_v45  ;;  %v4968_v45 = vld [vmem:[%s7284_s8 + $0x20] sm:$0xff] }
 0x3c4   :  { %5544 = vmatprep.subr.bf16.mxu0 %v2663_v38  ;;  %5564 = vmatprep.subr.bf16.mxu1 %v2663_v38  ;;  %v5796_v16 = vpack.c.bf16 %v4969_v15, %v4968_v45  ;;  %v5022_v15 = vld [vmem:[%s7284_s8 + $0xd0] sm:$0xff] }
 0x3c7   :  { %5545 = vmatpush3.bf16.msra.mxu0 %v2663_v38  ;;  %5565 = vmatpush3.bf16.msra.mxu1 %v2663_v38  ;;  %v5800_v38 = vpack.c.bf16 %v4971_v17, %v4970_v0 }
 0x3c8   :  { %5546 = vmatprep.subr.bf16.mxu0 %v2664_v21  ;;  %5566 = vmatprep.subr.bf16.mxu1 %v2664_v21 }
 0x3cb   :  { %5547 = vmatpush3.bf16.msra.mxu0 %v2664_v21  ;;  %5567 = vmatpush3.bf16.msra.mxu1 %v2664_v21 }
 0x3cc   :  { %5548 = vmatprep.subr.bf16.mxu0 %v2665_v20  ;;  %5568 = vmatprep.subr.bf16.mxu1 %v2665_v20 }
 0x3cf   :  { %5549 = vmatpush3.bf16.msra.mxu0 %v2665_v20  ;;  %5569 = vmatpush3.bf16.msra.mxu1 %v2665_v20 }
 0x3d0   :  { %5550 = vmatprep.subr.bf16.mxu0 %v2666_v13  ;;  %5570 = vmatprep.subr.bf16.mxu1 %v2666_v13 }
 0x3d3   :  { %5551 = vmatpush3.bf16.msra.mxu0 %v2666_v13  ;;  %5571 = vmatpush3.bf16.msra.mxu1 %v2666_v13  ;;  %v3000_v13 = vld [vmem:[%s7284_s8 + $0x10] sm:$0xff] }
 0x3d4   :  { %5552 = vmatprep.subr.bf16.mxu0 %v2667_v24  ;;  %5572 = vmatprep.subr.bf16.mxu1 %v2667_v24 }
 0x3d7   :  { %5553 = vmatpush3.bf16.msra.mxu0 %v2667_v24  ;;  %5573 = vmatpush3.bf16.msra.mxu1 %v2667_v24  ;;  %v3001_v24 = vld [vmem:[%s7284_s8 + $0x18] sm:$0xff] }
 0x3d8   :  { %5554 = vmatprep.subr.bf16.mxu0 %v2668_v32  ;;  %5574 = vmatprep.subr.bf16.mxu1 %v2668_v32  ;;  %v5808_v36 = vpack.c.bf16 %v3001_v24, %v3000_v13 }
 0x3db   :  { %5555 = vmatpush3.bf16.msra.mxu0 %v2668_v32  ;;  %5575 = vmatpush3.bf16.msra.mxu1 %v2668_v32 }
 0x3dc   :  { %5580 = vmatprep.subr.bf16.mxu1 %v6060_v53  ;;  %5797 = vmatprep.subr.bf16.mxu0 %v5796_v16 }
 0x3de   :  { %5557 = vmatmul.mubr.bf16.vlgmr.msra.gmra.mrb[40].mxu0 %v6032_v31  ;;  %5577 = vmatmul.mubr.bf16.vlgmr.msra.gmra.mrb[40].mxu1 %v6033_v26  ;;  %v5812_v26 = vpack.c.bf16 %v4981_v28, %v4980_v52 }
 0x3df   :  { %5584 = vmatprep.mubr.msk.bf16.mxu1 %vm6061_vm0, %v6060_v53  ;;  %5799 = vmatpush3.bf16.msra.mxu0 %v5796_v16  ;;  %v5023_v16 = vld [vmem:[%s7284_s8 + $0xd8] sm:$0xff] }
 0x3e0   :  { %5801 = vmatprep.subr.bf16.mxu0 %v5800_v38 }
 0x3e3   :  { %5803 = vmatpush3.bf16.msra.mxu0 %v5800_v38  ;;  %v5848_v38 = vpack.c.bf16 %v5023_v16, %v5022_v15 }
 0x3e4   :  { %5805 = vmatprep.subr.bf16.mxu0 %v5804_v33 }
 0x491   :  { %v5518_v4 = vpop.f32.mrb[36].mxu0  ;;  %v5538_v42 = vpop.f32.mrb[36].mxu1 }
 0x492   :  { %v2802_v46 = vmax.f32 %v5518_v4, %v5538_v42  ;;  %v2719_v50 = vpop.f32.mrb[37].mxu0  ;;  %v2785_v55 = vpop.f32.mrb[37].mxu1  ;;  %v4983_v4 = vld [vmem:[%s7284_s8 + $0x58] sm:$0xff] }
 0x493   :  { %v2800_v63 = vmax.f32 %v2719_v50, %v2785_v55  ;;  %v5519_v19 = vpop.f32.mrb[38].mxu0  ;;  %v5539_v22 = vpop.f32.mrb[38].mxu1 }
 0x494   :  { %v2803_v30 = vmax.f32 %v5519_v19, %v5539_v22  ;;  %v2722_v34 = vpop.f32.mrb[39].mxu0  ;;  %v2788_v51 = vpop.f32.mrb[39].mxu1  ;;  %v4991_v19 = vld [vmem:[%s7284_s8 + $0x68] sm:$0xff] }
 0x495   :  { %v2801_v54 = vmax.f32 %v2722_v34, %v2788_v51  ;;  %v4992_v34 = vld [vmem:[%s7284_s8 + $0x70] sm:$0xff]  ;;  %v4993_v51 = vld [vmem:[%s7284_s8 + $0x78] sm:$0xff] }
 0x4b1   :  { %v5558_v56 = vpop.f32.mrb[40].mxu0  ;;  %v5578_v40 = vpop.f32.mrb[40].mxu1 }
 0x4b2   :  { %v2872_v35 = vmax.f32 %v2802_v46, %v5558_v56  ;;  %v2855_v9 = vpop.f32.mrb[41].mxu0  ;;  %v2925_v5 = vpop.f32.mrb[41].mxu1 }
 0x4b3   :  { %v2870_v27 = vmax.f32 %v2800_v63, %v2855_v9  ;;  %v5559_v6 = vpop.f32.mrb[42].mxu0  ;;  %v5579_v12 = vpop.f32.mrb[42].mxu1  ;;  %v4990_v63 = vld [vmem:[%s7284_s8 + $0x60] sm:$0xff] }
 0x4b4   :  { %v2942_v37 = vmax.f32 %v2872_v35, %v5578_v40  ;;  %v2873_v8 = vmax.f32 %v2803_v30, %v5559_v6  ;;  %v2858_v57 = vpop.f32.mrb[43].mxu0  ;;  %v2928_v59 = vpop.f32.mrb[43].mxu1  ;;  %v5820_v30 = vpack.c.bf16 %v4991_v19, %v4990_v63  ;;  %v5824_v40 = vpack.c.bf16 %v4993_v51, %v4992_v34  ;;  %v5000_v9 = vld [vmem:[%s7284_s8 + $0x80] sm:$0xff] }
 0x4b5   :  { %v2940_v3 = vmax.f32 %v2870_v27, %v2925_v5  ;;  %v2871_v39 = vmax.f32 %v2801_v54, %v2858_v57  ;;  %v5001_v5 = vld [vmem:[%s7284_s8 + $0x88] sm:$0xff] }
 0x4b6   :  { %v2943_v41 = vmax.f32 %v2873_v8, %v5579_v12  ;;  %v5828_v6 = vpack.c.bf16 %v5001_v5, %v5000_v9  ;;  %v5002_v12 = vld [vmem:[%s7284_s8 + $0x90] sm:$0xff] }
 0x4b7   :  { %v2941_v58 = vmax.f32 %v2871_v39, %v2928_v59  ;;  %v5010_v39 = vld [vmem:[%s7284_s8 + $0xa0] sm:$0xff] }
 0x4b8   :  { %v2945_v43 = vpack.c.bf16 %v2943_v41, %v2942_v37  ;;  %v5003_v37 = vld [vmem:[%s7284_s8 + $0x98] sm:$0xff]  ;;  %v5011_v41 = vld [vmem:[%s7284_s8 + $0xa8] sm:$0xff] }
 0x4b9   :  { %v2944_v47 = vpack.c.bf16 %v2941_v58, %v2940_v3  ;;  %v5832_v59 = vpack.c.bf16 %v5003_v37, %v5002_v12 }
 0x4bb   :  { %5581 = vmatpush3.bf16.msra.mxu1 %v2944_v47 }
 0x4bc   :  { %5582 = vmatprep.subr.bf16.mxu1 %v6060_v53 }
 0x4bf   :  { %5583 = vmatpush3.bf16.msra.mxu1 %v2945_v43 }
 0x4c0   :  { %5588 = vmatprep.subr.bf16.mxu1 %v6060_v53 }
 0x4c2   :  { %5585 = vmatmul.mubr.msk.bf16.vlgmr.msra.gmra.mrb[44].mxu1 %vm2953_vm1, %v6034_v7  ;;  %v5013_v7 = vld [vmem:[%s7284_s8 + $0xb8] sm:$0xff] }
 0x4c3   :  { %5589 = vmatpush3.bf16.msra.mxu1 %v2944_v47  ;;  %5592 = vmatprep.mubr.msk.bf16.mxu1 %vm6061_vm0, %v6060_v53 }
 0x4c4   :  { %5590 = vmatprep.subr.bf16.mxu1 %v6060_v53 }
 0x4c7   :  { %5591 = vmatpush3.bf16.msra.mxu1 %v2945_v43 }
 0x4c8   :  { %5618 = vmatprep.subr.bf16.mxu1 %v6060_v53 }
 0x4ca   :  { %5593 = vmatmul.mubr.msk.bf16.vlgmr.msra.gmra.mrb[48].mxu1 %vm2953_vm1, %v6035_v18 }
 0x4cb   :  { %5619 = vmatpush3.bf16.msra.mxu1 %v2944_v47  ;;  %5622 = vmatprep.mubr.msk.bf16.mxu1 %vm6061_vm0, %v6060_v53 }
 0x4cc   :  { %5620 = vmatprep.subr.bf16.mxu1 %v6060_v53 }
 0x4cf   :  { %5621 = vmatpush3.bf16.msra.mxu1 %v2945_v43 }
 0x4d0   :  { %5637 = vmatprep.subr.bf16.mxu1 %v6060_v53 }
 0x4d2   :  { %5623 = vmatmul.mubr.msk.bf16.vlgmr.msra.gmra.mrb[52].mxu1 %vm2953_vm1, %v6036_v60 }
 0x4d3   :  { %5638 = vmatpush3.bf16.msra.mxu1 %v2944_v47  ;;  %5641 = vmatprep.mubr.msk.bf16.mxu1 %vm6061_vm0, %v6060_v53 }
 0x4d4   :  { %5639 = vmatprep.subr.bf16.mxu1 %v6060_v53 }
 0x4d7   :  { %5640 = vmatpush3.bf16.msra.mxu1 %v2945_v43 }
 0x4d8   :  { %5656 = vmatprep.subr.bf16.mxu1 %v6060_v53 }
 0x4da   :  { %5642 = vmatmul.mubr.msk.bf16.vlgmr.msra.gmra.mrb[56].mxu1 %vm2953_vm1, %v6037_v61 }
 0x4db   :  { %5657 = vmatpush3.bf16.msra.mxu1 %v2944_v47  ;;  %5660 = vmatprep.mubr.msk.bf16.mxu1 %vm6061_vm0, %v6060_v53 }
 0x4dc   :  { %5658 = vmatprep.subr.bf16.mxu1 %v6060_v53 }
 0x4df   :  { %5659 = vmatpush3.bf16.msra.mxu1 %v2945_v43 }
 0x4e0   :  { %5675 = vmatprep.subr.bf16.mxu1 %v6060_v53 }
 0x4e2   :  { %5661 = vmatmul.mubr.msk.bf16.vlgmr.msra.gmra.mrb[60].mxu1 %vm2953_vm1, %v6038_v62 }
 0x4e3   :  { %5676 = vmatpush3.bf16.msra.mxu1 %v2944_v47  ;;  %5679 = vmatprep.mubr.msk.bf16.mxu1 %vm6061_vm0, %v6060_v53 }
 0x4e4   :  { %5677 = vmatprep.subr.bf16.mxu1 %v6060_v53 }
 0x4e7   :  { %5678 = vmatpush3.bf16.msra.mxu1 %v2945_v43 }
 0x4e8   :  { %5694 = vmatprep.subr.bf16.mxu1 %v6060_v53 }
 0x4ea   :  { %5680 = vmatmul.mubr.msk.bf16.vlgmr.msra.gmra.mrb[64].mxu1 %vm2953_vm1, %v6039_v11  ;;  %v5020_v11 = vld [vmem:[%s7284_s8 + $0xc0] sm:$0xff] }
 0x4eb   :  { %5695 = vmatpush3.bf16.msra.mxu1 %v2944_v47  ;;  %5698 = vmatprep.mubr.msk.bf16.mxu1 %vm6061_vm0, %v6060_v53 }
 0x4ec   :  { %5696 = vmatprep.subr.bf16.mxu1 %v6060_v53 }
 0x4ef   :  { %5697 = vmatpush3.bf16.msra.mxu1 %v2945_v43 }
 0x4f0   :  { %5713 = vmatprep.subr.bf16.mxu1 %v6060_v53 }
 0x4f2   :  { %5699 = vmatmul.mubr.msk.bf16.vlgmr.msra.gmra.mrb[68].mxu1 %vm2953_vm1, %v6040_v44  ;;  %v5021_v44 = vld [vmem:[%s7284_s8 + $0xc8] sm:$0xff] }
 0x4f3   :  { %5714 = vmatpush3.bf16.msra.mxu1 %v2944_v47  ;;  %5717 = vmatprep.mubr.msk.bf16.mxu1 %vm6061_vm0, %v6060_v53  ;;  %v5012_v47 = vld [vmem:[%s7284_s8 + $0xb0] sm:$0xff]  ;;  %v5844_v45 = vpack.c.bf16 %v5021_v44, %v5020_v11 }
 0x4f4   :  { %5715 = vmatprep.subr.bf16.mxu1 %v6060_v53  ;;  %v4982_v53 = vld [vmem:[%s7284_s8 + $0x50] sm:$0xff]  ;;  %v5840_v61 = vpack.c.bf16 %v5013_v7, %v5012_v47 }
 0x4f5   :  { %v5816_v50 = vpack.c.bf16 %v4983_v4, %v4982_v53 }
 0x4f7   :  { %5716 = vmatpush3.bf16.msra.mxu1 %v2945_v43  ;;  %v5836_v43 = vpack.c.bf16 %v5011_v41, %v5010_v39 }
 0x4fa   :  { %5718 = vmatmul.mubr.msk.bf16.vlgmr.msra.gmra.mrb[72].mxu1 %vm2953_vm1, %v6041_v14 }
 0x595   :  { %v2991_v2 = vpop.f32.mrb[44].mxu1 }
 0x596   :  { %v5586_v21 = vpop.f32.mrb[45].mxu1 }
 0x597   :  { %v2994_v20 = vpop.f32.mrb[46].mxu1 }
 0x598   :  { %v5587_v48 = vpop.f32.mrb[47].mxu1 }
 0x599   :  { %v5033_v48 = vld [vmem:[%s7284_s8 + $0xf8] sm:$0xff] }
 0x59d   :  { %v3047_v25 = vpop.f32.mrb[48].mxu1 }
 0x59e   :  { %v5594_v32 = vpop.f32.mrb[49].mxu1  ;;  %5604 = vmatprep.mubr.msk.f32.mxu0 %vm2953_vm1, %v3047_v25 }
 0x59f   :  { %v3050_v10 = vpop.f32.mrb[50].mxu1 }
 0x5a0   :  { %v5595_v31 = vpop.f32.mrb[51].mxu1  ;;  %5605 = vmatmul.mubr.msk.f32.vlgmr.msra.gmra.mrb[44].mxu0 %vm2953_vm1, %v3050_v10  ;;  %v5036_v10 = vld [vmem:[%s7285_s9] ss:$0 sm:$0xff] }
 0x5a1   :  { %5807 = vmatpush3.bf16.msra.mxu0 %v5804_v33  ;;  %5615 = vmatprep.mubr.msk.f32.mxu0 %vm2953_vm1, %v2991_v2  ;;  %v5031_v33 = vld [vmem:[%s7284_s8 + $0xe8] sm:$0xff] }
 0x5a2   :  { %5809 = vmatprep.subr.bf16.mxu0 %v5808_v36  ;;  %v5852_v21 = vpack.c.bf16 %v5031_v33, %v5030_v1 }
 0x5a5   :  { %5811 = vmatpush3.bf16.msra.mxu0 %v5808_v36  ;;  %v3266_v42 = vpop.f32.mrb[52].mxu1 }
 0x5a6   :  { %5813 = vmatprep.subr.bf16.mxu0 %v5812_v26  ;;  %v5624_v46 = vpop.f32.mrb[53].mxu1 }
 0x5a7   :  { %v3269_v55 = vpop.f32.mrb[54].mxu1 }
 0x5a8   :  { %5616 = vmatmul.mubr.msk.f32.vlgmr.msra.gmra.mrb[44].mxu0 %vm2953_vm1, %v2994_v20  ;;  %v5625_v22 = vpop.f32.mrb[55].mxu1  ;;  %v5032_v20 = vld [vmem:[%s7284_s8 + $0xf0] sm:$0xff] }
 0x5a9   :  { %5815 = vmatpush3.bf16.msra.mxu0 %v5812_v26  ;;  %5634 = vmatprep.mubr.msk.f32.mxu0 %vm2953_vm1, %v3266_v42  ;;  %v5856_v25 = vpack.c.bf16 %v5033_v48, %v5032_v20 }
 0x5aa   :  { %5817 = vmatprep.subr.bf16.mxu0 %v5816_v50 }
 0x5ad   :  { %5819 = vmatpush3.bf16.msra.mxu0 %v5816_v50  ;;  %v3406_v54 = vpop.f32.mrb[56].mxu1 }
 0x5ae   :  { %5821 = vmatprep.subr.bf16.mxu0 %v5820_v30  ;;  %v5643_v56 = vpop.f32.mrb[57].mxu1 }
 0x5af   :  { %v3409_v35 = vpop.f32.mrb[58].mxu1 }
 0x5b0   :  { %5635 = vmatmul.mubr.msk.f32.vlgmr.msra.gmra.mrb[44].mxu0 %vm2953_vm1, %v3269_v55  ;;  %v5644_v27 = vpop.f32.mrb[59].mxu1 }
 0x5b1   :  { %5823 = vmatpush3.bf16.msra.mxu0 %v5820_v30  ;;  %5653 = vmatprep.mubr.msk.f32.mxu0 %vm2953_vm1, %v3406_v54 }
 0x5b2   :  { %5825 = vmatprep.subr.bf16.mxu0 %v5824_v40 }
 0x5b5   :  { %5827 = vmatpush3.bf16.msra.mxu0 %v5824_v40  ;;  %v3546_v8 = vpop.f32.mrb[60].mxu1 }
 0x5b6   :  { %5829 = vmatprep.subr.bf16.mxu0 %v5828_v6  ;;  %v5662_v57 = vpop.f32.mrb[61].mxu1 }
 0x5b7   :  { %v3549_v3 = vpop.f32.mrb[62].mxu1 }
 0x5b8   :  { %5654 = vmatmul.mubr.msk.f32.vlgmr.msra.gmra.mrb[44].mxu0 %vm2953_vm1, %v3409_v35  ;;  %v5663_v58 = vpop.f32.mrb[63].mxu1 }
 0x5b9   :  { %5831 = vmatpush3.bf16.msra.mxu0 %v5828_v6  ;;  %5672 = vmatprep.mubr.msk.f32.mxu0 %vm2953_vm1, %v3546_v8 }
 0x5ba   :  { %5833 = vmatprep.subr.bf16.mxu0 %v5832_v59 }
 0x5bd   :  { %5835 = vmatpush3.bf16.msra.mxu0 %v5832_v59  ;;  %v3686_v18 = vpop.f32.mrb[64].mxu1 }
 0x5be   :  { %5837 = vmatprep.subr.bf16.mxu0 %v5836_v43  ;;  %v5681_v60 = vpop.f32.mrb[65].mxu1 }
 0x5bf   :  { %v3689_v62 = vpop.f32.mrb[66].mxu1 }
 0x5c0   :  { %5673 = vmatmul.mubr.msk.f32.vlgmr.msra.gmra.mrb[44].mxu0 %vm2953_vm1, %v3549_v3  ;;  %v5682_v14 = vpop.f32.mrb[67].mxu1 }
 0x5c1   :  { %5839 = vmatpush3.bf16.msra.mxu0 %v5836_v43  ;;  %5691 = vmatprep.mubr.msk.f32.mxu0 %vm2953_vm1, %v3686_v18 }
 0x5c2   :  { %5841 = vmatprep.subr.bf16.mxu0 %v5840_v61 }
 0x5c5   :  { %5843 = vmatpush3.bf16.msra.mxu0 %v5840_v61  ;;  %v3826_v0 = vpop.f32.mrb[68].mxu1 }
 0x5c6   :  { %5845 = vmatprep.subr.bf16.mxu0 %v5844_v45  ;;  %v5700_v17 = vpop.f32.mrb[69].mxu1 }
 0x5c7   :  { %v3829_v49 = vpop.f32.mrb[70].mxu1 }
 0x5c8   :  { %5692 = vmatmul.mubr.msk.f32.vlgmr.msra.gmra.mrb[44].mxu0 %vm2953_vm1, %v3689_v62  ;;  %v5701_v2 = vpop.f32.mrb[71].mxu1 }
 0x5c9   :  { %5847 = vmatpush3.bf16.msra.mxu0 %v5844_v45  ;;  %5710 = vmatprep.mubr.msk.f32.mxu0 %vm2953_vm1, %v3826_v0 }
 0x5ca   :  { %5849 = vmatprep.subr.bf16.mxu0 %v5848_v38 }
 0x5cd   :  { %5851 = vmatpush3.bf16.msra.mxu0 %v5848_v38  ;;  %v3966_v13 = vpop.f32.mrb[72].mxu1 }
 0x5ce   :  { %5853 = vmatprep.subr.bf16.mxu0 %v5852_v21  ;;  %v5719_v24 = vpop.f32.mrb[73].mxu1 }
 0x5cf   :  { %v3969_v32 = vpop.f32.mrb[74].mxu1 }
 0x5d0   :  { %5711 = vmatmul.mubr.msk.f32.vlgmr.msra.gmra.mrb[44].mxu0 %vm2953_vm1, %v3829_v49  ;;  %v5720_v36 = vpop.f32.mrb[75].mxu1 }
 0x5d1   :  { %5855 = vmatpush3.bf16.msra.mxu0 %v5852_v21  ;;  %5729 = vmatprep.mubr.msk.f32.mxu0 %vm2953_vm1, %v3966_v13 }
 0x5d2   :  { %5857 = vmatprep.subr.bf16.mxu0 %v5856_v25 }
 0x5d5   :  { %5859 = vmatpush3.bf16.msra.mxu0 %v5856_v25 }
 0x5d8   :  { %5730 = vmatmul.mubr.msk.f32.vlgmr.msra.gmra.mrb[44].mxu0 %vm2953_vm1, %v3969_v32 }
 0x6ab   :  { %v5731_v52 = vpop.f32.mrb[44].mxu0 }
 0x6ac   :  { %v4069_v28 = vadd.f32 %v5731_v52, %v5036_v10  ;;  %v4050_v31 = vpop.f32.mrb[45].mxu0 }
 0x6ad   :  { %v4068_v26 = vadd.f32 %v5036_v10, %v4050_v31 }
 0x6ae   :  { %v4071_v53 = vmax.f32 %v4069_v28, 0.0 }
 0x6af   :  { %v4070_v4 = vmax.f32 %v4068_v26, 0.0 }
 0x6b1   :  { %v7237_v42 = vpack.c.bf16 %v4071_v53, %v4070_v4 }
 0x6b2   :  { %6050 = dma.done.wait [#allocation3], 8192 }
 0x6b3   :  { %6051 = vsyncadd [#allocation3], 4294959104  ;;  %v7293_v46 = vmov 0   ;;  %v4086_v50 = vld [vmem:[#allocation2 + $0x48] sm:$0xff]  ;;  %v4085_v63 = vld [vmem:[#allocation2 + $0x40] sm:$0xff]  ;;  %v4094_v8 = vrot.slane %v7237_v42, 1 }
 0x6b4   :  { %4131 = vmatprep.mubr.bf16.mxu1 %v7293_v46  ;;  %4175 = vmatprep.mubr.bf16.mxu0 %v7293_v46  ;;  %v4078_v55 = vld [vmem:[#allocation2 + $0x8] sm:$0xff]  ;;  %v4077_v19 = vld [vmem:[#allocation2] sm:$0xff]  ;;  %v4088_v22 = vld [vmem:[#allocation2 + $0x58] sm:$0xff]  ;;  %vm4095_vm2 = vcmask 523264   ;;  %v4192_v45 = vrot.slane %v7237_v42, 2  ;;  %v4247_v15 = vrot.slane %v7237_v42, 3 }
 0x6b5   :  { %4099 = vmatprep.subr.bf16.mxu1 %v4086_v50  ;;  %4143 = vmatprep.subr.bf16.mxu0 %v4078_v55  ;;  %v4080_v30 = vld [vmem:[#allocation2 + $0x18] sm:$0xff]  ;;  %v4087_v34 = vld [vmem:[#allocation2 + $0x50] sm:$0xff]  ;;  %v4090_v54 = vld [vmem:[#allocation2 + $0x68] sm:$0xff]  ;;  %v4302_v10 = vrot.slane %v7237_v42, 4  ;;  %v4357_v52 = vrot.slane %v7237_v42, 5  ;;  %vm4544_vm3 = vcmask 1041408  }
 0x6b6   :  { %4100 = vmatpush1.bf16.msra.mxu1 %v4085_v63  ;;  %4144 = vmatpush1.bf16.msra.mxu0 %v4077_v19  ;;  %v4079_v51 = vld [vmem:[#allocation2 + $0x10] sm:$0xff]  ;;  %v4082_v56 = vld [vmem:[#allocation2 + $0x28] sm:$0xff]  ;;  %v4089_v40 = vld [vmem:[#allocation2 + $0x60] sm:$0xff]  ;;  %vm4564_vm4 = vcmask 1024  }
 0x6b7   :  { %4101 = vmatprep.subr.bf16.mxu1 %v4088_v22  ;;  %4145 = vmatprep.subr.bf16.mxu0 %v4080_v30  ;;  %v4081_v35 = vld [vmem:[#allocation2 + $0x20] sm:$0xff]  ;;  %v4092_v9 = vld [vmem:[#allocation2 + $0x78] sm:$0xff]  ;;  %v4091_v27 = vld [vmem:[#allocation2 + $0x70] sm:$0xff] }
 0x6b8   :  { %v4084_v5 = vld [vmem:[#allocation2 + $0x38] sm:$0xff]  ;;  %v4083_v6 = vld [vmem:[#allocation2 + $0x30] sm:$0xff]  ;;  %v4185_v12 = vld [vmem:[#allocation2 + $0x88] sm:$0xff] }
 0x6b9   :  { %v4240_v37 = vld [vmem:[#allocation2 + $0xc8] sm:$0xff]  ;;  %v4184_v57 = vld [vmem:[#allocation2 + $0x80] sm:$0xff]  ;;  %v4187_v3 = vld [vmem:[#allocation2 + $0x98] sm:$0xff] }
 0x6ba   :  { %4102 = vmatpush1.bf16.msra.mxu1 %v4087_v34  ;;  %4146 = vmatpush1.bf16.msra.mxu0 %v4079_v51  ;;  %v4239_v59 = vld [vmem:[#allocation2 + $0xc0] sm:$0xff]  ;;  %v4242_v39 = vld [vmem:[#allocation2 + $0xd8] sm:$0xff]  ;;  %v4186_v41 = vld [vmem:[#allocation2 + $0x90] sm:$0xff] }
 0x6bb   :  { %4103 = vmatprep.subr.bf16.mxu1 %v4090_v54  ;;  %4147 = vmatprep.subr.bf16.mxu0 %v4082_v56  ;;  %v4241_v58 = vld [vmem:[#allocation2 + $0xd0] sm:$0xff]  ;;  %v4189_v43 = vld [vmem:[#allocation2 + $0xa8] sm:$0xff]  ;;  %v4188_v7 = vld [vmem:[#allocation2 + $0xa0] sm:$0xff]  ;;  %v4412_v56 = vrot.slane %v7237_v42, 6 }
 0x6bc   :  { %v4244_v47 = vld [vmem:[#allocation2 + $0xe8] sm:$0xff]  ;;  %v4243_v18 = vld [vmem:[#allocation2 + $0xe0] sm:$0xff]  ;;  %v4191_v60 = vld [vmem:[#allocation2 + $0xb8] sm:$0xff] }
 0x6bd   :  { %v4246_v61 = vld [vmem:[#allocation2 + $0xf8] sm:$0xff]  ;;  %v4190_v62 = vld [vmem:[#allocation2 + $0xb0] sm:$0xff]  ;;  %v4295_v44 = vld [vmem:[#allocation2 + $0x108] sm:$0xff] }
 0x6be   :  { %4104 = vmatpush1.bf16.msra.mxu1 %v4089_v40  ;;  %4148 = vmatpush1.bf16.msra.mxu0 %v4081_v35  ;;  %v4245_v11 = vld [vmem:[#allocation2 + $0xf0] sm:$0xff]  ;;  %v4350_v14 = vld [vmem:[#allocation2 + $0x148] sm:$0xff]  ;;  %v4294_v16 = vld [vmem:[#allocation2 + $0x100] sm:$0xff]  ;;  %v4467_v40 = vrot.slane %v7237_v42, 7 }
 0x6bf   :  { %4105 = vmatprep.subr.bf16.mxu1 %v4092_v9  ;;  %4149 = vmatprep.subr.bf16.mxu0 %v4084_v5  ;;  %v4349_v0 = vld [vmem:[#allocation2 + $0x140] sm:$0xff]  ;;  %v4297_v17 = vld [vmem:[#allocation2 + $0x118] sm:$0xff]  ;;  %v4296_v49 = vld [vmem:[#allocation2 + $0x110] sm:$0xff] }
 0x6c0   :  { %v4352_v38 = vld [vmem:[#allocation2 + $0x158] sm:$0xff]  ;;  %v4351_v1 = vld [vmem:[#allocation2 + $0x150] sm:$0xff]  ;;  %v4299_v33 = vld [vmem:[#allocation2 + $0x128] sm:$0xff] }
 0x6c1   :  { %v4354_v2 = vld [vmem:[#allocation2 + $0x168] sm:$0xff]  ;;  %v4298_v21 = vld [vmem:[#allocation2 + $0x120] sm:$0xff]  ;;  %v4301_v48 = vld [vmem:[#allocation2 + $0x138] sm:$0xff] }
 0x6c2   :  { %4106 = vmatpush1.bf16.msra.mxu1 %v4091_v27  ;;  %4150 = vmatpush1.bf16.msra.mxu0 %v4083_v6  ;;  %v4353_v20 = vld [vmem:[#allocation2 + $0x160] sm:$0xff]  ;;  %v4356_v13 = vld [vmem:[#allocation2 + $0x178] sm:$0xff]  ;;  %v4300_v24 = vld [vmem:[#allocation2 + $0x130] sm:$0xff] }
 0x6c3   :  { %4196 = vmatprep.subr.bf16.mxu1 %v4185_v12  ;;  %4251 = vmatprep.subr.bf16.mxu0 %v4240_v37  ;;  %v4355_v25 = vld [vmem:[#allocation2 + $0x170] sm:$0xff]  ;;  %v4405_v32 = vld [vmem:[#allocation2 + $0x188] sm:$0xff]  ;;  %v4404_v28 = vld [vmem:[#allocation2 + $0x180] sm:$0xff] }
 0x6c4   :  { %v4460_v36 = vld [vmem:[#allocation2 + $0x1c8] sm:$0xff]  ;;  %v4459_v31 = vld [vmem:[#allocation2 + $0x1c0] sm:$0xff]  ;;  %v4407_v26 = vld [vmem:[#allocation2 + $0x198] sm:$0xff] }
 0x6c5   :  { %5037 = vmatmul.mubr.msk.bf16.vlgmr.msra.gmra.mrb[76].mxu1 %vm4095_vm2, %v4094_v8  ;;  %5038 = vmatmul.mubr.msk.bf16.vlgmr.msra.gmra.mrb[48].mxu0 %vm4095_vm2, %v7237_v42  ;;  %v4462_v53 = vld [vmem:[#allocation2 + $0x1d8] sm:$0xff]  ;;  %v4406_v4 = vld [vmem:[#allocation2 + $0x190] sm:$0xff]  ;;  %v4409_v55 = vld [vmem:[#allocation2 + $0x1a8] sm:$0xff] }
 0x6c6   :  { %4197 = vmatpush1.bf16.msra.mxu1 %v4184_v57  ;;  %4252 = vmatpush1.bf16.msra.mxu0 %v4239_v59  ;;  %v4461_v50 = vld [vmem:[#allocation2 + $0x1d0] sm:$0xff]  ;;  %v4464_v63 = vld [vmem:[#allocation2 + $0x1e8] sm:$0xff]  ;;  %v4408_v19 = vld [vmem:[#allocation2 + $0x1a0] sm:$0xff] }
 0x6c7   :  { %4198 = vmatprep.subr.bf16.mxu1 %v4187_v3  ;;  %4253 = vmatprep.subr.bf16.mxu0 %v4242_v39  ;;  %v4463_v22 = vld [vmem:[#allocation2 + $0x1e0] sm:$0xff]  ;;  %v4411_v30 = vld [vmem:[#allocation2 + $0x1b8] sm:$0xff]  ;;  %v4410_v51 = vld [vmem:[#allocation2 + $0x1b0] sm:$0xff] }
 0x6c8   :  { %4228 = vmatprep.mubr.bf16.mxu1 %v7293_v46  ;;  %4283 = vmatprep.mubr.bf16.mxu0 %v7293_v46  ;;  %v4466_v34 = vld [vmem:[#allocation2 + $0x1f8] sm:$0xff]  ;;  %v4465_v54 = vld [vmem:[#allocation2 + $0x1f0] sm:$0xff] }
 0x6ca   :  { %4199 = vmatpush1.bf16.msra.mxu1 %v4186_v41  ;;  %4254 = vmatpush1.bf16.msra.mxu0 %v4241_v58 }
 0x6cb   :  { %4200 = vmatprep.subr.bf16.mxu1 %v4189_v43  ;;  %4255 = vmatprep.subr.bf16.mxu0 %v4244_v47 }
 0x6ce   :  { %4201 = vmatpush1.bf16.msra.mxu1 %v4188_v7  ;;  %4256 = vmatpush1.bf16.msra.mxu0 %v4243_v18 }
 0x6cf   :  { %4202 = vmatprep.subr.bf16.mxu1 %v4191_v60  ;;  %4257 = vmatprep.subr.bf16.mxu0 %v4246_v61 }
 0x6d2   :  { %4203 = vmatpush1.bf16.msra.mxu1 %v4190_v62  ;;  %4258 = vmatpush1.bf16.msra.mxu0 %v4245_v11 }
 0x6d3   :  { %4306 = vmatprep.subr.bf16.mxu1 %v4295_v44  ;;  %4361 = vmatprep.subr.bf16.mxu0 %v4350_v14 }
 0x6d5   :  { %5039 = vmatmul.mubr.msk.bf16.vlgmr.msra.gmra.mrb[80].mxu1 %vm4095_vm2, %v4192_v45  ;;  %5040 = vmatmul.mubr.msk.bf16.vlgmr.msra.gmra.mrb[52].mxu0 %vm4095_vm2, %v4247_v15 }
 0x6d6   :  { %4307 = vmatpush1.bf16.msra.mxu1 %v4294_v16  ;;  %4362 = vmatpush1.bf16.msra.mxu0 %v4349_v0 }
 0x6d7   :  { %4308 = vmatprep.subr.bf16.mxu1 %v4297_v17  ;;  %4363 = vmatprep.subr.bf16.mxu0 %v4352_v38 }
 0x6d8   :  { %4338 = vmatprep.mubr.bf16.mxu1 %v7293_v46  ;;  %4393 = vmatprep.mubr.bf16.mxu0 %v7293_v46 }
 0x6da   :  { %4309 = vmatpush1.bf16.msra.mxu1 %v4296_v49  ;;  %4364 = vmatpush1.bf16.msra.mxu0 %v4351_v1 }
 0x6db   :  { %4310 = vmatprep.subr.bf16.mxu1 %v4299_v33  ;;  %4365 = vmatprep.subr.bf16.mxu0 %v4354_v2  ;;  %v4514_v33 = vld [vmem:[%s7286_s11] sm:$0x3] }
 0x6de   :  { %4311 = vmatpush1.bf16.msra.mxu1 %v4298_v21  ;;  %4366 = vmatpush1.bf16.msra.mxu0 %v4353_v20 }
 0x6df   :  { %4312 = vmatprep.subr.bf16.mxu1 %v4301_v48  ;;  %4367 = vmatprep.subr.bf16.mxu0 %v4356_v13  ;;  %v4519_v48 = vrot.slane %v4514_v33, %v6594_v29 }
 0x6e2   :  { %4313 = vmatpush1.bf16.msra.mxu1 %v4300_v24  ;;  %4368 = vmatpush1.bf16.msra.mxu0 %v4355_v25 }
 0x6e3   :  { %4416 = vmatprep.subr.bf16.mxu1 %v4405_v32  ;;  %4471 = vmatprep.subr.bf16.mxu0 %v4460_v36  ;;  %v4523_v32 = vrot.slane %v4514_v33, %v6580_v23 }
 0x6e5   :  { %5041 = vmatmul.mubr.msk.bf16.vlgmr.msra.gmra.mrb[84].mxu1 %vm4095_vm2, %v4302_v10  ;;  %5042 = vmatmul.mubr.msk.bf16.vlgmr.msra.gmra.mrb[56].mxu0 %vm4095_vm2, %v4357_v52 }
 0x6e6   :  { %4417 = vmatpush1.bf16.msra.mxu1 %v4404_v28  ;;  %4472 = vmatpush1.bf16.msra.mxu0 %v4459_v31 }
 0x6e7   :  { %4418 = vmatprep.subr.bf16.mxu1 %v4407_v26  ;;  %4473 = vmatprep.subr.bf16.mxu0 %v4462_v53 }
 0x6e8   :  { %4448 = vmatprep.mubr.bf16.mxu1 %v7293_v46  ;;  %4503 = vmatprep.mubr.bf16.mxu0 %v7293_v46 }
 0x6ea   :  { %4419 = vmatpush1.bf16.msra.mxu1 %v4406_v4  ;;  %4474 = vmatpush1.bf16.msra.mxu0 %v4461_v50  ;;  %v4530_v50 = vld [vmem:[%s7287_s12] sm:$0x3] }
 0x6eb   :  { %4420 = vmatprep.subr.bf16.mxu1 %v4409_v55  ;;  %4475 = vmatprep.subr.bf16.mxu0 %v4464_v63  ;;  %v4535_v55 = vrot.slane %v4530_v50, %v6594_v29  ;;  %v4539_v63 = vrot.slane %v4530_v50, %v6580_v23 }
 0x6ee   :  { %4421 = vmatpush1.bf16.msra.mxu1 %v4408_v19  ;;  %4476 = vmatpush1.bf16.msra.mxu0 %v4463_v22 }
 0x6ef   :  { %4422 = vmatprep.subr.bf16.mxu1 %v4411_v30  ;;  %4477 = vmatprep.subr.bf16.mxu0 %v4466_v34 }
 0x6f2   :  { %4423 = vmatpush1.bf16.msra.mxu1 %v4410_v51  ;;  %4478 = vmatpush1.bf16.msra.mxu0 %v4465_v54 }
 0x6f5   :  { %5043 = vmatmul.mubr.msk.bf16.vlgmr.msra.gmra.mrb[88].mxu1 %vm4095_vm2, %v4412_v56  ;;  %5044 = vmatmul.mubr.msk.bf16.vlgmr.msra.gmra.mrb[60].mxu0 %vm4095_vm2, %v4467_v40  ;;  %v5045_v40 = vld [vmem:[#allocation4] ss:$0 sm:$0xff] }
 0x798   :  { %v4133_v46 = vpop.f32.mrb[76].mxu1  ;;  %v4177_v35 = vpop.f32.mrb[48].mxu0 }
 0x799   :  { %v4178_v9 = vadd.f32 %v4177_v35, %v4133_v46  ;;  %v4135_v5 = vpop.f32.mrb[77].mxu1  ;;  %v4179_v27 = vpop.f32.mrb[49].mxu0 }
 0x79a   :  { %v4180_v6 = vadd.f32 %v4179_v27, %v4135_v5  ;;  %v4137_v12 = vpop.f32.mrb[78].mxu1  ;;  %v4181_v37 = vpop.f32.mrb[50].mxu0 }
 0x79b   :  { %v4138_v8 = vpop.f32.mrb[79].mxu1  ;;  %v4182_v57 = vpop.f32.mrb[51].mxu0 }
 0x7a8   :  { %v4230_v59 = vpop.f32.mrb[80].mxu1  ;;  %v4285_v3 = vpop.f32.mrb[52].mxu0 }
 0x7a9   :  { %v4237_v39 = vadd.f32 %v4230_v59, %v4178_v9  ;;  %v4232_v42 = vpop.f32.mrb[81].mxu1  ;;  %v4287_v41 = vpop.f32.mrb[53].mxu0 }
 0x7aa   :  { %v4238_v58 = vadd.f32 %v4232_v42, %v4180_v6  ;;  %v4234_v43 = vpop.f32.mrb[82].mxu1  ;;  %v4289_v47 = vpop.f32.mrb[54].mxu0 }
 0x7ab   :  { %v4292_v7 = vadd.f32 %v4285_v3, %v4237_v39  ;;  %v4235_v18 = vpop.f32.mrb[83].mxu1  ;;  %v4290_v60 = vpop.f32.mrb[55].mxu0 }
 0x7ac   :  { %v4293_v61 = vadd.f32 %v4287_v41, %v4238_v58 }
 0x7b8   :  { %v4340_v62 = vpop.f32.mrb[84].mxu1  ;;  %v4395_v11 = vpop.f32.mrb[56].mxu0 }
 0x7b9   :  { %v4347_v44 = vadd.f32 %v4340_v62, %v4292_v7  ;;  %v4342_v14 = vpop.f32.mrb[85].mxu1  ;;  %v4397_v45 = vpop.f32.mrb[57].mxu0 }
 0x7ba   :  { %v4348_v15 = vadd.f32 %v4342_v14, %v4293_v61  ;;  %v4344_v16 = vpop.f32.mrb[86].mxu1  ;;  %v4399_v0 = vpop.f32.mrb[58].mxu0 }
 0x7bb   :  { %v4402_v17 = vadd.f32 %v4395_v11, %v4347_v44  ;;  %v4345_v38 = vpop.f32.mrb[87].mxu1  ;;  %v4400_v49 = vpop.f32.mrb[59].mxu0 }
 0x7bc   :  { %v4403_v1 = vadd.f32 %v4397_v45, %v4348_v15 }
 0x7c8   :  { %v4450_v2 = vpop.f32.mrb[88].mxu1  ;;  %v4505_v21 = vpop.f32.mrb[60].mxu0 }
 0x7c9   :  { %v4457_v20 = vadd.f32 %v4450_v2, %v4402_v17  ;;  %v4452_v13 = vpop.f32.mrb[89].mxu1  ;;  %v4507_v24 = vpop.f32.mrb[61].mxu0 }
 0x7ca   :  { %v4458_v25 = vadd.f32 %v4452_v13, %v4403_v1  ;;  %v4454_v36 = vpop.f32.mrb[90].mxu1  ;;  %v4509_v10 = vpop.f32.mrb[62].mxu0 }
 0x7cb   :  { %v4512_v52 = vadd.f32 %v4505_v21, %v4457_v20  ;;  %v4455_v28 = vpop.f32.mrb[91].mxu1  ;;  %v4510_v31 = vpop.f32.mrb[63].mxu0 }
 0x7cc   :  { %v4513_v26 = vadd.f32 %v4507_v24, %v4458_v25 }
 0x7cd   :  { %v4526_v53 = vadd.f32 %v4519_v48, %v4512_v52 }
 0x7ce   :  { %v4527_v4 = vadd.f32 %v4523_v32, %v4513_v26 }
 0x7cf   :  { %6042 = vtanh.f32 %v4526_v53 }
 0x7d0   :  { %6044 = vtanh.f32 %v4527_v4 }
 0x7d9   :  { %v6043_v19 = vpop.eup %6042 }
 0x7da   :  { %v6045_v22 = vpop.eup %6044  ;;  %v4542_v30 = vmul.f32 %v6043_v19, %v4535_v55 }
 0x7db   :  { %v4543_v34 = vmul.f32 %v6045_v22, %v4539_v63 }
 0x7dc   :  { %v4545_v51 = vsel %vm4544_vm3, %v4542_v30, 0.0 }
 0x7dd   :  { %v4546_v54 = vsel %vm4544_vm3, %v4543_v34, 0.0 }
 0x7de   :  { %v4547_v56 = vadd.f32 %v4546_v54, %v4545_v51 }
 0x7e0   :  { %4548 = vadd.xlane.f32.xlu0 %v4547_v56 }
 0x86d   :  { %v4549_v46 = vpop.xlane.xlu0 %4548 }
 0x86e   :  { %v4557_v35 = vadd.f32 %v5045_v40, %v4549_v46 }
 0x870   :  { %v5046_v9 = vmul.f32 -1.442695, %v4557_v35 }
 0x872   :  { %6046 = vpow2.f32 %v5046_v9 }
 0x87c   :  { %v6047_v5 = vpop.eup %6046 }
 0x87d   :  { %v4561_v27 = vadd.f32 1.0, %v6047_v5 }
 0x87f   :  { %6048 = vrcp.f32 %v4561_v27 }
 0x889   :  { %v6049_v29 = vpop.eup %6048 }
 0x88a   :  { %4565 = vst.msk [vmem:[%s7289_s14] sm:$0x3] %vm4564_vm4, %v6049_v29 }
 0x88b   :  { %4570 = vsyncmov [#allocation3] }
 0x88e   :  { %s4571_s27 = vpop.sfrf %4570 }
 0x88f   :  { %p5047_p0 = scmp.ne.s32.totalorder %s4571_s27, 0 }
 0x891   :  { %4575 = shalt.err (%p5047_p0)  }

</bundles_post_ra>
